<compile_context>
chip_gen: v6e
topology: v6e:2x2x1
jax: 0.10.0
libtpu: 0.0.40
codegen_flags: <defaults>
</compile_context>

<pallas_src>
import functools

import jax
import jax.numpy as jnp
from jax import lax
from jax.experimental import pallas as pl
from jax.experimental.pallas import tpu as pltpu

LANE = 128


def _round_up(x, m):
    return (x + m - 1) // m * m


def _silu(x):
    # exp and the approx reciprocal both run on the EUP slot -> VALU stays free.
    return x * pl.reciprocal(1.0 + jnp.exp(-x), approx=True)


# ----------------------------- fused Pallas kernel ------------------------- #

def fused_dwconv_kernel(x_hbm, dw_w_ref, dw_shift_ref, pw_w_ref, pw_shift_ref,
                        o_ref, xbuf, sem, *, ksize, th, out_w):
    """Depthwise KxK (stride 1) + BN + SiLU, then 1x1 conv + BN + SiLU, fused.

    x_hbm:        (N, Hp, Wp, Cpi) raw HBM ref (halo + lane padded); only the
                  halo rows of the current tile are DMA'd into `xbuf`.
    dw_w_ref:     (ksize, ksize, Cpi)   depthwise taps, BN scale pre-folded
    dw_shift_ref: (1, Cpi)              folded BatchNorm shift (eval mode)
    pw_w_ref:     (Cpi, Cpo) bf16       pointwise weights, BN scale pre-folded
    pw_shift_ref: (1, Cpo)
    o_ref:        (1, th, out_w, Cpo)
    xbuf:         VMEM (2, th+ksize-1, Wp, Cpi) double-buffered halo slabs
    sem:          DMA semaphores (2,)
    """
    i = pl.program_id(0)                   # batch element
    j = pl.program_id(1)                   # row tile within the batch element
    n_ht = pl.num_programs(1)
    thk = th + ksize - 1                   # rows per halo slab

    def slab_copy(tile, slot):
        row0 = tile * th
        if th % 8 == 0:
            row0 = pl.multiple_of(row0, 8)
        return pltpu.make_async_copy(
            x_hbm.at[i, pl.ds(row0, thk)], xbuf.at[slot], sem.at[slot])

    slot = j % 2

    # Prime the pipeline at the start of every batch element's row sweep.
    @pl.when(j == 0)
    def _():
        slab_copy(0, 0).start()

    # Wait for this tile's slab (started above at j==0, else prefetched at j-1).
    slab_copy(j, slot).wait()

    # Prefetch the next row tile while we compute on this one.
    @pl.when(j + 1 < n_ht)
    def _():
        slab_copy(j + 1, 1 - slot).start()

    slab = xbuf[slot]                                      # (thk, Wp, Cpi) f32
    cpi = slab.shape[-1]

    # ---- depthwise conv: KxK shifted-window MACs, f32 accumulate ----
    acc = jnp.zeros((th, out_w, cpi), jnp.float32)
    for kh in range(ksize):                                # static tap loops
        rows = slab[kh:kh + th]                            # (th, Wp, Cpi)
        for kw in range(ksize):
            # TODO(synk): move the kw shift onto the XLU slot with pltpu.roll
            # along W to avoid the sublane-offset relayout per tap.
            acc = acc + rows[:, kw:kw + out_w, :] * dw_w_ref[kh, kw, :]
    y = _silu(acc + dw_shift_ref[0, :])                    # (th, out_w, Cpi)

    # ---- pointwise 1x1 conv as an MXU matmul (bf16 operands, f32 acc) ----
    lhs = y.astype(jnp.bfloat16).reshape(th * out_w, cpi)
    z = jnp.dot(lhs, pw_w_ref[...], preferred_element_type=jnp.float32)
    z = _silu(z + pw_shift_ref[0, :])
    o_ref[0] = z.reshape(th, out_w, -1).astype(o_ref.dtype)


# ------------------------------- wrapper ----------------------------------- #

def _tile_vmem_bytes(th, w, wp, cpi, cpo, ksize):
    thk = th + ksize - 1
    return 4 * (2 * thk * wp * cpi          # double-buffered input halo slabs
                + 2 * th * w * cpo          # double-buffered output blocks
                + 3 * th * w * max(cpi, cpo))   # live intermediates (acc/y/z)


def _pick_th(h, w, wp, cpi, cpo, ksize, vmem_budget):
    """Row-tile height: as large as the VMEM budget allows, MXU-friendly rows."""
    th = 1
    for cand in range(1, h + 1):
        if _tile_vmem_bytes(cand, w, wp, cpi, cpo, ksize) > vmem_budget:
            break
        th = cand
        if cand * w >= 1024:                # LHS rows already MXU-friendly
            break
    while th > 1 and (th * w) % 8 != 0:     # keep matmul-LHS rows sublane-aligned
        th -= 1
    return th


def _vmem_capacity_bytes():
    cap = 64 * 1024 * 1024                  # conservative default (v7x per-TC)
    try:
        info_cap = int(pltpu.get_tpu_info().vmem_capacity_bytes)
        if 16 * 1024 * 1024 <= info_cap <= 1024 * 1024 * 1024:
            cap = info_cap
    except Exception:                       # best-effort hardware query
        pass
    return cap


def dwconv_forward(x_nchw, params, ksize, stride=1):
    """Forward pass equivalent to DWConv(in_c, out_c, ksize, stride, act='silu')."""
    assert stride == 1, "only stride=1 implemented"  # TODO(synk): general stride
    assert ksize % 2 == 1

    # TODO(synk): keep activations NHWC at the module boundary to drop these
    # full-tensor transposes.
    x = jnp.transpose(x_nchw, (0, 2, 3, 1))           # NCHW -> NHWC
    n, h, w, cin = x.shape
    cout = params["pw_w"].shape[1]
    pad = (ksize - 1) // 2

    cpi = _round_up(cin, LANE)                        # lane-dense channel dims
    cpo = _round_up(cout, LANE)
    wp = _round_up(w + 2 * pad, 8)                    # sublane-dense padded width

    vmem_cap = _vmem_capacity_bytes()
    th = _pick_th(h, w, wp, cpi, cpo, ksize, vmem_budget=int(vmem_cap * 0.35))
    n_ht = -(-h // th)                                # ceil(h / th)
    thk = th + ksize - 1
    hp = n_ht * th + (ksize - 1)                      # halo + tile-multiple rows

    # Spatial halo + channel lane padding in one HBM pass.  Padded rows/cols/
    # channels are exact zeros and are sliced off at the end.
    # TODO(synk): fold this pad into the kernel's manual DMA (clamped row
    # ranges + zero-filled slab) to drop the extra HBM round trip.
    xp = jnp.pad(x, ((0, 0),
                     (pad, hp - h - pad),
                     (pad, wp - w - pad),
                     (0, cpi - cin)))

    # Fold the BatchNorm scales into the (tiny) conv weights; keep the shift
    # padding explicitly zero so silu(0) == 0 in padded lanes.
    dw_w = params["dw_w"] * params["dw_scale"][0]
    dw_w = jnp.pad(dw_w, ((0, 0), (0, 0), (0, cpi - cin)))
    dw_shift = jnp.pad(params["dw_shift"], ((0, 0), (0, cpi - cin)))
    pw_w = params["pw_w"] * params["pw_scale"][0]
    pw_w = jnp.pad(pw_w, ((0, cpi - cin), (0, cpo - cout))).astype(jnp.bfloat16)
    pw_shift = jnp.pad(params["pw_shift"], ((0, 0), (0, cpo - cout)))

    # Generation-aware VMEM limit: actual working set + slack, floored at 32 MiB.
    need_bytes = (_tile_vmem_bytes(th, w, wp, cpi, cpo, ksize)
                  + 2 * (4 * (ksize * ksize * cpi + cpi + cpo) + 2 * cpi * cpo)
                  + (8 << 20))
    vmem_limit = max(32 << 20, min(need_bytes, int(vmem_cap * 0.7)))

    grid = (n, n_ht)

    out_p = pl.pallas_call(
        functools.partial(fused_dwconv_kernel, ksize=ksize, th=th, out_w=w),
        out_shape=jax.ShapeDtypeStruct((n, n_ht * th, w, cpo), x.dtype),
        grid=grid,
        in_specs=[
            # Raw HBM ref; the kernel DMAs only the halo rows each tile needs.
            pl.BlockSpec(memory_space=pl.ANY),
            # Constant-index operands (weights / shifts).
            # TODO(synk): pipeline_mode=pl.Buffered(1) to drop their 2nd buffer.
            pl.BlockSpec((ksize, ksize, cpi), lambda i, j: (0, 0, 0)),
            pl.BlockSpec((1, cpi), lambda i, j: (0, 0)),
            pl.BlockSpec((cpi, cpo), lambda i, j: (0, 0)),
            pl.BlockSpec((1, cpo), lambda i, j: (0, 0)),
        ],
        out_specs=pl.BlockSpec((1, th, w, cpo), lambda i, j: (i, j, 0, 0)),
        scratch_shapes=[
            pltpu.VMEM((2, thk, wp, cpi), x.dtype),   # double-buffered halo slabs
            pltpu.SemaphoreType.DMA((2,)),
        ],
        compiler_params=pltpu.CompilerParams(
            # Batch axis may shard across TensorCores (v7x megacore); the row
            # tile axis must stay sequential per core for the prefetch chain.
            dimension_semantics=("parallel", "arbitrary"),
            vmem_limit_bytes=int(vmem_limit),
        ),
    )(xp, dw_w, dw_shift, pw_w, pw_shift)

    out = out_p[:, :h, :, :cout]                      # drop tile / lane padding
    return jnp.transpose(out, (0, 3, 1, 2))           # NHWC -> NCHW


# ----------------------- deterministic parameter init ---------------------- #

def init_params(key, in_channels, out_channels, ksize, eps=1e-5):
    k_dw, k_pw = jax.random.split(key)
    fan_dw = ksize * ksize  # depthwise: in_channels/groups = 1
    bound_dw = 1.0 / jnp.sqrt(fan_dw)
    dw_w = jax.random.uniform(k_dw, (ksize, ksize, in_channels),
                              minval=-bound_dw, maxval=bound_dw,
                              dtype=jnp.float32)
    fan_pw = in_channels
    bound_pw = 1.0 / jnp.sqrt(fan_pw)
    pw_w = jax.random.uniform(k_pw, (in_channels, out_channels),
                              minval=-bound_pw, maxval=bound_pw,
                              dtype=jnp.float32)
    # BatchNorm (eval mode, default running stats) folded into scale/shift.
    gamma_dw = jnp.ones((in_channels,), jnp.float32)
    beta_dw = jnp.zeros((in_channels,), jnp.float32)
    mean_dw = jnp.zeros((in_channels,), jnp.float32)
    var_dw = jnp.ones((in_channels,), jnp.float32)
    dw_scale = (gamma_dw / jnp.sqrt(var_dw + eps)).reshape(1, -1)
    dw_shift = (beta_dw - mean_dw * dw_scale[0]).reshape(1, -1)

    gamma_pw = jnp.ones((out_channels,), jnp.float32)
    beta_pw = jnp.zeros((out_channels,), jnp.float32)
    mean_pw = jnp.zeros((out_channels,), jnp.float32)
    var_pw = jnp.ones((out_channels,), jnp.float32)
    pw_scale = (gamma_pw / jnp.sqrt(var_pw + eps)).reshape(1, -1)
    pw_shift = (beta_pw - mean_pw * pw_scale[0]).reshape(1, -1)

    return dict(dw_w=dw_w, dw_scale=dw_scale, dw_shift=dw_shift,
                pw_w=pw_w, pw_scale=pw_scale, pw_shift=pw_shift)


# ------------------------------ pure-JAX reference -------------------------- #

def reference_forward(x_nchw, params, ksize):
    x = jnp.transpose(x_nchw, (0, 2, 3, 1))
    c = x.shape[-1]
    pad = (ksize - 1) // 2
    w_hwio = params["dw_w"].reshape(ksize, ksize, 1, c)
    y = lax.conv_general_dilated(
        x, w_hwio, window_strides=(1, 1), padding=((pad, pad), (pad, pad)),
        dimension_numbers=("NHWC", "HWIO", "NHWC"), feature_group_count=c)
    y = y * params["dw_scale"][0] + params["dw_shift"][0]
    y = jax.nn.silu(y)
    z = jnp.einsum("nhwc,cd->nhwd", y, params["pw_w"])
    z = z * params["pw_scale"][0] + params["pw_shift"][0]
    z = jax.nn.silu(z)
    return jnp.transpose(z, (0, 3, 1, 2))


if __name__ == "__main__":
    in_channels, out_channels, ksize = 4, 8, 3
    key = jax.random.PRNGKey(0)
    kx, kp = jax.random.split(key)

    x = jax.random.normal(kx, (2, in_channels, 16, 16), dtype=jnp.float32)  # NCHW
    params = init_params(kp, in_channels, out_channels, ksize)

    out = jax.block_until_ready(dwconv_forward(x, params, ksize))
    ref = jax.block_until_ready(reference_forward(x, params, ksize))

    assert out.shape == (2, out_channels, 16, 16), out.shape
    max_err = float(jnp.max(jnp.abs(out - ref)))
    # Tolerance covers the bf16 MXU operands of the pointwise matmul plus the
    # EUP approx-reciprocal SiLU, vs the exact f32 reference.
    assert jnp.allclose(out, ref, atol=3e-2, rtol=3e-2), max_err

    print("KERNEL_OK")
</pallas_src>

<mosaic_0001>
module attributes {stable_mosaic.version = 11 : i64} {
  func.func @fused_dwconv_kernel(%arg0: i32, %arg1: i32, %arg2: memref<2x18x24x128xf32, #tpu.memory_space<any>>, %arg3: memref<3x3x128xf32, #tpu.memory_space<vmem>>, %arg4: memref<1x128xf32, #tpu.memory_space<vmem>>, %arg5: memref<128x128xbf16, #tpu.memory_space<vmem>>, %arg6: memref<1x128xf32, #tpu.memory_space<vmem>>, %arg7: memref<1x16x16x128xf32, #tpu.memory_space<vmem>>, %arg8: memref<2x18x24x128xf32, #tpu.memory_space<vmem>>, %arg9: memref<2x!tpu.dma_semaphore, #tpu.memory_space<semaphore_mem>>) attributes {dimension_semantics = [#tpu.dimension_semantics<parallel>, #tpu.dimension_semantics<arbitrary>], iteration_bounds = array<i64: 2, 1>, scalar_prefetch = 0 : i64, scratch_operands = 2 : i64, tpu.core_type = #tpu.core_type<tc>, window_params = [{}, {pipeline_mode = #tpu.pipeline_mode<synchronous>, transform_indices = @transform_1, window_bounds = array<i64: 3, 3, 128>}, {pipeline_mode = #tpu.pipeline_mode<synchronous>, transform_indices = @transform_2, window_bounds = array<i64: 1, 128>}, {pipeline_mode = #tpu.pipeline_mode<synchronous>, transform_indices = @transform_3, window_bounds = array<i64: 128, 128>}, {pipeline_mode = #tpu.pipeline_mode<synchronous>, transform_indices = @transform_4, window_bounds = array<i64: 1, 128>}, {transform_indices = @transform_5, window_bounds = array<i64: 1, 16, 16, 128>}]} {
    %c2_i32 = arith.constant 2 : i32
    %c0_i32 = arith.constant 0 : i32
    %0 = arith.cmpi eq, %c2_i32, %c0_i32 : i32
    %c1_i32 = arith.constant 1 : i32
    %1 = arith.select %0, %c1_i32, %c2_i32 : i32
    %2 = arith.remsi %arg1, %1 : i32
    %c0_i32_0 = arith.constant 0 : i32
    %3 = arith.cmpi ne, %2, %c0_i32_0 : i32
    %c0_i32_1 = arith.constant 0 : i32
    %4 = arith.cmpi slt, %2, %c0_i32_1 : i32
    %c0_i32_2 = arith.constant 0 : i32
    %5 = arith.cmpi slt, %1, %c0_i32_2 : i32
    %6 = arith.xori %4, %5 : i1
    %7 = arith.andi %6, %3 : i1
    %8 = arith.addi %2, %1 : i32
    %9 = arith.select %7, %8, %2 : i32
    %c0_i32_3 = arith.constant 0 : i32
    %10 = arith.cmpi eq, %arg1, %c0_i32_3 : i32
    %11 = arith.extui %10 : i1 to i32
    %c0_i32_4 = arith.constant 0 : i32
    %12 = arith.cmpi ne, %11, %c0_i32_4 : i32
    scf.if %12 {
      %c0_i32_55 = arith.constant 0 : i32
      %127 = tpu.assume_multiple %c0_i32_55, 8 : i32
      %c0_i32_56 = arith.constant 0 : i32
      %c0_i32_57 = arith.constant 0 : i32
      %c0_i32_58 = arith.constant 0 : i32
      %c0_i32_59 = arith.constant 0 : i32
      %128 = tpu.memref_slice %arg2[%arg0, %127, %c0_i32_58, %c0_i32_59] : memref<2x18x24x128xf32, #tpu.memory_space<any>> -> memref<1x18x24x128xf32, #tpu.memory_space<any>>
      %129 = tpu.memref_squeeze %128 : memref<1x18x24x128xf32, #tpu.memory_space<any>> -> memref<18x24x128xf32, #tpu.memory_space<any>>
      %c0_i32_60 = arith.constant 0 : i32
      %c0_i32_61 = arith.constant 0 : i32
      %c0_i32_62 = arith.constant 0 : i32
      %130 = tpu.memref_slice %arg8[%c0_i32_56, %c0_i32_60, %c0_i32_61, %c0_i32_62] : memref<2x18x24x128xf32, #tpu.memory_space<vmem>> -> memref<1x18x24x128xf32, #tpu.memory_space<vmem>>
      %131 = tpu.memref_squeeze %130 : memref<1x18x24x128xf32, #tpu.memory_space<vmem>> -> memref<18x24x128xf32, #tpu.memory_space<vmem>>
      %132 = tpu.memref_slice %arg9[%c0_i32_57] : memref<2x!tpu.dma_semaphore, #tpu.memory_space<semaphore_mem>> -> memref<1x!tpu.dma_semaphore, #tpu.memory_space<semaphore_mem>>
      %133 = tpu.memref_squeeze %132 : memref<1x!tpu.dma_semaphore, #tpu.memory_space<semaphore_mem>> -> memref<!tpu.dma_semaphore, #tpu.memory_space<semaphore_mem>>
      tpu.enqueue_dma source(%129 : memref<18x24x128xf32, #tpu.memory_space<any>>) target(%131 : memref<18x24x128xf32, #tpu.memory_space<vmem>>) target_semaphore(%133 : memref<!tpu.dma_semaphore, #tpu.memory_space<semaphore_mem>>)
    } else {
    }
    %c16_i32 = arith.constant 16 : i32
    %13 = arith.muli %arg1, %c16_i32 : i32
    %14 = tpu.assume_multiple %13, 8 : i32
    %c0_i32_5 = arith.constant 0 : i32
    %c0_i32_6 = arith.constant 0 : i32
    %15 = tpu.memref_slice %arg2[%arg0, %14, %c0_i32_5, %c0_i32_6] : memref<2x18x24x128xf32, #tpu.memory_space<any>> -> memref<1x18x24x128xf32, #tpu.memory_space<any>>
    %16 = tpu.memref_squeeze %15 : memref<1x18x24x128xf32, #tpu.memory_space<any>> -> memref<18x24x128xf32, #tpu.memory_space<any>>
    %c0_i32_7 = arith.constant 0 : i32
    %c0_i32_8 = arith.constant 0 : i32
    %c0_i32_9 = arith.constant 0 : i32
    %17 = tpu.memref_slice %arg8[%9, %c0_i32_7, %c0_i32_8, %c0_i32_9] : memref<2x18x24x128xf32, #tpu.memory_space<vmem>> -> memref<1x18x24x128xf32, #tpu.memory_space<vmem>>
    %18 = tpu.memref_squeeze %17 : memref<1x18x24x128xf32, #tpu.memory_space<vmem>> -> memref<18x24x128xf32, #tpu.memory_space<vmem>>
    %19 = tpu.memref_slice %arg9[%9] : memref<2x!tpu.dma_semaphore, #tpu.memory_space<semaphore_mem>> -> memref<1x!tpu.dma_semaphore, #tpu.memory_space<semaphore_mem>>
    %20 = tpu.memref_squeeze %19 : memref<1x!tpu.dma_semaphore, #tpu.memory_space<semaphore_mem>> -> memref<!tpu.dma_semaphore, #tpu.memory_space<semaphore_mem>>
    tpu.wait_dma2 semaphore(%20 : memref<!tpu.dma_semaphore, #tpu.memory_space<semaphore_mem>>) src(%16 : memref<18x24x128xf32, #tpu.memory_space<any>>) dst(%18 : memref<18x24x128xf32, #tpu.memory_space<vmem>>)
    %c1_i32_10 = arith.constant 1 : i32
    %21 = arith.addi %arg1, %c1_i32_10 : i32
    %c1_i32_11 = arith.constant 1 : i32
    %22 = arith.cmpi slt, %21, %c1_i32_11 : i32
    %23 = arith.extui %22 : i1 to i32
    %c0_i32_12 = arith.constant 0 : i32
    %24 = arith.cmpi ne, %23, %c0_i32_12 : i32
    scf.if %24 {
      %c1_i32_55 = arith.constant 1 : i32
      %127 = arith.addi %arg1, %c1_i32_55 : i32
      %c1_i32_56 = arith.constant 1 : i32
      %128 = arith.subi %c1_i32_56, %9 : i32
      %c16_i32_57 = arith.constant 16 : i32
      %129 = arith.muli %127, %c16_i32_57 : i32
      %130 = tpu.assume_multiple %129, 8 : i32
      %c0_i32_58 = arith.constant 0 : i32
      %c0_i32_59 = arith.constant 0 : i32
      %131 = tpu.memref_slice %arg2[%arg0, %130, %c0_i32_58, %c0_i32_59] : memref<2x18x24x128xf32, #tpu.memory_space<any>> -> memref<1x18x24x128xf32, #tpu.memory_space<any>>
      %132 = tpu.memref_squeeze %131 : memref<1x18x24x128xf32, #tpu.memory_space<any>> -> memref<18x24x128xf32, #tpu.memory_space<any>>
      %c0_i32_60 = arith.constant 0 : i32
      %c0_i32_61 = arith.constant 0 : i32
      %c0_i32_62 = arith.constant 0 : i32
      %133 = tpu.memref_slice %arg8[%128, %c0_i32_60, %c0_i32_61, %c0_i32_62] : memref<2x18x24x128xf32, #tpu.memory_space<vmem>> -> memref<1x18x24x128xf32, #tpu.memory_space<vmem>>
      %134 = tpu.memref_squeeze %133 : memref<1x18x24x128xf32, #tpu.memory_space<vmem>> -> memref<18x24x128xf32, #tpu.memory_space<vmem>>
      %135 = tpu.memref_slice %arg9[%128] : memref<2x!tpu.dma_semaphore, #tpu.memory_space<semaphore_mem>> -> memref<1x!tpu.dma_semaphore, #tpu.memory_space<semaphore_mem>>
      %136 = tpu.memref_squeeze %135 : memref<1x!tpu.dma_semaphore, #tpu.memory_space<semaphore_mem>> -> memref<!tpu.dma_semaphore, #tpu.memory_space<semaphore_mem>>
      tpu.enqueue_dma source(%132 : memref<18x24x128xf32, #tpu.memory_space<any>>) target(%134 : memref<18x24x128xf32, #tpu.memory_space<vmem>>) target_semaphore(%136 : memref<!tpu.dma_semaphore, #tpu.memory_space<semaphore_mem>>)
    } else {
    }
    %25 = arith.index_cast %9 : i32 to index
    %c0 = arith.constant 0 : index
    %c0_13 = arith.constant 0 : index
    %c0_14 = arith.constant 0 : index
    %26 = vector.load %arg8[%25, %c0, %c0_13, %c0_14] : memref<2x18x24x128xf32, #tpu.memory_space<vmem>>, vector<1x18x24x128xf32>
    %27 = vector.shape_cast %26 : vector<1x18x24x128xf32> to vector<18x24x128xf32>
    %cst = arith.constant 0.000000e+00 : f32
    %28 = vector.broadcast %cst : f32 to vector<16x16x128xf32>
    %29 = vector.extract_strided_slice %27 {offsets = [0, 0, 0], sizes = [16, 24, 128], strides = [1, 1, 1]} : vector<18x24x128xf32> to vector<16x24x128xf32>
    %30 = vector.extract_strided_slice %29 {offsets = [0, 0, 0], sizes = [16, 16, 128], strides = [1, 1, 1]} : vector<16x24x128xf32> to vector<16x16x128xf32>
    %c0_15 = arith.constant 0 : index
    %c0_16 = arith.constant 0 : index
    %c0_17 = arith.constant 0 : index
    %31 = vector.load %arg3[%c0_15, %c0_16, %c0_17] : memref<3x3x128xf32, #tpu.memory_space<vmem>>, vector<1x1x128xf32>
    %32 = vector.shape_cast %31 : vector<1x1x128xf32> to vector<128xf32>
    %33 = vector.shape_cast %32 : vector<128xf32> to vector<1x1x128xf32>
    %34 = vector.broadcast %33 : vector<1x1x128xf32> to vector<16x16x128xf32>
    %35 = arith.mulf %30, %34 : vector<16x16x128xf32>
    %36 = arith.addf %28, %35 : vector<16x16x128xf32>
    %37 = vector.extract_strided_slice %29 {offsets = [0, 1, 0], sizes = [16, 16, 128], strides = [1, 1, 1]} : vector<16x24x128xf32> to vector<16x16x128xf32>
    %c0_18 = arith.constant 0 : index
    %c1 = arith.constant 1 : index
    %c0_19 = arith.constant 0 : index
    %38 = vector.load %arg3[%c0_18, %c1, %c0_19] : memref<3x3x128xf32, #tpu.memory_space<vmem>>, vector<1x1x128xf32>
    %39 = vector.shape_cast %38 : vector<1x1x128xf32> to vector<128xf32>
    %40 = vector.shape_cast %39 : vector<128xf32> to vector<1x1x128xf32>
    %41 = vector.broadcast %40 : vector<1x1x128xf32> to vector<16x16x128xf32>
    %42 = arith.mulf %37, %41 : vector<16x16x128xf32>
    %43 = arith.addf %36, %42 : vector<16x16x128xf32>
    %44 = vector.extract_strided_slice %29 {offsets = [0, 2, 0], sizes = [16, 16, 128], strides = [1, 1, 1]} : vector<16x24x128xf32> to vector<16x16x128xf32>
    %c0_20 = arith.constant 0 : index
    %c2 = arith.constant 2 : index
    %c0_21 = arith.constant 0 : index
    %45 = vector.load %arg3[%c0_20, %c2, %c0_21] : memref<3x3x128xf32, #tpu.memory_space<vmem>>, vector<1x1x128xf32>
    %46 = vector.shape_cast %45 : vector<1x1x128xf32> to vector<128xf32>
    %47 = vector.shape_cast %46 : vector<128xf32> to vector<1x1x128xf32>
    %48 = vector.broadcast %47 : vector<1x1x128xf32> to vector<16x16x128xf32>
    %49 = arith.mulf %44, %48 : vector<16x16x128xf32>
    %50 = arith.addf %43, %49 : vector<16x16x128xf32>
    %51 = vector.extract_strided_slice %27 {offsets = [1, 0, 0], sizes = [16, 24, 128], strides = [1, 1, 1]} : vector<18x24x128xf32> to vector<16x24x128xf32>
    %52 = vector.extract_strided_slice %51 {offsets = [0, 0, 0], sizes = [16, 16, 128], strides = [1, 1, 1]} : vector<16x24x128xf32> to vector<16x16x128xf32>
    %c1_22 = arith.constant 1 : index
    %c0_23 = arith.constant 0 : index
    %c0_24 = arith.constant 0 : index
    %53 = vector.load %arg3[%c1_22, %c0_23, %c0_24] : memref<3x3x128xf32, #tpu.memory_space<vmem>>, vector<1x1x128xf32>
    %54 = vector.shape_cast %53 : vector<1x1x128xf32> to vector<128xf32>
    %55 = vector.shape_cast %54 : vector<128xf32> to vector<1x1x128xf32>
    %56 = vector.broadcast %55 : vector<1x1x128xf32> to vector<16x16x128xf32>
    %57 = arith.mulf %52, %56 : vector<16x16x128xf32>
    %58 = arith.addf %50, %57 : vector<16x16x128xf32>
    %59 = vector.extract_strided_slice %51 {offsets = [0, 1, 0], sizes = [16, 16, 128], strides = [1, 1, 1]} : vector<16x24x128xf32> to vector<16x16x128xf32>
    %c1_25 = arith.constant 1 : index
    %c1_26 = arith.constant 1 : index
    %c0_27 = arith.constant 0 : index
    %60 = vector.load %arg3[%c1_25, %c1_26, %c0_27] : memref<3x3x128xf32, #tpu.memory_space<vmem>>, vector<1x1x128xf32>
    %61 = vector.shape_cast %60 : vector<1x1x128xf32> to vector<128xf32>
    %62 = vector.shape_cast %61 : vector<128xf32> to vector<1x1x128xf32>
    %63 = vector.broadcast %62 : vector<1x1x128xf32> to vector<16x16x128xf32>
    %64 = arith.mulf %59, %63 : vector<16x16x128xf32>
    %65 = arith.addf %58, %64 : vector<16x16x128xf32>
    %66 = vector.extract_strided_slice %51 {offsets = [0, 2, 0], sizes = [16, 16, 128], strides = [1, 1, 1]} : vector<16x24x128xf32> to vector<16x16x128xf32>
    %c1_28 = arith.constant 1 : index
    %c2_29 = arith.constant 2 : index
    %c0_30 = arith.constant 0 : index
    %67 = vector.load %arg3[%c1_28, %c2_29, %c0_30] : memref<3x3x128xf32, #tpu.memory_space<vmem>>, vector<1x1x128xf32>
    %68 = vector.shape_cast %67 : vector<1x1x128xf32> to vector<128xf32>
    %69 = vector.shape_cast %68 : vector<128xf32> to vector<1x1x128xf32>
    %70 = vector.broadcast %69 : vector<1x1x128xf32> to vector<16x16x128xf32>
    %71 = arith.mulf %66, %70 : vector<16x16x128xf32>
    %72 = arith.addf %65, %71 : vector<16x16x128xf32>
    %73 = vector.extract_strided_slice %27 {offsets = [2, 0, 0], sizes = [16, 24, 128], strides = [1, 1, 1]} : vector<18x24x128xf32> to vector<16x24x128xf32>
    %74 = vector.extract_strided_slice %73 {offsets = [0, 0, 0], sizes = [16, 16, 128], strides = [1, 1, 1]} : vector<16x24x128xf32> to vector<16x16x128xf32>
    %c2_31 = arith.constant 2 : index
    %c0_32 = arith.constant 0 : index
    %c0_33 = arith.constant 0 : index
    %75 = vector.load %arg3[%c2_31, %c0_32, %c0_33] : memref<3x3x128xf32, #tpu.memory_space<vmem>>, vector<1x1x128xf32>
    %76 = vector.shape_cast %75 : vector<1x1x128xf32> to vector<128xf32>
    %77 = vector.shape_cast %76 : vector<128xf32> to vector<1x1x128xf32>
    %78 = vector.broadcast %77 : vector<1x1x128xf32> to vector<16x16x128xf32>
    %79 = arith.mulf %74, %78 : vector<16x16x128xf32>
    %80 = arith.addf %72, %79 : vector<16x16x128xf32>
    %81 = vector.extract_strided_slice %73 {offsets = [0, 1, 0], sizes = [16, 16, 128], strides = [1, 1, 1]} : vector<16x24x128xf32> to vector<16x16x128xf32>
    %c2_34 = arith.constant 2 : index
    %c1_35 = arith.constant 1 : index
    %c0_36 = arith.constant 0 : index
    %82 = vector.load %arg3[%c2_34, %c1_35, %c0_36] : memref<3x3x128xf32, #tpu.memory_space<vmem>>, vector<1x1x128xf32>
    %83 = vector.shape_cast %82 : vector<1x1x128xf32> to vector<128xf32>
    %84 = vector.shape_cast %83 : vector<128xf32> to vector<1x1x128xf32>
    %85 = vector.broadcast %84 : vector<1x1x128xf32> to vector<16x16x128xf32>
    %86 = arith.mulf %81, %85 : vector<16x16x128xf32>
    %87 = arith.addf %80, %86 : vector<16x16x128xf32>
    %88 = vector.extract_strided_slice %73 {offsets = [0, 2, 0], sizes = [16, 16, 128], strides = [1, 1, 1]} : vector<16x24x128xf32> to vector<16x16x128xf32>
    %c2_37 = arith.constant 2 : index
    %c2_38 = arith.constant 2 : index
    %c0_39 = arith.constant 0 : index
    %89 = vector.load %arg3[%c2_37, %c2_38, %c0_39] : memref<3x3x128xf32, #tpu.memory_space<vmem>>, vector<1x1x128xf32>
    %90 = vector.shape_cast %89 : vector<1x1x128xf32> to vector<128xf32>
    %91 = vector.shape_cast %90 : vector<128xf32> to vector<1x1x128xf32>
    %92 = vector.broadcast %91 : vector<1x1x128xf32> to vector<16x16x128xf32>
    %93 = arith.mulf %88, %92 : vector<16x16x128xf32>
    %94 = arith.addf %87, %93 : vector<16x16x128xf32>
    %c0_40 = arith.constant 0 : index
    %c0_41 = arith.constant 0 : index
    %95 = vector.load %arg4[%c0_40, %c0_41] : memref<1x128xf32, #tpu.memory_space<vmem>>, vector<1x128xf32>
    %96 = vector.shape_cast %95 : vector<1x128xf32> to vector<128xf32>
    %97 = vector.shape_cast %96 : vector<128xf32> to vector<1x1x128xf32>
    %98 = vector.broadcast %97 : vector<1x1x128xf32> to vector<16x16x128xf32>
    %99 = arith.addf %94, %98 : vector<16x16x128xf32>
    %cst_42 = arith.constant 0.000000e+00 : f32
    %100 = vector.broadcast %cst_42 : f32 to vector<16x16x128xf32>
    %101 = arith.subf %100, %99 : vector<16x16x128xf32>
    %102 = math.exp %101 : vector<16x16x128xf32>
    %cst_43 = arith.constant 1.000000e+00 : f32
    %103 = vector.broadcast %cst_43 : f32 to vector<16x16x128xf32>
    %104 = arith.addf %103, %102 : vector<16x16x128xf32>
    %105 = tpu.reciprocal %104 {approx = true} : vector<16x16x128xf32> -> vector<16x16x128xf32>
    %106 = arith.mulf %99, %105 : vector<16x16x128xf32>
    %107 = arith.truncf %106 : vector<16x16x128xf32> to vector<16x16x128xbf16>
    %108 = vector.shape_cast %107 : vector<16x16x128xbf16> to vector<256x128xbf16>
    %c0_44 = arith.constant 0 : index
    %c0_45 = arith.constant 0 : index
    %109 = vector.load %arg5[%c0_44, %c0_45] : memref<128x128xbf16, #tpu.memory_space<vmem>>, vector<128x128xbf16>
    %cst_46 = arith.constant dense<0.000000e+00> : vector<256x128xf32>
    %110 = tpu.matmul %108, %109, %cst_46 {dimension_numbers = #tpu.dot_dimension_numbers<[1], [0], [0], [1], [0, 0, 1, 1], [], []>} : vector<256x128xbf16>, vector<128x128xbf16>, vector<256x128xf32> -> vector<256x128xf32>
    %c0_47 = arith.constant 0 : index
    %c0_48 = arith.constant 0 : index
    %111 = vector.load %arg6[%c0_47, %c0_48] : memref<1x128xf32, #tpu.memory_space<vmem>>, vector<1x128xf32>
    %112 = vector.shape_cast %111 : vector<1x128xf32> to vector<128xf32>
    %113 = vector.shape_cast %112 : vector<128xf32> to vector<1x128xf32>
    %114 = vector.broadcast %113 : vector<1x128xf32> to vector<256x128xf32>
    %115 = arith.addf %110, %114 : vector<256x128xf32>
    %cst_49 = arith.constant 0.000000e+00 : f32
    %116 = vector.broadcast %cst_49 : f32 to vector<256x128xf32>
    %117 = arith.subf %116, %115 : vector<256x128xf32>
    %118 = math.exp %117 : vector<256x128xf32>
    %cst_50 = arith.constant 1.000000e+00 : f32
    %119 = vector.broadcast %cst_50 : f32 to vector<256x128xf32>
    %120 = arith.addf %119, %118 : vector<256x128xf32>
    %121 = tpu.reciprocal %120 {approx = true} : vector<256x128xf32> -> vector<256x128xf32>
    %122 = arith.mulf %115, %121 : vector<256x128xf32>
    %123 = vector.shape_cast %122 : vector<256x128xf32> to vector<16x16x128xf32>
    %c0_51 = arith.constant 0 : index
    %c0_52 = arith.constant 0 : index
    %c0_53 = arith.constant 0 : index
    %c0_54 = arith.constant 0 : index
    %124 = vector.load %arg7[%c0_51, %c0_52, %c0_53, %c0_54] : memref<1x16x16x128xf32, #tpu.memory_space<vmem>>, vector<1x16x16x128xf32>
    %125 = vector.shape_cast %124 : vector<1x16x16x128xf32> to vector<16x16x128xf32>
    %126 = vector.shape_cast %123 : vector<16x16x128xf32> to vector<1x16x16x128xf32>
    tpu.vector_store %arg7[%c0_51, %c0_52, %c0_53, %c0_54], %126 {strides = array<i32>} : memref<1x16x16x128xf32, #tpu.memory_space<vmem>>, vector<1x16x16x128xf32>,
    return
  }
  func.func @transform_1(%arg0: i32, %arg1: i32) -> (i32, i32, i32) {
    %c0_i32 = arith.constant 0 : i32
    %c0_i32_0 = arith.constant 0 : i32
    %c0_i32_1 = arith.constant 0 : i32
    %c0_i32_2 = arith.constant 0 : i32
    return %c0_i32, %c0_i32_0, %c0_i32_1 : i32, i32, i32
  }
  func.func @transform_2(%arg0: i32, %arg1: i32) -> (i32, i32) {
    %c0_i32 = arith.constant 0 : i32
    %c0_i32_0 = arith.constant 0 : i32
    %c0_i32_1 = arith.constant 0 : i32
    return %c0_i32, %c0_i32_0 : i32, i32
  }
  func.func @transform_3(%arg0: i32, %arg1: i32) -> (i32, i32) {
    %c0_i32 = arith.constant 0 : i32
    %c0_i32_0 = arith.constant 0 : i32
    %c0_i32_1 = arith.constant 0 : i32
    return %c0_i32, %c0_i32_0 : i32, i32
  }
  func.func @transform_4(%arg0: i32, %arg1: i32) -> (i32, i32) {
    %c0_i32 = arith.constant 0 : i32
    %c0_i32_0 = arith.constant 0 : i32
    %c0_i32_1 = arith.constant 0 : i32
    return %c0_i32, %c0_i32_0 : i32, i32
  }
  func.func @transform_5(%arg0: i32, %arg1: i32) -> (i32, i32, i32, i32) {
    %c0_i32 = arith.constant 0 : i32
    %c0_i32_0 = arith.constant 0 : i32
    %c0_i32_1 = arith.constant 0 : i32
    return %arg0, %arg1, %c0_i32, %c0_i32_0 : i32, i32, i32, i32
  }
}

</mosaic_0001>

<bundles_post_ra>
// kernel: tpu_custom_call.1
= control target key start
LH: loop header
LB: loop body
LE: loop exit
PB: predicated region body
PF: predicated region fallthrough
CT: control target
= control target key end

     0   :  { %10 = vsyncpa [#allocation5], 0  ;;  %s5081_s0 = inlined_call_operand.hbm [shape: f32[2,18,24,128], index: 0, kind: input, shape index: {}]   ;;  %s5082_s1 = inlined_call_operand.hbm [shape: f32[3,3,128], index: 1, kind: input, shape index: {}]   ;;  %s5083_s2 = inlined_call_operand.vmem [shape: f32[1,128], index: 2, kind: input, shape index: {}]   ;;  %s5084_s3 = inlined_call_operand.hbm [shape: bf16[128,128], index: 3, kind: input, shape index: {}]   ;;  %s5085_s4 = inlined_call_operand.vmem [shape: f32[1,128], index: 4, kind: input, shape index: {}]   ;;  %s5086_s5 = inlined_call_operand.hbm [shape: f32[2,16,16,128], index: 5, kind: output, shape index: {}]  }
   0x1   :  { %11 = vsyncpa [#allocation8], 0 }
   0x2   :  { %12 = vsyncpa [#allocation6], 0 }
   0x3   :  { %14 = vsyncpa [#allocation6 + $0x1], 0  ;;  %s3553_s18 = smov 0   ;;  %s3555_s19 = smov 0  }
   0x4   :  { %s3557_s20 = smov 0   ;;  %s3559_s21 = smov 0  }
   0x5   :  { %s3561_s22 = smov 0   ;;  %s3563_s23 = smov 0  }
   0x6 LB: > { %s2855_s24 = sadd.s32 4294967295, %s3513_s23   ;;  %s2856_s25 = sadd.s32 4294967294, %s3513_s23   ;;  %s3513_s23 = sphi %s3563_s23, %s20_s23   ;;  %s3509_s22 = sphi %s3561_s22, %s5099_s22   ;;  %s3505_s21 = sphi %s3559_s21, %s5098_s21   ;;  %s3501_s20 = sphi %s3557_s20, %s5097_s20   ;;  %s3497_s19 = sphi %s3555_s19, %s5096_s19   ;;  %s3493_s18 = sphi %s3553_s18, %s5095_s18  }
   0x7   : > { %s32_s26 = sadd.s32 1, %s3509_s22  ;;  %s125_s27 = sadd.s32 1, %s3501_s20 }
   0x8   : > { %p34_p0 = scmp.ge.s32.totalorder %s32_s26, 2  ;;  %p135_p1 = scmp.ne.s32.totalorder %s3501_s20, %s3497_s19 }
   0x9   : > { %p136_p2 = scmp.eq.s32.totalorder %s2855_s24, 1  ;;  %p141_p3 = scmp.ne.s32.totalorder %s3497_s19, %s3493_s18 }
   0xa   : > { %s5101_s26 = smov (%p34_p0, %s32_s26), 0  ;;  %p142_p5 = scmp.eq.s32.totalorder %s2856_s25, 1 }
   0xb   : > { %p3593_p4 = por %p136_p2, %p135_p1  ;;  %s120_s29 = ssub.s32 %s3509_s22, %s5101_s26 }
   0xc   : > { %p2857_p6 = scmp.ge.s32.totalorder %s3513_s23, 1  ;;  %p123_p7 = scmp.eq.s32.totalorder %s120_s29, 0 }
   0xd   : > { %s5088_s28 = scalar_select %p3593_p4, 1, 0 }
   0xe   : > { %p3600_p8 = por %p142_p5, %p141_p3  ;;  %p149_p9 = scmp.lt.s32.totalorder %s3513_s23, 3 }
   0xf   : > { %s3606_s6 = scalar_select %p123_p7, %s3501_s20, %s125_s27  }
  0x10   : > { %s5089_s30 = scalar_select %p3600_p8, 1, 0 }
  0x11   : > { %p3608_p10 = pnand %p2857_p6, %p149_p9  ;;  %p3612_p11 = scmp.eq.s32.totalorder %s2855_s24, 0 }
  0x12   : > { %s3515_s9 = smov [#allocation4]   ;;  %s3516_s12 = smov [#allocation7]  }
  0x13   : > { %p2992_p12 = pneg %p3608_p10  ;;  %s161_s10 = sshll.u32 %s3515_s9, 4  ;;  %s162_s10 = int_to_ptr.vmem [resolvable:$true] %s161_s10 }
  0x14   : > { %s177_s13 = sshll.u32 %s3516_s12, 4  ;;  %s3364_s14 = scalar_lea.vmem %s162_s10, 192  ;;  %s178_s13 = int_to_ptr.vmem [resolvable:$true] %s177_s13 }
  0x15   : > { %p3620_p13 = pnand %p3612_p11, %p2992_p12  ;;  %p3365_p1 = scmp.ne.s32.totalorder %s162_s10, %s3364_s14 }
  0x16   : > { %p3372_p5 = scmp.lt.s32.totalorder %s162_s10, %s162_s10  ;;  %p3373_p6 = scmp.lt.s32.totalorder %s3364_s14, %s3364_s14 }
  0x17   : > { %p3355_p0 = pneg %p3620_p13 }
  0x18   : > { %p3374_p7 = por %p3373_p6, %p3372_p5 }
  0x19   : > { %p3367_p2 = pnand %p3365_p1, %p3355_p0 }
  0x1b   : > { %p3368_p3 = pneg %p3367_p2 }
  0x1d   : > { %p3375_p9 = pnand %p3374_p7, %p3368_p3 }
  0x1f   : > { %3378 = shalt.err (!%p3375_p9)
}
  0x20   : > { %s3517_s15 = smov 64   ;;  %s3518_s16 = smov 4  }
  0x21   : > { %2995 = dma.hbm_to_vmem [thread:$0]  (!%p3620_p13), %s5082_s1, 192, %s162_s10, [#allocation5], %s3517_s15, %s3517_s15, %s3518_s16  }
  0x22   : > { %s3390_s25 = scalar_lea.vmem %s178_s13, 1024  ;;  %p3398_p8 = scmp.lt.s32.totalorder %s178_s13, %s178_s13 }
  0x23   : > { %p3391_p12 = scmp.ne.s32.totalorder %s178_s13, %s3390_s25  ;;  %p3399_p4 = scmp.lt.s32.totalorder %s3390_s25, %s3390_s25 }
  0x25   : > { %p3393_p1 = pnand %p3391_p12, %p3355_p0  ;;  %p3400_p5 = por %p3399_p4, %p3398_p8 }
  0x27   : > { %p3394_p2 = pneg %p3393_p1 }
  0x29   : > { %p3401_p3 = pnand %p3400_p5, %p3394_p2 }
  0x2b   : > { %3404 = shalt.err (!%p3401_p3)
}
  0x2c   : > { %2998 = dma.hbm_to_vmem [thread:$0]  (!%p3620_p13), %s5084_s3, 1024, %s178_s13, [#allocation8], %s3517_s15, %s3517_s15, %s3518_s16  }
  0x2d   : > { %196 = sbr.rel (%p3608_p10) target bundleno = 710 (0x2c6), region = 36 }
  0x32   : > { %3478 = dma.done.wait (%p3612_p11), [#allocation5], 192  }
  0x33   : > { %3480 = vsyncadd (%p3612_p11), [#allocation5], 4294967104 }
  0x34   : > { %3482 = dma.done.wait (%p3612_p11), [#allocation8], 1024  }
  0x35   : > { %3484 = vsyncadd (%p3612_p11), [#allocation8], 4294966272  ;;  %s218_s9 = sand.u32 1, %s3497_s19   ;;  %s2892_s10 = smul.u32 6912, %s3505_s21 }
  0x36   : > { %s2863_s7 = sshll.u32 %s218_s9, 8  ;;  %s3519_s14 = smov [#allocation2]  }
  0x37   : > { %s243_s13 = scalar_lea.hbm %s5081_s0, %s2892_s10  ;;  %s251_s15 = sshll.u32 %s3519_s14, 4  ;;  %s252_s15 = int_to_ptr.vmem [resolvable:$true] %s251_s15 }
  0x38   : > { %s3405_s16 = scalar_lea.hbm %s243_s13, 6912  ;;  %s3407_s8 = scalar_lea.hbm %s5081_s0, 13824 }
  0x39   : > { %p3406_p4 = scmp.ne.s32.totalorder %s243_s13, %s3405_s16  ;;  %p3408_p8 = scmp.lt.s32.totalorder %s243_s13, %s5081_s0 }
  0x3a   : > { %p3409_p10 = scmp.lt.s32.totalorder %s3407_s8, %s3405_s16 }
  0x3c   : > { %p3410_p11 = por %p3409_p10, %p3408_p8 }
  0x3e   : > { %p3411_p13 = pnand %p3410_p11, %p3406_p4 }
  0x40   : > { %3414 = shalt.err (!%p3411_p13)  }
  0x41   : > { %s3415_s29 = scalar_lea.vmem %s252_s15, 6912  ;;  %s3419_s10 = scalar_lea.vmem %s252_s15, 13824 }
  0x42   : > { %p3416_p0 = scmp.ne.s32.totalorder %s252_s15, %s3415_s29  ;;  %p3420_p6 = scmp.lt.s32.totalorder %s252_s15, %s252_s15 }
  0x43   : > { %p3421_p7 = scmp.lt.s32.totalorder %s3419_s10, %s3415_s29 }
  0x45   : > { %p3422_p9 = por %p3421_p7, %p3420_p6 }
  0x47   : > { %p3423_p12 = pnand %p3422_p9, %p3416_p0 }
  0x49   : > { %3426 = shalt.err (!%p3423_p12)  }
  0x4a   : > { %254 = dma.hbm_to_vmem [thread:$0]  %s243_s13, 6912, %s252_s15, [#allocation3] }
  0x4b   : > { %s3665_s11 = scalar_lea.vmem [#allocation9], %s2863_s7 }
  0x4c   : > { %3485 = dma.done.wait [#allocation3], 6912 }
  0x4d   : > { %3486 = vsyncadd [#allocation3], 4294960384  ;;  %v3063_v0 = vld [vmem:[#allocation7 + $0x38] sm:$0xff]   ;;  %v3064_v1 = vld [vmem:[#allocation7 + $0x30] sm:$0xff]   ;;  %vm513_vm0 = vcmask 1046528   ;;  %vm759_vm1 = vcmask 1045504  }
  0x4e   : > { %2918 = vmatprep.subr.bf16.mxu0 %v3063_v0  ;;  %2966 = vmatprep.subr.bf16.mxu1 %v3063_v0  ;;  %v3065_v2 = vld [vmem:[#allocation7 + $0x28] sm:$0xff]   ;;  %v3066_v3 = vld [vmem:[#allocation7 + $0x20] sm:$0xff]   ;;  %v289_v4 = vld [vmem:[#allocation2] sm:$0xff]  ;;  %s2893_s8 = sshll.u32 %s3505_s21, 12  ;;  %s2744_s25 = sshll.u32 %s3665_s11, 4  ;;  %s5030_s25 = int_to_ptr.vmem [resolvable:$true] %s2744_s25 }
  0x4f   : > { %2919 = vmatpush3.bf16.msra.mxu0 %v3063_v0  ;;  %2974 = vmatpush3.bf16.msra.mxu1 %v3063_v0  ;;  %v290_v5 = vld [vmem:[#allocation2 + $0x8] sm:$0xff]  ;;  %v291_v6 = vld [vmem:[#allocation2 + $0x10] sm:$0xff]  ;;  %v3667_v7 = vld [vmem:[#allocation4] ss:$0 sm:$0xff]  ;;  %s5028_s10 = scalar_lea.hbm %s5086_s5, %s2893_s8  ;;  %s5036_s21 = scalar_lea.sflag [#allocation6], %s218_s9 }
  0x50   : > { %2920 = vmatprep.subr.bf16.mxu0 %v3064_v1  ;;  %2967 = vmatprep.subr.bf16.mxu1 %v3064_v1  ;;  %v3669_v8 = vld [vmem:[#allocation4 + $0x1] ss:$0 sm:$0xff]  ;;  %v3671_v9 = vld [vmem:[#allocation4 + $0x2] ss:$0 sm:$0xff]  ;;  %v3067_v10 = vld [vmem:[#allocation7 + $0x18] sm:$0xff]   ;;  %v348_v13 = vmul.f32 %v3667_v7, %v289_v4  ;;  %v349_v18 = vmul.f32 %v3667_v7, %v290_v5  ;;  %s3427_s7 = scalar_lea.vmem %s5030_s25, 4096 }
  0x51   : > { %v294_v11 = vld [vmem:[#allocation2 + $0x28] sm:$0xff]  ;;  %v417_v12 = vmul.f32 %v3669_v8, %v289_v4  ;;  %v418_v14 = vmul.f32 %v3669_v8, %v290_v5  ;;  %v419_v15 = vmul.f32 %v3669_v8, %v291_v6  ;;  %v663_v16 = vmul.f32 %v3671_v9, %v289_v4  ;;  %v3678_v17 = vld [vmem:[#allocation4 + $0x4] ss:$0 sm:$0xff]  ;;  %v3683_v22 = vld [vmem:[#allocation4 + $0x5] ss:$0 sm:$0xff]  ;;  %p3428_p1 = scmp.ne.s32.totalorder %s5030_s25, %s3427_s7  ;;  %p5093_p2 = scmp.ne.s32.totalorder %s5088_s28, 0 }
  0x52   : > { %v664_v20 = vmul.f32 %v3671_v9, %v290_v5  ;;  %v665_v21 = vmul.f32 %v3671_v9, %v291_v6  ;;  %v3685_v23 = vld [vmem:[#allocation2 + $0x18] sm:$0xff]  ;;  %v3688_v24 = vmul.f32 %v3669_v8, %v294_v11  ;;  %v3690_v29 = vld [vmem:[#allocation2 + $0x20] sm:$0xff]  ;;  %v3693_v30 = vmul.f32 %v3671_v9, %v294_v11  ;;  %v3712_v47 = vld [vmem:[#allocation4 + $0x8] ss:$0 sm:$0xff]  ;;  %s3520_s12 = smov [#allocation9]  }
  0x53   : > { %2921 = vmatpush3.bf16.msra.mxu0 %v3064_v1  ;;  %2975 = vmatpush3.bf16.msra.mxu1 %v3064_v1  ;;  %v514_v19 = vrot.slane %v417_v12, 1  ;;  %v515_v25 = vrot.slane %v418_v14, 1  ;;  %v517_v26 = vrot.slane %v419_v15, 1  ;;  %v760_v27 = vrot.slane %v663_v16, 2  ;;  %v3068_v28 = vld [vmem:[#allocation7 + $0x10] sm:$0xff]   ;;  %v3069_v48 = vld [vmem:[#allocation7 + $0x8] sm:$0xff]   ;;  %p3429_p5 = pnand %p3428_p1, %p5093_p2 }
  0x54   : > { %2922 = vmatprep.subr.bf16.mxu0 %v3065_v2  ;;  %2968 = vmatprep.subr.bf16.mxu1 %v3065_v2  ;;  %v761_v31 = vrot.slane %v664_v20, 2  ;;  %v763_v32 = vrot.slane %v665_v21, 2  ;;  %v910_v33 = vmul.f32 %v3678_v17, %v3685_v23  ;;  %v3697_v34 = vld [vmem:[#allocation4 + $0x6] ss:$0 sm:$0xff]  ;;  %v911_v37 = vmul.f32 %v3678_v17, %v3690_v29  ;;  %v3716_v52 = vld [vmem:[#allocation2 + $0x30] sm:$0xff]  ;;  %v3719_v57 = vld [vmem:[#allocation2 + $0x38] sm:$0xff] }
  0x55   : > { %v516_v35 = vsel %vm513_vm0, %v514_v19, %v515_v25  ;;  %v518_v36 = vsel %vm513_vm0, %v515_v25, %v517_v26  ;;  %v979_v38 = vmul.f32 %v3683_v22, %v3685_v23  ;;  %v980_v43 = vmul.f32 %v3683_v22, %v3690_v29  ;;  %v3723_v62 = vld [vmem:[#allocation4 + $0x9] ss:$0 sm:$0xff]  ;;  %v3070_v4 = vld [vmem:[#allocation7] sm:$0xff]   ;;  %v3731_v5 = vld [vmem:[#allocation2 + $0x40] sm:$0xff]  ;;  %p3430_p3 = pneg %p3429_p5  ;;  %s3431_s13 = sshll.u32 %s3520_s12, 4  ;;  %s3432_s13 = int_to_ptr.vmem [resolvable:$false] %s3431_s13 }
  0x56   : > { %v626_v39 = vadd.f32 %v516_v35, %v348_v13  ;;  %v627_v40 = vadd.f32 %v518_v36, %v349_v18  ;;  %v762_v41 = vsel %vm759_vm1, %v760_v27, %v761_v31  ;;  %v764_v42 = vsel %vm759_vm1, %v761_v31, %v763_v32  ;;  %v313_v36 = vld [vmem:[#allocation2 + $0xc0] sm:$0xff]  ;;  %s3433_s14 = scalar_lea.vmem %s3432_s13, 8192  ;;  %p3434_p4 = scmp.lt.s32.totalorder %s5030_s25, %s3432_s13 }
  0x57   : > { %2923 = vmatpush3.bf16.msra.mxu0 %v3065_v2  ;;  %2976 = vmatpush3.bf16.msra.mxu1 %v3065_v2  ;;  %v981_v44 = vmul.f32 %v3683_v22, %v294_v11  ;;  %v1075_v45 = vrot.slane %v979_v38, 1  ;;  %v1224_v46 = vmul.f32 %v3697_v34, %v3685_v23  ;;  %v1225_v51 = vmul.f32 %v3697_v34, %v3690_v29  ;;  %p3435_p8 = scmp.lt.s32.totalorder %s3433_s14, %s3427_s7 }
  0x58   : > { %2924 = vmatprep.subr.bf16.mxu0 %v3066_v3  ;;  %2969 = vmatprep.subr.bf16.mxu1 %v3066_v3  ;;  %v872_v49 = vadd.f32 %v762_v41, %v626_v39  ;;  %v873_v50 = vadd.f32 %v764_v42, %v627_v40  ;;  %v1076_v53 = vrot.slane %v980_v43, 1  ;;  %v1226_v55 = vmul.f32 %v3697_v34, %v294_v11  ;;  %v315_v41 = vld [vmem:[#allocation2 + $0xd0] sm:$0xff] }
  0x59   : > { %v1078_v54 = vrot.slane %v981_v44, 1  ;;  %v1320_v56 = vrot.slane %v1224_v46, 2  ;;  %v1321_v60 = vrot.slane %v1225_v51, 2  ;;  %v1470_v61 = vmul.f32 %v3712_v47, %v3716_v52  ;;  %p3436_p10 = por %p3435_p8, %p3434_p4 }
  0x5a   : > { %v942_v58 = vadd.f32 %v910_v33, %v872_v49  ;;  %v943_v59 = vadd.f32 %v911_v37, %v873_v50  ;;  %v1077_v63 = vsel %vm513_vm0, %v1075_v45, %v1076_v53  ;;  %v1323_v1 = vrot.slane %v1226_v55, 2  ;;  %v314_v37 = vld [vmem:[#allocation2 + $0xc8] sm:$0xff]  ;;  %v3758_v50 = vld [vmem:[%s5083_s2] ss:$0 sm:$0xff] }
  0x5b   : > { %2925 = vmatpush3.bf16.msra.mxu0 %v3066_v3  ;;  %2977 = vmatpush3.bf16.msra.mxu1 %v3066_v3  ;;  %v1079_v0 = vsel %vm513_vm0, %v1076_v53, %v1078_v54  ;;  %v1471_v2 = vmul.f32 %v3712_v47, %v3719_v57  ;;  %v3729_v3 = vld [vmem:[#allocation4 + $0xa] ss:$0 sm:$0xff]  ;;  %v522_v6 = vrot.slane %v3688_v24, 1  ;;  %v1322_v12 = vsel %vm759_vm1, %v1320_v56, %v1321_v60  ;;  %p3437_p11 = pnand %p3436_p10, %p3430_p3 }
  0x5c   : > { %2926 = vmatprep.subr.bf16.mxu0 %v3067_v10  ;;  %2970 = vmatprep.subr.bf16.mxu1 %v3067_v10  ;;  %v1188_v11 = vadd.f32 %v1079_v0, %v943_v59  ;;  %v1324_v13 = vsel %vm759_vm1, %v1321_v60, %v1323_v1  ;;  %v1539_v14 = vmul.f32 %v3723_v62, %v3716_v52 }
  0x5d   : > { %v1540_v15 = vmul.f32 %v3723_v62, %v3719_v57  ;;  %v1541_v16 = vmul.f32 %v3723_v62, %v3731_v5  ;;  %v1784_v20 = vmul.f32 %v3729_v3, %v3716_v52  ;;  %v1785_v21 = vmul.f32 %v3729_v3, %v3719_v57 }
  0x5e   : > { %v1433_v19 = vadd.f32 %v1324_v13, %v1188_v11  ;;  %v1635_v25 = vrot.slane %v1539_v14, 1  ;;  %v364_v42 = vmul.f32 %v3667_v7, %v313_v36  ;;  %v365_v46 = vmul.f32 %v3667_v7, %v314_v37 }
  0x5f   : > { %2927 = vmatpush3.bf16.msra.mxu0 %v3067_v10  ;;  %2978 = vmatpush3.bf16.msra.mxu1 %v3067_v10  ;;  %v1187_v10 = vadd.f32 %v1077_v63, %v942_v58  ;;  %v1636_v26 = vrot.slane %v1540_v15, 1  ;;  %v1638_v27 = vrot.slane %v1541_v16, 1  ;;  %v1880_v33 = vrot.slane %v1784_v20, 2 }
  0x60   : > { %2928 = vmatprep.subr.bf16.mxu0 %v3068_v28  ;;  %2971 = vmatprep.subr.bf16.mxu1 %v3068_v28  ;;  %v1503_v32 = vadd.f32 %v1471_v2, %v1433_v19  ;;  %v1881_v35 = vrot.slane %v1785_v21, 2  ;;  %v441_v51 = vmul.f32 %v3669_v8, %v313_v36  ;;  %v442_v53 = vmul.f32 %v3669_v8, %v314_v37  ;;  %v3772_v2 = vld [vmem:[#allocation2 + $0xd8] sm:$0xff] }
  0x61   : > { %v1432_v18 = vadd.f32 %v1322_v12, %v1187_v10  ;;  %v1637_v38 = vsel %vm513_vm0, %v1635_v25, %v1636_v26  ;;  %v1639_v39 = vsel %vm513_vm0, %v1636_v26, %v1638_v27  ;;  %v443_v56 = vmul.f32 %v3669_v8, %v315_v41 }
  0x62   : > { %v1748_v44 = vadd.f32 %v1639_v39, %v1503_v32  ;;  %v1882_v45 = vsel %vm759_vm1, %v1880_v33, %v1881_v35  ;;  %v687_v58 = vmul.f32 %v3671_v9, %v313_v36  ;;  %v554_v59 = vrot.slane %v441_v51, 1  ;;  %v3786_v32 = vld [vmem:[#allocation2 + $0xe8] sm:$0xff] }
  0x63   : > { %2929 = vmatpush3.bf16.msra.mxu0 %v3068_v28  ;;  %2979 = vmatpush3.bf16.msra.mxu1 %v3068_v28  ;;  %v1786_v28 = vmul.f32 %v3729_v3, %v3731_v5  ;;  %v1502_v31 = vadd.f32 %v1470_v61, %v1432_v18  ;;  %v555_v60 = vrot.slane %v442_v53, 1  ;;  %v688_v61 = vmul.f32 %v3671_v9, %v314_v37  ;;  %v3779_v18 = vld [vmem:[#allocation2 + $0xe0] sm:$0xff] }
  0x64   : > { %2930 = vmatprep.subr.bf16.mxu0 %v3069_v48  ;;  %2972 = vmatprep.subr.bf16.mxu1 %v3069_v48  ;;  %v689_v63 = vmul.f32 %v3671_v9, %v315_v41  ;;  %v800_v10 = vrot.slane %v687_v58, 2  ;;  %v926_v14 = vmul.f32 %v3678_v17, %v3772_v2  ;;  %v927_v27 = vmul.f32 %v3678_v17, %v3779_v18 }
  0x65   : > { %v1883_v40 = vrot.slane %v1786_v28, 2  ;;  %v1747_v43 = vadd.f32 %v1637_v38, %v1502_v31  ;;  %v556_v11 = vsel %vm513_vm0, %v554_v59, %v555_v60  ;;  %v801_v12 = vrot.slane %v688_v61, 2  ;;  %v3812_v61 = vld [vmem:[#allocation2 + $0x100] sm:$0xff] }
  0x66   : > { %v803_v13 = vrot.slane %v689_v63, 2  ;;  %v642_v20 = vadd.f32 %v556_v11, %v364_v42  ;;  %v1004_v37 = vmul.f32 %v3683_v22, %v3779_v18  ;;  %v1005_v38 = vmul.f32 %v3683_v22, %v3786_v32 }
  0x67   : > { %2931 = vmatpush3.bf16.msra.mxu0 %v3069_v48  ;;  %2980 = vmatpush3.bf16.msra.mxu1 %v3069_v48  ;;  %v768_v48 = vrot.slane %v3693_v30, 2  ;;  %v1884_v49 = vsel %vm759_vm1, %v1881_v35, %v1883_v40  ;;  %v1992_v54 = vadd.f32 %v1882_v45, %v1747_v43  ;;  %v802_v25 = vsel %vm759_vm1, %v800_v10, %v801_v12  ;;  %v3798_v43 = vld [vmem:[#allocation2 + $0xf0] sm:$0xff]  ;;  %v3870_v30 = vld [vmem:[#allocation2 + $0x48] sm:$0xff] }
  0x68   : > { %2932 = vmatprep.subr.bf16.mxu0 %v3070_v4  ;;  %2973 = vmatprep.subr.bf16.mxu1 %v3070_v4  ;;  %v1993_v55 = vadd.f32 %v1884_v49, %v1748_v44  ;;  %v804_v26 = vsel %vm759_vm1, %v801_v12, %v803_v13  ;;  %v888_v33 = vadd.f32 %v802_v25, %v642_v20  ;;  %v1116_v45 = vrot.slane %v1004_v37, 1  ;;  %v3800_v49 = vld [vmem:[#allocation2 + $0xf8] sm:$0xff] }
  0x69   : > { %v3767_v0 = vadd.f32 %v3758_v50, %v1992_v54  ;;  %v1003_v35 = vmul.f32 %v3683_v22, %v3772_v2  ;;  %v1248_v39 = vmul.f32 %v3697_v34, %v3772_v2  ;;  %v1249_v42 = vmul.f32 %v3697_v34, %v3779_v18 }
  0x6a   : > { %v3770_v1 = vadd.f32 %v3758_v50, %v1993_v55  ;;  %v958_v40 = vadd.f32 %v926_v14, %v888_v33  ;;  %v1250_v51 = vmul.f32 %v3697_v34, %v3786_v32  ;;  %v1486_v55 = vmul.f32 %v3712_v47, %v3798_v43 }
  0x6b   : > { %2933 = vmatpush3.bf16.msra.mxu0 %v3070_v4  ;;  %2981 = vmatpush3.bf16.msra.mxu1 %v3070_v4  ;;  %v557_v4 = vrot.slane %v443_v56, 1  ;;  %v2063_v15 = vsub.f32 0.0, %v3767_v0  ;;  %v1115_v41 = vrot.slane %v1003_v35, 1  ;;  %v1360_v53 = vrot.slane %v1248_v39, 2 }
  0x6c   : > { %v2064_v16 = vsub.f32 0.0, %v3770_v1  ;;  %v1361_v54 = vrot.slane %v1249_v42, 2  ;;  %v1487_v59 = vmul.f32 %v3712_v47, %v3800_v49  ;;  %v1363_v11 = vrot.slane %v1250_v51, 2 }
  0x6d   : > { %v558_v19 = vsel %vm513_vm0, %v555_v60, %v557_v4  ;;  %v2095_v28 = vmul.f32 1.442695, %v2063_v15  ;;  %v1117_v56 = vsel %vm513_vm0, %v1115_v41, %v1116_v45  ;;  %v1563_v60 = vmul.f32 %v3723_v62, %v3798_v43 }
  0x6e   : > { %v643_v21 = vadd.f32 %v558_v19, %v365_v46  ;;  %v2097_v31 = vmul.f32 1.442695, %v2064_v16  ;;  %v1118_v46 = vrot.slane %v1005_v38, 1  ;;  %v1203_v63 = vadd.f32 %v1117_v56, %v958_v40 }
  0x6f   : > { %3071 = vpow2.f32 %v2095_v28  ;;  %v1362_v10 = vsel %vm759_vm1, %v1360_v53, %v1361_v54  ;;  %v1564_v12 = vmul.f32 %v3723_v62, %v3800_v49  ;;  %v1565_v13 = vmul.f32 %v3723_v62, %v3812_v61 }
  0x70   : > { %v889_v36 = vadd.f32 %v804_v26, %v643_v21  ;;  %3073 = vpow2.f32 %v2097_v31  ;;  %v1119_v58 = vsel %vm513_vm0, %v1116_v45, %v1118_v46  ;;  %v1675_v14 = vrot.slane %v1563_v60, 1 }
  0x71   : > { %v1808_v15 = vmul.f32 %v3729_v3, %v3798_v43  ;;  %v1364_v16 = vsel %vm759_vm1, %v1361_v54, %v1363_v11  ;;  %v1448_v19 = vadd.f32 %v1362_v10, %v1203_v63  ;;  %v1809_v20 = vmul.f32 %v3729_v3, %v3800_v49 }
  0x72   : > { %v959_v44 = vadd.f32 %v927_v27, %v889_v36  ;;  %v1810_v21 = vmul.f32 %v3729_v3, %v3812_v61  ;;  %v1676_v26 = vrot.slane %v1564_v12, 1  ;;  %v1678_v27 = vrot.slane %v1565_v13, 1 }
  0x73   : > { %v1920_v28 = vrot.slane %v1808_v15, 2  ;;  %v1518_v31 = vadd.f32 %v1486_v55, %v1448_v19  ;;  %v1921_v33 = vrot.slane %v1809_v20, 2  ;;  %v350_v36 = vmul.f32 %v3667_v7, %v3685_v23 }
  0x74   : > { %v1204_v4 = vadd.f32 %v1119_v58, %v959_v44  ;;  %v1923_v35 = vrot.slane %v1810_v21, 2  ;;  %v1677_v38 = vsel %vm513_vm0, %v1675_v14, %v1676_v26  ;;  %v1679_v39 = vsel %vm513_vm0, %v1676_v26, %v1678_v27 }
  0x75   : > { %v351_v40 = vmul.f32 %v3667_v7, %v3690_v29  ;;  %v1763_v41 = vadd.f32 %v1677_v38, %v1518_v31  ;;  %v1922_v42 = vsel %vm759_vm1, %v1920_v28, %v1921_v33  ;;  %v420_v45 = vmul.f32 %v3669_v8, %v3685_v23 }
  0x76   : > { %v1449_v25 = vadd.f32 %v1364_v16, %v1204_v4  ;;  %v1924_v44 = vsel %vm759_vm1, %v1921_v33, %v1923_v35  ;;  %v421_v51 = vmul.f32 %v3669_v8, %v3690_v29  ;;  %v666_v53 = vmul.f32 %v3671_v9, %v3685_v23 }
  0x77   : > { %v667_v54 = vmul.f32 %v3671_v9, %v3690_v29  ;;  %v2008_v55 = vadd.f32 %v1922_v42, %v1763_v41  ;;  %v519_v56 = vrot.slane %v420_v45, 1  ;;  %v912_v58 = vmul.f32 %v3678_v17, %v3716_v52 }
  0x78   : > { %v1519_v37 = vadd.f32 %v1487_v59, %v1449_v25  ;;  %v913_v59 = vmul.f32 %v3678_v17, %v3719_v57  ;;  %v520_v4 = vrot.slane %v421_v51, 1  ;;  %v765_v10 = vrot.slane %v666_v53, 2 }
  0x79   : > { %v766_v11 = vrot.slane %v667_v54, 2  ;;  %v3847_v23 = vadd.f32 %v3758_v50, %v2008_v55  ;;  %v982_v29 = vmul.f32 %v3683_v22, %v3716_v52  ;;  %v983_v14 = vmul.f32 %v3683_v22, %v3719_v57 }
  0x7a   : > { %v1764_v46 = vadd.f32 %v1679_v39, %v1519_v37  ;;  %v521_v19 = vsel %vm513_vm0, %v519_v56, %v520_v4  ;;  %v523_v20 = vsel %vm513_vm0, %v520_v4, %v522_v6  ;;  %v984_v24 = vmul.f32 %v3683_v22, %v3731_v5  ;;  %v3882_v56 = vld [vmem:[#allocation2 + $0x58] sm:$0xff] }
  0x7b   : > { %v2079_v21 = vsub.f32 0.0, %v3847_v23  ;;  %v628_v25 = vadd.f32 %v521_v19, %v350_v36  ;;  %v629_v26 = vadd.f32 %v523_v20, %v351_v40  ;;  %v767_v28 = vsel %vm759_vm1, %v765_v10, %v766_v11 }
  0x7c   : > { %v3072_v60 = vpop.eup %3071  ;;  %v2009_v63 = vadd.f32 %v1924_v44, %v1764_v46  ;;  %v769_v31 = vsel %vm759_vm1, %v766_v11, %v768_v48  ;;  %v1080_v38 = vrot.slane %v982_v29, 1  ;;  %v1081_v39 = vrot.slane %v983_v14, 1  ;;  %v3877_v46 = vld [vmem:[#allocation2 + $0x50] sm:$0xff] }
  0x7d   : > { %v3074_v12 = vpop.eup %3073  ;;  %v2159_v13 = vadd.f32 1.0, %v3072_v60  ;;  %v2127_v33 = vmul.f32 1.442695, %v2079_v21  ;;  %v874_v35 = vadd.f32 %v767_v28, %v628_v25  ;;  %v875_v37 = vadd.f32 %v769_v31, %v629_v26 }
  0x7e   : > { %v2160_v15 = vadd.f32 1.0, %v3074_v12  ;;  %v3854_v16 = vadd.f32 %v3758_v50, %v2009_v63  ;;  %v1227_v36 = vmul.f32 %v3697_v34, %v3716_v52  ;;  %v1083_v42 = vrot.slane %v984_v24, 1 }
  0x7f   : > { %3075 = vrcp.f32 %v2159_v13  ;;  %v944_v40 = vadd.f32 %v912_v58, %v874_v35  ;;  %v945_v41 = vadd.f32 %v913_v59, %v875_v37  ;;  %v1082_v48 = vsel %vm513_vm0, %v1080_v38, %v1081_v39 }
  0x80   : > { %3077 = vrcp.f32 %v2160_v15  ;;  %v2080_v27 = vsub.f32 0.0, %v3854_v16  ;;  %v1228_v44 = vmul.f32 %v3697_v34, %v3719_v57  ;;  %v1229_v45 = vmul.f32 %v3697_v34, %v3731_v5 }
  0x81   : > { %3079 = vpow2.f32 %v2127_v33  ;;  %v1084_v51 = vsel %vm513_vm0, %v1081_v39, %v1083_v42  ;;  %v1189_v53 = vadd.f32 %v1082_v48, %v944_v40  ;;  %v1325_v54 = vrot.slane %v1227_v36, 2 }
  0x82   : > { %v2129_v6 = vmul.f32 1.442695, %v2080_v27  ;;  %v1472_v55 = vmul.f32 %v3712_v47, %v3870_v30  ;;  %v1190_v58 = vadd.f32 %v1084_v51, %v945_v41  ;;  %v1326_v59 = vrot.slane %v1228_v44, 2 }
  0x83   : > { %v1328_v60 = vrot.slane %v1229_v45, 2  ;;  %v1473_v63 = vmul.f32 %v3712_v47, %v3877_v46  ;;  %v1542_v4 = vmul.f32 %v3723_v62, %v3870_v30  ;;  %v1543_v10 = vmul.f32 %v3723_v62, %v3877_v46 }
  0x84   : > { %3081 = vpow2.f32 %v2129_v6  ;;  %v1544_v11 = vmul.f32 %v3723_v62, %v3882_v56  ;;  %v1787_v12 = vmul.f32 %v3729_v3, %v3870_v30  ;;  %v1327_v13 = vsel %vm759_vm1, %v1325_v54, %v1326_v59 }
  0x85   : > { %v1329_v29 = vsel %vm759_vm1, %v1326_v59, %v1328_v60  ;;  %v1788_v14 = vmul.f32 %v3729_v3, %v3877_v46  ;;  %v1789_v15 = vmul.f32 %v3729_v3, %v3882_v56  ;;  %v1434_v19 = vadd.f32 %v1327_v13, %v1189_v53 }
  0x86   : > { %v1435_v20 = vadd.f32 %v1329_v29, %v1190_v58  ;;  %v1640_v21 = vrot.slane %v1542_v4, 1  ;;  %v1641_v25 = vrot.slane %v1543_v10, 1  ;;  %v1643_v26 = vrot.slane %v1544_v11, 1 }
  0x87   : > { %v1885_v27 = vrot.slane %v1787_v12, 2  ;;  %v1886_v28 = vrot.slane %v1788_v14, 2  ;;  %v1888_v31 = vrot.slane %v1789_v15, 2  ;;  %v1504_v33 = vadd.f32 %v1472_v55, %v1434_v19 }
  0x88   : > { %v1505_v35 = vadd.f32 %v1473_v63, %v1435_v20  ;;  %v1642_v37 = vsel %vm513_vm0, %v1640_v21, %v1641_v25  ;;  %v366_v24 = vmul.f32 %v3667_v7, %v3772_v2  ;;  %v1644_v38 = vsel %vm513_vm0, %v1641_v25, %v1643_v26 }
  0x89   : > { %v1887_v39 = vsel %vm759_vm1, %v1885_v27, %v1886_v28  ;;  %v1889_v36 = vsel %vm759_vm1, %v1886_v28, %v1888_v31  ;;  %v367_v40 = vmul.f32 %v3667_v7, %v3779_v18  ;;  %v1749_v48 = vadd.f32 %v1642_v37, %v1504_v33 }
  0x8a   : > { %v1750_v44 = vadd.f32 %v1644_v38, %v1505_v35  ;;  %v444_v45 = vmul.f32 %v3669_v8, %v3772_v2  ;;  %v445_v53 = vmul.f32 %v3669_v8, %v3779_v18  ;;  %v446_v54 = vmul.f32 %v3669_v8, %v3786_v32 }
  0x8b   : > { %v690_v55 = vmul.f32 %v3671_v9, %v3772_v2  ;;  %v1994_v58 = vadd.f32 %v1887_v39, %v1749_v48  ;;  %v928_v37 = vmul.f32 %v3678_v17, %v3798_v43  ;;  %v929_v38 = vmul.f32 %v3678_v17, %v3800_v49 }
  0x8c   : > { %v3076_v6 = vpop.eup %3075  ;;  %v1995_v59 = vadd.f32 %v1889_v36, %v1750_v44  ;;  %v559_v60 = vrot.slane %v444_v45, 1  ;;  %v560_v10 = vrot.slane %v445_v53, 1  ;;  %v562_v11 = vrot.slane %v446_v54, 1  ;;  %v3946_v45 = vld [vmem:[#allocation2 + $0x108] sm:$0xff] }
  0x8d   : > { %v3078_v41 = vpop.eup %3077  ;;  %v2223_v42 = vmul.f32 %v3076_v6, %v3767_v0  ;;  %v691_v0 = vmul.f32 %v3671_v9, %v3779_v18  ;;  %v3923_v29 = vadd.f32 %v3758_v50, %v1994_v58  ;;  %v805_v14 = vrot.slane %v690_v55, 2 }
  0x8e   : > { %v2224_v51 = vmul.f32 %v3078_v41, %v3770_v1  ;;  %v3080_v63 = vpop.eup %3079  ;;  %v692_v1 = vmul.f32 %v3671_v9, %v3786_v32  ;;  %v3926_v2 = vadd.f32 %v3758_v50, %v1995_v59  ;;  %v561_v18 = vsel %vm513_vm0, %v559_v60, %v560_v10 }
  0x8f   : > { %v2175_v13 = vadd.f32 1.0, %v3080_v63  ;;  %v563_v19 = vsel %vm513_vm0, %v560_v10, %v562_v11  ;;  %v806_v20 = vrot.slane %v691_v0, 2  ;;  %v2065_v21 = vsub.f32 0.0, %v3923_v29 }
  0x90   : > { %v2255_v4 = vpack.c.bf16 %v2224_v51, %v2223_v42  ;;  %v2066_v32 = vsub.f32 0.0, %v3926_v2  ;;  %v644_v25 = vadd.f32 %v561_v18, %v366_v24  ;;  %v645_v26 = vadd.f32 %v563_v19, %v367_v40  ;;  %v3948_v51 = vld [vmem:[#allocation2 + $0x110] sm:$0xff] }
  0x91   : > { %v3082_v12 = vpop.eup %3081  ;;  %3083 = vrcp.f32 %v2175_v13  ;;  %v807_v27 = vsel %vm759_vm1, %v805_v14, %v806_v20  ;;  %v808_v28 = vrot.slane %v692_v1, 2  ;;  %v2099_v31 = vmul.f32 1.442695, %v2065_v21 }
  0x92   : > { %2934 = vmatprep.mubr.bf16.mxu0 %v2255_v4  ;;  %v2176_v15 = vadd.f32 1.0, %v3082_v12  ;;  %v2101_v33 = vmul.f32 1.442695, %v2066_v32  ;;  %v890_v35 = vadd.f32 %v807_v27, %v644_v25  ;;  %v1006_v39 = vmul.f32 %v3683_v22, %v3798_v43  ;;  %v3959_v4 = vld [vmem:[#allocation2 + $0x118] sm:$0xff] }
  0x93   : > { %v809_v6 = vsel %vm759_vm1, %v806_v20, %v808_v28  ;;  %v1007_v24 = vmul.f32 %v3683_v22, %v3800_v49  ;;  %v1008_v41 = vmul.f32 %v3683_v22, %v3812_v61  ;;  %v1251_v44 = vmul.f32 %v3697_v34, %v3798_v43 }
  0x94   : > { %3085 = vrcp.f32 %v2176_v15  ;;  %v891_v36 = vadd.f32 %v809_v6, %v645_v26  ;;  %v960_v40 = vadd.f32 %v928_v37, %v890_v35  ;;  %v1120_v42 = vrot.slane %v1006_v39, 1 }
  0x95   : > { %3087 = vpow2.f32 %v2099_v31  ;;  %v1121_v48 = vrot.slane %v1007_v24, 1  ;;  %v1123_v54 = vrot.slane %v1008_v41, 1  ;;  %v1252_v55 = vmul.f32 %v3697_v34, %v3800_v49 }
  0x96   : > { %3089 = vpow2.f32 %v2101_v33  ;;  %v961_v53 = vadd.f32 %v929_v38, %v891_v36  ;;  %v1253_v58 = vmul.f32 %v3697_v34, %v3812_v61  ;;  %v1365_v60 = vrot.slane %v1251_v44, 2 }
  0x97   : > { %v1122_v59 = vsel %vm513_vm0, %v1120_v42, %v1121_v48  ;;  %v1488_v0 = vmul.f32 %v3712_v47, %v3946_v45  ;;  %v1489_v63 = vmul.f32 %v3712_v47, %v3948_v51  ;;  %v1124_v10 = vsel %vm513_vm0, %v1121_v48, %v1123_v54 }
  0x98   : > { %v1205_v11 = vadd.f32 %v1122_v59, %v960_v40  ;;  %v1366_v1 = vrot.slane %v1252_v55, 2  ;;  %v1368_v12 = vrot.slane %v1253_v58, 2  ;;  %v1206_v13 = vadd.f32 %v1124_v10, %v961_v53 }
  0x99   : > { %v1566_v14 = vmul.f32 %v3723_v62, %v3946_v45  ;;  %v1567_v15 = vmul.f32 %v3723_v62, %v3948_v51  ;;  %v1568_v18 = vmul.f32 %v3723_v62, %v3959_v4  ;;  %v1811_v21 = vmul.f32 %v3729_v3, %v3946_v45 }
  0x9a   : > { %v1367_v19 = vsel %vm759_vm1, %v1365_v60, %v1366_v1  ;;  %v1369_v20 = vsel %vm759_vm1, %v1366_v1, %v1368_v12  ;;  %v1812_v32 = vmul.f32 %v3729_v3, %v3948_v51  ;;  %v1813_v33 = vmul.f32 %v3729_v3, %v3959_v4 }
  0x9b   : > { %v1450_v25 = vadd.f32 %v1367_v19, %v1205_v11  ;;  %v1451_v26 = vadd.f32 %v1369_v20, %v1206_v13  ;;  %v1680_v27 = vrot.slane %v1566_v14, 1  ;;  %v1681_v28 = vrot.slane %v1567_v15, 1 }
  0x9c   : > { %v1683_v31 = vrot.slane %v1568_v18, 1  ;;  %v1925_v35 = vrot.slane %v1811_v21, 2  ;;  %v1926_v37 = vrot.slane %v1812_v32, 2  ;;  %v352_v36 = vmul.f32 %v3667_v7, %v3716_v52 }
  0x9d   : > { %v1520_v38 = vadd.f32 %v1488_v0, %v1450_v25  ;;  %v1521_v39 = vadd.f32 %v1489_v63, %v1451_v26  ;;  %v1682_v24 = vsel %vm513_vm0, %v1680_v27, %v1681_v28  ;;  %v1928_v44 = vrot.slane %v1813_v33, 2 }
  0x9e   : > { %v3084_v6 = vpop.eup %3083  ;;  %v1684_v42 = vsel %vm513_vm0, %v1681_v28, %v1683_v31  ;;  %v1927_v48 = vsel %vm759_vm1, %v1925_v35, %v1926_v37  ;;  %v353_v58 = vmul.f32 %v3667_v7, %v3719_v57  ;;  %v423_v60 = vmul.f32 %v3669_v8, %v3716_v52 }
  0x9f   : > { %v2239_v41 = vmul.f32 %v3084_v6, %v3847_v23  ;;  %v1765_v54 = vadd.f32 %v1682_v24, %v1520_v38  ;;  %v1766_v55 = vadd.f32 %v1684_v42, %v1521_v39  ;;  %v1929_v59 = vsel %vm759_vm1, %v1926_v37, %v1928_v44 }
  0xa0   : > { %v424_v23 = vmul.f32 %v3669_v8, %v3719_v57  ;;  %v425_v0 = vmul.f32 %v3669_v8, %v3731_v5  ;;  %v669_v1 = vmul.f32 %v3671_v9, %v3716_v52  ;;  %v524_v14 = vrot.slane %v423_v60, 1 }
  0xa1   : > { %v3086_v40 = vpop.eup %3085  ;;  %v2010_v11 = vadd.f32 %v1927_v48, %v1765_v54  ;;  %v670_v32 = vmul.f32 %v3671_v9, %v3719_v57  ;;  %v671_v26 = vmul.f32 %v3671_v9, %v3731_v5  ;;  %v914_v39 = vmul.f32 %v3678_v17, %v3870_v30 }
  0xa2   : > { %v2240_v53 = vmul.f32 %v3086_v40, %v3854_v16  ;;  %v3088_v63 = vpop.eup %3087  ;;  %v2011_v16 = vadd.f32 %v1929_v59, %v1766_v55  ;;  %v525_v15 = vrot.slane %v424_v23, 1  ;;  %v527_v18 = vrot.slane %v425_v0, 1 }
  0xa3   : > { %v3090_v12 = vpop.eup %3089  ;;  %v2161_v13 = vadd.f32 1.0, %v3088_v63  ;;  %v3995_v20 = vadd.f32 %v3758_v50, %v2010_v11  ;;  %v770_v35 = vrot.slane %v669_v1, 2  ;;  %v771_v37 = vrot.slane %v670_v32, 2  ;;  %v4026_v63 = vld [vmem:[#allocation2 + $0x68] sm:$0xff] }
  0xa4   : > { %v2263_v10 = vpack.c.bf16 %v2240_v53, %v2239_v41  ;;  %v2162_v19 = vadd.f32 1.0, %v3090_v12  ;;  %v3998_v21 = vadd.f32 %v3758_v50, %v2011_v16  ;;  %v526_v25 = vsel %vm513_vm0, %v524_v14, %v525_v15 }
  0xa5   : > { %3091 = vrcp.f32 %v2161_v13  ;;  %v528_v52 = vsel %vm513_vm0, %v525_v15, %v527_v18  ;;  %v2081_v27 = vsub.f32 0.0, %v3995_v20  ;;  %v630_v31 = vadd.f32 %v526_v25, %v352_v36  ;;  %v4036_v18 = vld [vmem:[#allocation2 + $0x70] sm:$0xff] }
  0xa6   : > { %2950 = vmatprep.mubr.bf16.mxu1 %v2263_v10  ;;  %3093 = vrcp.f32 %v2162_v19  ;;  %v2082_v28 = vsub.f32 0.0, %v3998_v21  ;;  %v631_v33 = vadd.f32 %v528_v52, %v353_v58  ;;  %v773_v6 = vrot.slane %v671_v26, 2  ;;  %v4022_v58 = vld [vmem:[#allocation2 + $0x60] sm:$0xff] }
  0xa7   : > { %v2131_v38 = vmul.f32 1.442695, %v2081_v27  ;;  %v915_v24 = vmul.f32 %v3678_v17, %v3877_v46  ;;  %v772_v5 = vsel %vm759_vm1, %v770_v35, %v771_v37  ;;  %v985_v41 = vmul.f32 %v3683_v22, %v3870_v30 }
  0xa8   : > { %v2133_v57 = vmul.f32 1.442695, %v2082_v28  ;;  %v774_v40 = vsel %vm759_vm1, %v771_v37, %v773_v6  ;;  %v986_v36 = vmul.f32 %v3683_v22, %v3877_v46  ;;  %v876_v42 = vadd.f32 %v772_v5, %v630_v31 }
  0xa9   : > { %3095 = vpow2.f32 %v2131_v38  ;;  %v877_v48 = vadd.f32 %v774_v40, %v631_v33  ;;  %v987_v44 = vmul.f32 %v3683_v22, %v3882_v56  ;;  %v1085_v53 = vrot.slane %v985_v41, 1 }
  0xaa   : > { %3097 = vpow2.f32 %v2133_v57  ;;  %v1086_v54 = vrot.slane %v986_v36, 1  ;;  %v1230_v55 = vmul.f32 %v3697_v34, %v3870_v30  ;;  %v946_v59 = vadd.f32 %v914_v39, %v876_v42 }
  0xab   : > { %v947_v60 = vadd.f32 %v915_v24, %v877_v48  ;;  %v1088_v23 = vrot.slane %v987_v44, 1  ;;  %v1231_v0 = vmul.f32 %v3697_v34, %v3877_v46  ;;  %v1232_v11 = vmul.f32 %v3697_v34, %v3882_v56 }
  0xac   : > { %v1087_v10 = vsel %vm513_vm0, %v1085_v53, %v1086_v54  ;;  %v1330_v16 = vrot.slane %v1230_v55, 2  ;;  %v1474_v1 = vmul.f32 %v3712_v47, %v4022_v58  ;;  %v1475_v15 = vmul.f32 %v3712_v47, %v4026_v63 }
  0xad   : > { %v1089_v12 = vsel %vm513_vm0, %v1086_v54, %v1088_v23  ;;  %v1191_v13 = vadd.f32 %v1087_v10, %v946_v59  ;;  %v1331_v14 = vrot.slane %v1231_v0, 2  ;;  %v1333_v32 = vrot.slane %v1232_v11, 2 }
  0xae   : > { %v1192_v19 = vadd.f32 %v1089_v12, %v947_v60  ;;  %v1545_v25 = vmul.f32 %v3723_v62, %v4022_v58  ;;  %v1546_v52 = vmul.f32 %v3723_v62, %v4026_v63  ;;  %v1547_v27 = vmul.f32 %v3723_v62, %v4036_v18 }
  0xaf   : > { %v1332_v26 = vsel %vm759_vm1, %v1330_v16, %v1331_v14  ;;  %v1790_v28 = vmul.f32 %v3729_v3, %v4022_v58  ;;  %v1791_v31 = vmul.f32 %v3729_v3, %v4026_v63  ;;  %v1334_v33 = vsel %vm759_vm1, %v1331_v14, %v1333_v32 }
  0xb0   : > { %v1436_v35 = vadd.f32 %v1332_v26, %v1191_v13  ;;  %v1645_v37 = vrot.slane %v1545_v25, 1  ;;  %v1646_v6 = vrot.slane %v1546_v52, 1  ;;  %v1437_v57 = vadd.f32 %v1334_v33, %v1192_v19 }
  0xb1   : > { %v1648_v39 = vrot.slane %v1547_v27, 1  ;;  %v1792_v24 = vmul.f32 %v3729_v3, %v4036_v18  ;;  %v1890_v5 = vrot.slane %v1790_v28, 2  ;;  %v1891_v48 = vrot.slane %v1791_v31, 2 }
  0xb2   : > { %v3092_v38 = vpop.eup %3091  ;;  %v1506_v36 = vadd.f32 %v1474_v1, %v1436_v35  ;;  %v1647_v42 = vsel %vm513_vm0, %v1645_v37, %v1646_v6  ;;  %v1507_v53 = vadd.f32 %v1475_v15, %v1437_v57  ;;  %v368_v23 = vmul.f32 %v3667_v7, %v3798_v43 }
  0xb3   : > { %v3094_v40 = vpop.eup %3093  ;;  %v2225_v41 = vmul.f32 %v3092_v38, %v3923_v29  ;;  %v1649_v54 = vsel %vm513_vm0, %v1646_v6, %v1648_v39  ;;  %v1893_v55 = vrot.slane %v1792_v24, 2  ;;  %v1892_v60 = vsel %vm759_vm1, %v1890_v5, %v1891_v48 }
  0xb4   : > { %v2226_v44 = vmul.f32 %v3094_v40, %v3926_v2  ;;  %v1751_v59 = vadd.f32 %v1647_v42, %v1506_v36  ;;  %v369_v0 = vmul.f32 %v3667_v7, %v3800_v49  ;;  %v1752_v10 = vadd.f32 %v1649_v54, %v1507_v53 }
  0xb5   : > { %v1894_v11 = vsel %vm759_vm1, %v1891_v48, %v1893_v55  ;;  %v447_v2 = vmul.f32 %v3669_v8, %v3798_v43  ;;  %v448_v12 = vmul.f32 %v3669_v8, %v3800_v49  ;;  %v449_v13 = vmul.f32 %v3669_v8, %v3812_v61  ;;  %v4096_v55 = vld [vmem:[#allocation2 + $0x120] sm:$0xff] }
  0xb6   : > { %v2256_v29 = vpack.c.bf16 %v2226_v44, %v2225_v41  ;;  %v3096_v16 = vpop.eup %3095  ;;  %v1996_v1 = vadd.f32 %v1892_v60, %v1751_v59  ;;  %v693_v14 = vmul.f32 %v3671_v9, %v3798_v43  ;;  %v1997_v19 = vadd.f32 %v1894_v11, %v1752_v10 }
  0xb7   : > { %v3098_v15 = vpop.eup %3097  ;;  %v2177_v7 = vadd.f32 1.0, %v3096_v16  ;;  %v564_v32 = vrot.slane %v447_v2, 1  ;;  %v694_v25 = vmul.f32 %v3671_v9, %v3800_v49  ;;  %v565_v27 = vrot.slane %v448_v12, 1  ;;  %v4107_v2 = vld [vmem:[#allocation2 + $0x128] sm:$0xff] }
  0xb8   : > { %2935 = vmatmul.mubr.bf16.vlgmr.msra.gmra.mxu0 %v2256_v29  ;;  %v2178_v52 = vadd.f32 1.0, %v3098_v15  ;;  %v4073_v26 = vadd.f32 %v3758_v50, %v1996_v1  ;;  %v567_v28 = vrot.slane %v449_v13, 1  ;;  %v4076_v8 = vadd.f32 %v3758_v50, %v1997_v19 }
  0xb9   : > { %3099 = vrcp.f32 %v2177_v7  ;;  %v695_v43 = vmul.f32 %v3671_v9, %v3812_v61  ;;  %v810_v31 = vrot.slane %v693_v14, 2  ;;  %v566_v35 = vsel %vm513_vm0, %v564_v32, %v565_v27  ;;  %v4110_v14 = vld [vmem:[#allocation2 + $0x130] sm:$0xff] }
  0xba   : > { %3101 = vrcp.f32 %v2178_v52  ;;  %v2067_v33 = vsub.f32 0.0, %v4073_v26  ;;  %v568_v49 = vsel %vm513_vm0, %v565_v27, %v567_v28  ;;  %v2068_v37 = vsub.f32 0.0, %v4076_v8 }
  0xbb   : > { %v646_v6 = vadd.f32 %v566_v35, %v368_v23  ;;  %v647_v38 = vadd.f32 %v568_v49, %v369_v0  ;;  %v811_v57 = vrot.slane %v694_v25, 2  ;;  %v813_v24 = vrot.slane %v695_v43, 2 }
  0xbc   : > { %v2103_v39 = vmul.f32 1.442695, %v2067_v33  ;;  %v930_v5 = vmul.f32 %v3678_v17, %v3946_v45  ;;  %v931_v9 = vmul.f32 %v3678_v17, %v3948_v51  ;;  %v2105_v61 = vmul.f32 1.442695, %v2068_v37 }
  0xbd   : > { %v812_v40 = vsel %vm759_vm1, %v810_v31, %v811_v57  ;;  %v1009_v41 = vmul.f32 %v3683_v22, %v3946_v45  ;;  %v1010_v36 = vmul.f32 %v3683_v22, %v3948_v51  ;;  %v814_v42 = vsel %vm759_vm1, %v811_v57, %v813_v24 }
  0xbe   : > { %3103 = vpow2.f32 %v2103_v39  ;;  %v892_v48 = vadd.f32 %v812_v40, %v646_v6  ;;  %v1011_v44 = vmul.f32 %v3683_v22, %v3959_v4  ;;  %v893_v53 = vadd.f32 %v814_v42, %v647_v38 }
  0xbf   : > { %3105 = vpow2.f32 %v2105_v61  ;;  %v1125_v54 = vrot.slane %v1009_v41, 1  ;;  %v1126_v17 = vrot.slane %v1010_v36, 1  ;;  %v1254_v23 = vmul.f32 %v3697_v34, %v3946_v45 }
  0xc0   : > { %v962_v59 = vadd.f32 %v930_v5, %v892_v48  ;;  %v1128_v60 = vrot.slane %v1011_v44, 1  ;;  %v1255_v0 = vmul.f32 %v3697_v34, %v3948_v51  ;;  %v963_v29 = vadd.f32 %v931_v9, %v893_v53  ;;  %v4133_v48 = vld [vmem:[#allocation4] ss:$0 sm:$0xff] }
  0xc1   : > { %v1127_v10 = vsel %vm513_vm0, %v1125_v54, %v1126_v17  ;;  %v1256_v22 = vmul.f32 %v3697_v34, %v3959_v4  ;;  %v1490_v11 = vmul.f32 %v3712_v47, %v4096_v55  ;;  %v1370_v12 = vrot.slane %v1254_v23, 2 }
  0xc2   : > { %v1129_v16 = vsel %vm513_vm0, %v1126_v17, %v1128_v60  ;;  %v1207_v1 = vadd.f32 %v1127_v10, %v962_v59  ;;  %v1371_v13 = vrot.slane %v1255_v0, 2  ;;  %v1491_v19 = vmul.f32 %v3712_v47, %v4107_v2 }
  0xc3   : > { %v1208_v15 = vadd.f32 %v1129_v16, %v963_v29  ;;  %v1373_v7 = vrot.slane %v1256_v22, 2  ;;  %v1569_v34 = vmul.f32 %v3723_v62, %v4096_v55  ;;  %v1570_v25 = vmul.f32 %v3723_v62, %v4107_v2  ;;  %v4148_v16 = vld [vmem:[#allocation4 + $0x2] ss:$0 sm:$0xff] }
  0xc4   : > { %v1372_v32 = vsel %vm759_vm1, %v1370_v12, %v1371_v13  ;;  %v1571_v52 = vmul.f32 %v3723_v62, %v4110_v14  ;;  %v1814_v27 = vmul.f32 %v3729_v3, %v4096_v55  ;;  %v1815_v47 = vmul.f32 %v3729_v3, %v4107_v2 }
  0xc5   : > { %v1374_v28 = vsel %vm759_vm1, %v1371_v13, %v1373_v7  ;;  %v1452_v43 = vadd.f32 %v1372_v32, %v1207_v1  ;;  %v1685_v31 = vrot.slane %v1569_v34, 1  ;;  %v1686_v49 = vrot.slane %v1570_v25, 1 }
  0xc6   : > { %v3100_v33 = vpop.eup %3099  ;;  %v1453_v35 = vadd.f32 %v1374_v28, %v1208_v15  ;;  %v1688_v37 = vrot.slane %v1571_v52, 1  ;;  %v1816_v6 = vmul.f32 %v3729_v3, %v4110_v14  ;;  %v1930_v39 = vrot.slane %v1814_v27, 2 }
  0xc7   : > { %v3102_v38 = vpop.eup %3101  ;;  %v2241_v62 = vmul.f32 %v3100_v33, %v3995_v20  ;;  %v1522_v57 = vadd.f32 %v1490_v11, %v1452_v43  ;;  %v1931_v24 = vrot.slane %v1815_v47, 2  ;;  %v1687_v61 = vsel %vm513_vm0, %v1685_v31, %v1686_v49 }
  0xc8   : > { %v2242_v5 = vmul.f32 %v3102_v38, %v3998_v21  ;;  %v1523_v9 = vadd.f32 %v1491_v19, %v1453_v35  ;;  %v1689_v40 = vsel %vm513_vm0, %v1686_v49, %v1688_v37  ;;  %v1933_v42 = vrot.slane %v1816_v6, 2  ;;  %v4139_v21 = vld [vmem:[#allocation4 + $0x1] ss:$0 sm:$0xff]  ;;  %v4166_v35 = vld [vmem:[#allocation4 + $0x4] ss:$0 sm:$0xff] }
  0xc9   : > { %v1767_v41 = vadd.f32 %v1687_v61, %v1522_v57  ;;  %v1932_v36 = vsel %vm759_vm1, %v1930_v39, %v1931_v24  ;;  %v354_v3 = vmul.f32 %v4133_v48, %v3870_v30  ;;  %v355_v53 = vmul.f32 %v4133_v48, %v3877_v46  ;;  %v4172_v37 = vld [vmem:[#allocation4 + $0x5] ss:$0 sm:$0xff]  ;;  %v4182_v61 = vld [vmem:[#allocation2 + $0x78] sm:$0xff] }
  0xca   : > { %v2264_v20 = vpack.c.bf16 %v2242_v5, %v2241_v62  ;;  %v1768_v44 = vadd.f32 %v1689_v40, %v1523_v9  ;;  %v426_v54 = vmul.f32 %v4139_v21, %v3870_v30  ;;  %v1934_v59 = vsel %vm759_vm1, %v1931_v24, %v1933_v42 }
  0xcb   : > { %v3104_v17 = vpop.eup %3103  ;;  %v2012_v60 = vadd.f32 %v1932_v36, %v1767_v41  ;;  %v427_v23 = vmul.f32 %v4139_v21, %v3877_v46  ;;  %v428_v0 = vmul.f32 %v4139_v21, %v3882_v56  ;;  %v672_v1 = vmul.f32 %v4148_v16, %v3870_v30  ;;  %v4184_v36 = vld [vmem:[#allocation4 + $0x6] ss:$0 sm:$0xff] }
  0xcc   : > { %v3106_v29 = vpop.eup %3105  ;;  %2951 = vmatmul.mubr.bf16.vlgmr.msra.gmra.mxu1 %v2264_v20  ;;  %v2163_v10 = vadd.f32 1.0, %v3104_v17  ;;  %v2013_v22 = vadd.f32 %v1934_v59, %v1768_v44  ;;  %v529_v11 = vrot.slane %v426_v54, 1  ;;  %v673_v34 = vmul.f32 %v4148_v16, %v3877_v46  ;;  %v4192_v54 = vld [vmem:[#allocation4 + $0x8] ss:$0 sm:$0xff]  ;;  %v4196_v59 = vld [vmem:[#allocation2 + $0x80] sm:$0xff] }
  0xcd   : > { %v2164_v12 = vadd.f32 1.0, %v3106_v29  ;;  %v4153_v13 = vadd.f32 %v3758_v50, %v2012_v60  ;;  %v530_v15 = vrot.slane %v427_v23, 1  ;;  %v532_v7 = vrot.slane %v428_v0, 1 }
  0xce   : > { %3107 = vrcp.f32 %v2163_v10  ;;  %v4156_v19 = vadd.f32 %v3758_v50, %v2013_v22  ;;  %v674_v32 = vmul.f32 %v4148_v16, %v3882_v56  ;;  %v775_v31 = vrot.slane %v672_v1, 2  ;;  %v4200_v10 = vld [vmem:[#allocation2 + $0x88] sm:$0xff] }
  0xcf   : > { %3109 = vrcp.f32 %v2164_v12  ;;  %v2083_v25 = vsub.f32 0.0, %v4153_v13  ;;  %v531_v30 = vsel %vm513_vm0, %v529_v11, %v530_v15  ;;  %v533_v52 = vsel %vm513_vm0, %v530_v15, %v532_v7  ;;  %v4205_v7 = vld [vmem:[#allocation4 + $0x9] ss:$0 sm:$0xff] }
  0xd0   : > { %v2084_v27 = vsub.f32 0.0, %v4156_v19  ;;  %v632_v28 = vadd.f32 %v531_v30, %v354_v3  ;;  %v633_v43 = vadd.f32 %v533_v52, %v355_v53  ;;  %v776_v47 = vrot.slane %v673_v34, 2 }
  0xd1   : > { %v2135_v50 = vmul.f32 1.442695, %v2083_v25  ;;  %v778_v33 = vrot.slane %v674_v32, 2  ;;  %v916_v46 = vmul.f32 %v4166_v35, %v4022_v58  ;;  %v917_v49 = vmul.f32 %v4166_v35, %v4026_v63 }
  0xd2   : > { %v2137_v56 = vmul.f32 1.442695, %v2084_v27  ;;  %v988_v6 = vmul.f32 %v4172_v37, %v4022_v58  ;;  %v989_v38 = vmul.f32 %v4172_v37, %v4026_v63  ;;  %v777_v62 = vsel %vm759_vm1, %v775_v31, %v776_v47  ;;  %v4214_v27 = vld [vmem:[#allocation4 + $0xa] ss:$0 sm:$0xff] }
  0xd3   : > { %3111 = vpow2.f32 %v2135_v50  ;;  %v779_v57 = vsel %vm759_vm1, %v776_v47, %v778_v33  ;;  %v990_v39 = vmul.f32 %v4172_v37, %v4036_v18  ;;  %v878_v24 = vadd.f32 %v777_v62, %v632_v28 }
  0xd4   : > { %3113 = vpow2.f32 %v2137_v56  ;;  %v879_v5 = vadd.f32 %v779_v57, %v633_v43  ;;  %v1090_v9 = vrot.slane %v988_v6, 1  ;;  %v1091_v40 = vrot.slane %v989_v38, 1 }
  0xd5   : > { %v1093_v41 = vrot.slane %v990_v39, 1  ;;  %v1233_v42 = vmul.f32 %v4184_v36, %v4022_v58  ;;  %v1234_v3 = vmul.f32 %v4184_v36, %v4026_v63  ;;  %v948_v20 = vadd.f32 %v916_v46, %v878_v24 }
  0xd6   : > { %v949_v44 = vadd.f32 %v917_v49, %v879_v5  ;;  %v1235_v53 = vmul.f32 %v4184_v36, %v4036_v18  ;;  %v1476_v17 = vmul.f32 %v4192_v54, %v4182_v61  ;;  %v1092_v60 = vsel %vm513_vm0, %v1090_v9, %v1091_v40 }
  0xd7   : > { %v1094_v23 = vsel %vm513_vm0, %v1091_v40, %v1093_v41  ;;  %v1335_v0 = vrot.slane %v1233_v42, 2  ;;  %v1336_v29 = vrot.slane %v1234_v3, 2  ;;  %v1193_v22 = vadd.f32 %v1092_v60, %v948_v20 }
  0xd8   : > { %v1194_v11 = vadd.f32 %v1094_v23, %v949_v44  ;;  %v1338_v1 = vrot.slane %v1235_v53, 2  ;;  %v1477_v12 = vmul.f32 %v4192_v54, %v4196_v59  ;;  %v1548_v34 = vmul.f32 %v4205_v7, %v4182_v61 }
  0xd9   : > { %v1337_v15 = vsel %vm759_vm1, %v1335_v0, %v1336_v29  ;;  %v1549_v32 = vmul.f32 %v4205_v7, %v4196_v59  ;;  %v1550_v25 = vmul.f32 %v4205_v7, %v4200_v10  ;;  %v1793_v28 = vmul.f32 %v4214_v27, %v4182_v61 }
  0xda   : > { %v1339_v30 = vsel %vm759_vm1, %v1336_v29, %v1338_v1  ;;  %v1438_v52 = vadd.f32 %v1337_v15, %v1193_v22  ;;  %v1794_v43 = vmul.f32 %v4214_v27, %v4196_v59  ;;  %v1650_v47 = vrot.slane %v1548_v34, 1 }
  0xdb   : > { %v3108_v31 = vpop.eup %3107  ;;  %v1439_v50 = vadd.f32 %v1339_v30, %v1194_v11  ;;  %v1651_v33 = vrot.slane %v1549_v32, 1  ;;  %v1653_v46 = vrot.slane %v1550_v25, 1  ;;  %v1795_v38 = vmul.f32 %v4214_v27, %v4200_v10  ;;  %v4243_v25 = vld [vmem:[%s5083_s2] ss:$0 sm:$0xff] }
  0xdc   : > { %v3110_v56 = vpop.eup %3109  ;;  %v2227_v49 = vmul.f32 %v3108_v31, %v4073_v26  ;;  %v1508_v6 = vadd.f32 %v1476_v17, %v1438_v52  ;;  %v1895_v62 = vrot.slane %v1793_v28, 2  ;;  %v1896_v40 = vrot.slane %v1794_v43, 2 }
  0xdd   : > { %v2228_v57 = vmul.f32 %v3110_v56, %v4076_v8  ;;  %v1509_v39 = vadd.f32 %v1477_v12, %v1439_v50  ;;  %v1652_v24 = vsel %vm513_vm0, %v1650_v47, %v1651_v33  ;;  %v1654_v5 = vsel %vm513_vm0, %v1651_v33, %v1653_v46 }
  0xde   : > { %v1753_v9 = vadd.f32 %v1652_v24, %v1508_v6  ;;  %v1898_v41 = vrot.slane %v1795_v38, 2  ;;  %v370_v42 = vmul.f32 %v4133_v48, %v3946_v45  ;;  %v371_v20 = vmul.f32 %v4133_v48, %v3948_v51 }
  0xdf   : > { %v2257_v3 = vpack.c.bf16 %v2228_v57, %v2227_v49  ;;  %v1754_v26 = vadd.f32 %v1654_v5, %v1509_v39  ;;  %v450_v44 = vmul.f32 %v4139_v21, %v3946_v45  ;;  %v1897_v53 = vsel %vm759_vm1, %v1895_v62, %v1896_v40 }
  0xe0   : > { %v3112_v8 = vpop.eup %3111  ;;  %v1899_v17 = vsel %vm759_vm1, %v1896_v40, %v1898_v41  ;;  %v451_v60 = vmul.f32 %v4139_v21, %v3948_v51  ;;  %v452_v23 = vmul.f32 %v4139_v21, %v3959_v4  ;;  %v1998_v22 = vadd.f32 %v1897_v53, %v1753_v9 }
  0xe1   : > { %v3114_v0 = vpop.eup %3113  ;;  %2938 = vmatprep.mubr.bf16.mxu0 %v2257_v3  ;;  %v2179_v29 = vadd.f32 1.0, %v3112_v8  ;;  %v1999_v11 = vadd.f32 %v1899_v17, %v1754_v26  ;;  %v569_v1 = vrot.slane %v450_v44, 1  ;;  %v696_v32 = vmul.f32 %v4148_v16, %v3946_v45  ;;  %v4273_v44 = vld [vmem:[#allocation2 + $0x138] sm:$0xff] }
  0xe2   : > { %v2180_v12 = vadd.f32 1.0, %v3114_v0  ;;  %v570_v15 = vrot.slane %v451_v60, 1  ;;  %v572_v34 = vrot.slane %v452_v23, 1  ;;  %v4246_v30 = vadd.f32 %v4243_v25, %v1998_v22 }
  0xe3   : > { %3115 = vrcp.f32 %v2179_v29  ;;  %v4249_v52 = vadd.f32 %v4243_v25, %v1999_v11  ;;  %v697_v28 = vmul.f32 %v4148_v16, %v3948_v51  ;;  %v698_v31 = vmul.f32 %v4148_v16, %v3959_v4  ;;  %v4283_v11 = vld [vmem:[#allocation2 + $0x140] sm:$0xff] }
  0xe4   : > { %3117 = vrcp.f32 %v2180_v12  ;;  %v571_v43 = vsel %vm513_vm0, %v569_v1, %v570_v15  ;;  %v573_v45 = vsel %vm513_vm0, %v570_v15, %v572_v34  ;;  %v2069_v50 = vsub.f32 0.0, %v4246_v30  ;;  %v4285_v1 = vld [vmem:[#allocation2 + $0x148] sm:$0xff] }
  0xe5   : > { %v2070_v47 = vsub.f32 0.0, %v4249_v52  ;;  %v648_v33 = vadd.f32 %v571_v43, %v370_v42  ;;  %v649_v46 = vadd.f32 %v573_v45, %v371_v20  ;;  %v815_v56 = vrot.slane %v696_v32, 2 }
  0xe6   : > { %v816_v49 = vrot.slane %v697_v28, 2  ;;  %v818_v6 = vrot.slane %v698_v31, 2  ;;  %v932_v51 = vmul.f32 %v4166_v35, %v4096_v55  ;;  %v2107_v38 = vmul.f32 1.442695, %v2069_v50 }
  0xe7   : > { %v2109_v62 = vmul.f32 1.442695, %v2070_v47  ;;  %v933_v57 = vmul.f32 %v4166_v35, %v4107_v2  ;;  %v1012_v4 = vmul.f32 %v4172_v37, %v4096_v55  ;;  %v1013_v5 = vmul.f32 %v4172_v37, %v4107_v2 }
  0xe8   : > { %v817_v39 = vsel %vm759_vm1, %v815_v56, %v816_v49  ;;  %v819_v24 = vsel %vm759_vm1, %v816_v49, %v818_v6  ;;  %v1014_v9 = vmul.f32 %v4172_v37, %v4110_v14  ;;  %3119 = vpow2.f32 %v2107_v38 }
  0xe9   : > { %v894_v40 = vadd.f32 %v817_v39, %v648_v33  ;;  %v895_v41 = vadd.f32 %v819_v24, %v649_v46  ;;  %v1130_v42 = vrot.slane %v1012_v4, 1  ;;  %3121 = vpow2.f32 %v2109_v62 }
  0xea   : > { %v1131_v3 = vrot.slane %v1013_v5, 1  ;;  %v1133_v26 = vrot.slane %v1014_v9, 1  ;;  %v1257_v20 = vmul.f32 %v4184_v36, %v4096_v55  ;;  %v1258_v17 = vmul.f32 %v4184_v36, %v4107_v2 }
  0xeb   : > { %v964_v8 = vadd.f32 %v932_v51, %v894_v40  ;;  %v965_v53 = vadd.f32 %v933_v57, %v895_v41  ;;  %v1259_v60 = vmul.f32 %v4184_v36, %v4110_v14  ;;  %v1492_v22 = vmul.f32 %v4192_v54, %v4273_v44 }
  0xec   : > { %v1132_v23 = vsel %vm513_vm0, %v1130_v42, %v1131_v3  ;;  %v1134_v0 = vsel %vm513_vm0, %v1131_v3, %v1133_v26  ;;  %v1375_v29 = vrot.slane %v1257_v20, 2  ;;  %v1376_v34 = vrot.slane %v1258_v17, 2 }
  0xed   : > { %v1209_v12 = vadd.f32 %v1132_v23, %v964_v8  ;;  %v1210_v15 = vadd.f32 %v1134_v0, %v965_v53  ;;  %v1378_v32 = vrot.slane %v1259_v60, 2  ;;  %v1493_v28 = vmul.f32 %v4192_v54, %v4283_v11 }
  0xee   : > { %v1572_v43 = vmul.f32 %v4205_v7, %v4273_v44  ;;  %v1573_v45 = vmul.f32 %v4205_v7, %v4283_v11  ;;  %v1574_v31 = vmul.f32 %v4205_v7, %v4285_v1  ;;  %v1377_v50 = vsel %vm759_vm1, %v1375_v29, %v1376_v34 }
  0xef   : > { %v1379_v47 = vsel %vm759_vm1, %v1376_v34, %v1378_v32  ;;  %v1817_v33 = vmul.f32 %v4214_v27, %v4273_v44  ;;  %v1818_v46 = vmul.f32 %v4214_v27, %v4283_v11  ;;  %v1454_v49 = vadd.f32 %v1377_v50, %v1209_v12 }
  0xf0   : > { %v3116_v56 = vpop.eup %3115  ;;  %v1455_v6 = vadd.f32 %v1379_v47, %v1210_v15  ;;  %v1690_v51 = vrot.slane %v1572_v43, 1  ;;  %v1691_v38 = vrot.slane %v1573_v45, 1  ;;  %v1693_v4 = vrot.slane %v1574_v31, 1 }
  0xf1   : > { %v3118_v62 = vpop.eup %3117  ;;  %v2243_v57 = vmul.f32 %v3116_v56, %v4153_v13  ;;  %v1819_v39 = vmul.f32 %v4214_v27, %v4285_v1  ;;  %v1935_v24 = vrot.slane %v1817_v33, 2  ;;  %v1524_v9 = vadd.f32 %v1492_v22, %v1454_v49 }
  0xf2   : > { %v2244_v5 = vmul.f32 %v3118_v62, %v4156_v19  ;;  %v1525_v40 = vadd.f32 %v1493_v28, %v1455_v6  ;;  %v1692_v41 = vsel %vm513_vm0, %v1690_v51, %v1691_v38  ;;  %v1694_v42 = vsel %vm513_vm0, %v1691_v38, %v1693_v4 }
  0xf3   : > { %v1936_v3 = vrot.slane %v1818_v46, 2  ;;  %v1938_v26 = vrot.slane %v1819_v39, 2  ;;  %v356_v20 = vmul.f32 %v4133_v48, %v4022_v58  ;;  %v1769_v13 = vadd.f32 %v1692_v41, %v1524_v9 }
  0xf4   : > { %v2265_v8 = vpack.c.bf16 %v2244_v5, %v2243_v57  ;;  %v1770_v53 = vadd.f32 %v1694_v42, %v1525_v40  ;;  %v357_v17 = vmul.f32 %v4133_v48, %v4026_v63  ;;  %v429_v23 = vmul.f32 %v4139_v21, %v4022_v58 }
  0xf5   : > { %v1937_v60 = vsel %vm759_vm1, %v1935_v24, %v1936_v3  ;;  %v1939_v19 = vsel %vm759_vm1, %v1936_v3, %v1938_v26  ;;  %v430_v0 = vmul.f32 %v4139_v21, %v4026_v63  ;;  %v3120_v29 = vpop.eup %3119  ;;  %v431_v15 = vmul.f32 %v4139_v21, %v4036_v18 }
  0xf6   : > { %2954 = vmatprep.mubr.bf16.mxu1 %v2265_v8  ;;  %v2014_v22 = vadd.f32 %v1937_v60, %v1769_v13  ;;  %v2015_v12 = vadd.f32 %v1939_v19, %v1770_v53  ;;  %v675_v34 = vmul.f32 %v4148_v16, %v4022_v58  ;;  %v3122_v32 = vpop.eup %3121  ;;  %v2165_v28 = vadd.f32 1.0, %v3120_v29  ;;  %v4353_v29 = vld [vmem:[#allocation2 + $0x98] sm:$0xff] }
  0xf7   : > { %v534_v43 = vrot.slane %v429_v23, 1  ;;  %v535_v45 = vrot.slane %v430_v0, 1  ;;  %v676_v31 = vmul.f32 %v4148_v16, %v4026_v63  ;;  %v2166_v50 = vadd.f32 1.0, %v3122_v32 }
  0xf8   : > { %v4324_v47 = vadd.f32 %v4243_v25, %v2014_v22  ;;  %v4327_v33 = vadd.f32 %v4243_v25, %v2015_v12  ;;  %v537_v46 = vrot.slane %v431_v15, 1  ;;  %3123 = vrcp.f32 %v2165_v28 }
  0xf9   : > { %v536_v56 = vsel %vm513_vm0, %v534_v43, %v535_v45  ;;  %v677_v58 = vmul.f32 %v4148_v16, %v4036_v18  ;;  %v780_v49 = vrot.slane %v675_v34, 2  ;;  %3125 = vrcp.f32 %v2166_v50 }
  0xfa   : > { %v2085_v6 = vsub.f32 0.0, %v4324_v47  ;;  %v2086_v63 = vsub.f32 0.0, %v4327_v33  ;;  %v538_v51 = vsel %vm513_vm0, %v535_v45, %v537_v46  ;;  %v634_v38 = vadd.f32 %v536_v56, %v356_v20 }
  0xfb   : > { %v635_v62 = vadd.f32 %v538_v51, %v357_v17  ;;  %v781_v57 = vrot.slane %v676_v31, 2  ;;  %v783_v4 = vrot.slane %v677_v58, 2  ;;  %v918_v5 = vmul.f32 %v4166_v35, %v4182_v61  ;;  %v4349_v17 = vld [vmem:[#allocation2 + $0x90] sm:$0xff]  ;;  %v4363_v31 = vld [vmem:[#allocation2 + $0xa0] sm:$0xff] }
  0xfc   : > { %v2139_v39 = vmul.f32 1.442695, %v2085_v6  ;;  %v2141_v24 = vmul.f32 1.442695, %v2086_v63  ;;  %v919_v18 = vmul.f32 %v4166_v35, %v4196_v59  ;;  %v991_v41 = vmul.f32 %v4172_v37, %v4182_v61 }
  0xfd   : > { %v782_v9 = vsel %vm759_vm1, %v780_v49, %v781_v57  ;;  %v784_v40 = vsel %vm759_vm1, %v781_v57, %v783_v4  ;;  %v992_v42 = vmul.f32 %v4172_v37, %v4196_v59  ;;  %v993_v20 = vmul.f32 %v4172_v37, %v4200_v10 }
  0xfe   : > { %3127 = vpow2.f32 %v2139_v39  ;;  %v880_v3 = vadd.f32 %v782_v9, %v634_v38  ;;  %v881_v26 = vadd.f32 %v784_v40, %v635_v62  ;;  %v1095_v8 = vrot.slane %v991_v41, 1 }
  0xff   : > { %3129 = vpow2.f32 %v2141_v24  ;;  %v1096_v13 = vrot.slane %v992_v42, 1  ;;  %v1236_v53 = vmul.f32 %v4184_v36, %v4182_v61  ;;  %v1098_v23 = vrot.slane %v993_v20, 1 }
 0x100   : > { %v950_v60 = vadd.f32 %v918_v5, %v880_v3  ;;  %v951_v19 = vadd.f32 %v919_v18, %v881_v26  ;;  %v1237_v0 = vmul.f32 %v4184_v36, %v4196_v59  ;;  %v1238_v12 = vmul.f32 %v4184_v36, %v4200_v10 }
 0x101   : > { %v1097_v22 = vsel %vm513_vm0, %v1095_v8, %v1096_v13  ;;  %v1340_v15 = vrot.slane %v1236_v53, 2  ;;  %v1478_v34 = vmul.f32 %v4192_v54, %v4349_v17  ;;  %v1099_v32 = vsel %vm513_vm0, %v1096_v13, %v1098_v23 }
 0x102   : > { %v1195_v28 = vadd.f32 %v1097_v22, %v950_v60  ;;  %v1341_v43 = vrot.slane %v1237_v0, 2  ;;  %v1479_v45 = vmul.f32 %v4192_v54, %v4353_v29  ;;  %v1196_v50 = vadd.f32 %v1099_v32, %v951_v19 }
 0x103   : > { %v1343_v46 = vrot.slane %v1238_v12, 2  ;;  %v1551_v56 = vmul.f32 %v4205_v7, %v4349_v17  ;;  %v1552_v58 = vmul.f32 %v4205_v7, %v4353_v29  ;;  %v1553_v6 = vmul.f32 %v4205_v7, %v4363_v31 }
 0x104   : > { %v1342_v49 = vsel %vm759_vm1, %v1340_v15, %v1341_v43  ;;  %v1796_v63 = vmul.f32 %v4214_v27, %v4349_v17  ;;  %v1797_v51 = vmul.f32 %v4214_v27, %v4353_v29  ;;  %v1798_v18 = vmul.f32 %v4214_v27, %v4363_v31 }
 0x105   : > { %v1344_v38 = vsel %vm759_vm1, %v1341_v43, %v1343_v46  ;;  %v1440_v62 = vadd.f32 %v1342_v49, %v1195_v28  ;;  %v1655_v57 = vrot.slane %v1551_v56, 1  ;;  %v1656_v4 = vrot.slane %v1552_v58, 1  ;;  %v3124_v39 = vpop.eup %3123 }
 0x106   : > { %v1441_v24 = vadd.f32 %v1344_v38, %v1196_v50  ;;  %v1658_v5 = vrot.slane %v1553_v6, 1  ;;  %v1900_v9 = vrot.slane %v1796_v63, 2  ;;  %v3126_v40 = vpop.eup %3125  ;;  %v2229_v41 = vmul.f32 %v3124_v39, %v4246_v30 }
 0x107   : > { %v1510_v42 = vadd.f32 %v1478_v34, %v1440_v62  ;;  %v1657_v3 = vsel %vm513_vm0, %v1655_v57, %v1656_v4  ;;  %v1901_v26 = vrot.slane %v1797_v51, 2  ;;  %v2230_v20 = vmul.f32 %v3126_v40, %v4249_v52 }
 0x108   : > { %v1511_v8 = vadd.f32 %v1479_v45, %v1441_v24  ;;  %v1659_v13 = vsel %vm513_vm0, %v1656_v4, %v1658_v5  ;;  %v1903_v53 = vrot.slane %v1798_v18, 2  ;;  %v372_v23 = vmul.f32 %v4133_v48, %v4096_v55 }
 0x109   : > { %v1755_v60 = vadd.f32 %v1657_v3, %v1510_v42  ;;  %v1902_v19 = vsel %vm759_vm1, %v1900_v9, %v1901_v26  ;;  %v373_v0 = vmul.f32 %v4133_v48, %v4107_v2  ;;  %v2258_v30 = vpack.c.bf16 %v2230_v20, %v2229_v41 }
 0x10a   : > { %v1756_v22 = vadd.f32 %v1659_v13, %v1511_v8  ;;  %v1904_v12 = vsel %vm759_vm1, %v1901_v26, %v1903_v53  ;;  %v453_v52 = vmul.f32 %v4139_v21, %v4096_v55  ;;  %v454_v32 = vmul.f32 %v4139_v21, %v4107_v2 }
 0x10b   : > { %v3128_v15 = vpop.eup %3127  ;;  %v2000_v34 = vadd.f32 %v1902_v19, %v1755_v60  ;;  %v455_v28 = vmul.f32 %v4139_v21, %v4110_v14  ;;  %v699_v43 = vmul.f32 %v4148_v16, %v4096_v55  ;;  %2939 = vmatmul.mubr.bf16.gmra.mxu0 %v2258_v30  ;;  %v700_v58 = vmul.f32 %v4148_v16, %v4107_v2 }
 0x10c   : > { %v3130_v45 = vpop.eup %3129  ;;  %v2181_v50 = vadd.f32 1.0, %v3128_v15  ;;  %v2001_v46 = vadd.f32 %v1904_v12, %v1756_v22  ;;  %v574_v56 = vrot.slane %v453_v52, 1  ;;  %v575_v63 = vrot.slane %v454_v32, 1 }
 0x10d   : > { %v2182_v49 = vadd.f32 1.0, %v3130_v45  ;;  %v4400_v6 = vadd.f32 %v4243_v25, %v2000_v34  ;;  %v577_v51 = vrot.slane %v455_v28, 1  ;;  %v701_v55 = vmul.f32 %v4148_v16, %v4110_v14 }
 0x10e   : > { %3131 = vrcp.f32 %v2181_v50  ;;  %v4403_v38 = vadd.f32 %v4243_v25, %v2001_v46  ;;  %v820_v62 = vrot.slane %v699_v43, 2  ;;  %v576_v4 = vsel %vm513_vm0, %v574_v56, %v575_v63  ;;  %v4434_v43 = vld [vmem:[#allocation2 + $0x158] sm:$0xff] }
 0x10f   : > { %3133 = vrcp.f32 %v2182_v49  ;;  %v2071_v57 = vsub.f32 0.0, %v4400_v6  ;;  %v578_v2 = vsel %vm513_vm0, %v575_v63, %v577_v51  ;;  %v650_v24 = vadd.f32 %v576_v4, %v372_v23 }
 0x110   : > { %v2072_v39 = vsub.f32 0.0, %v4403_v38  ;;  %v651_v5 = vadd.f32 %v578_v2, %v373_v0  ;;  %v821_v18 = vrot.slane %v700_v58, 2  ;;  %v823_v40 = vrot.slane %v701_v55, 2  ;;  %v4423_v0 = vld [vmem:[#allocation2 + $0x150] sm:$0xff]  ;;  %v4437_v58 = vld [vmem:[#allocation2 + $0x160] sm:$0xff] }
 0x111   : > { %v2111_v9 = vmul.f32 1.442695, %v2071_v57  ;;  %v934_v41 = vmul.f32 %v4166_v35, %v4273_v44  ;;  %v935_v14 = vmul.f32 %v4166_v35, %v4283_v11  ;;  %v1015_v26 = vmul.f32 %v4172_v37, %v4273_v44 }
 0x112   : > { %v2113_v42 = vmul.f32 1.442695, %v2072_v39  ;;  %v822_v3 = vsel %vm759_vm1, %v820_v62, %v821_v18  ;;  %v1016_v20 = vmul.f32 %v4172_v37, %v4283_v11  ;;  %v824_v8 = vsel %vm759_vm1, %v821_v18, %v823_v40 }
 0x113   : > { %3135 = vpow2.f32 %v2111_v9  ;;  %v896_v13 = vadd.f32 %v822_v3, %v650_v24  ;;  %v1017_v53 = vmul.f32 %v4172_v37, %v4285_v1  ;;  %v897_v60 = vadd.f32 %v824_v8, %v651_v5 }
 0x114   : > { %3137 = vpow2.f32 %v2113_v42  ;;  %v1135_v19 = vrot.slane %v1015_v26, 1  ;;  %v1136_v23 = vrot.slane %v1016_v20, 1  ;;  %v1260_v12 = vmul.f32 %v4184_v36, %v4273_v44 }
 0x115   : > { %v966_v30 = vadd.f32 %v934_v41, %v896_v13  ;;  %v1138_v22 = vrot.slane %v1017_v53, 1  ;;  %v1261_v52 = vmul.f32 %v4184_v36, %v4283_v11  ;;  %v967_v15 = vadd.f32 %v935_v14, %v897_v60 }
 0x116   : > { %v1137_v34 = vsel %vm513_vm0, %v1135_v19, %v1136_v23  ;;  %v1262_v32 = vmul.f32 %v4184_v36, %v4285_v1  ;;  %v1494_v28 = vmul.f32 %v4192_v54, %v4423_v0  ;;  %v1380_v46 = vrot.slane %v1260_v12, 2 }
 0x117   : > { %v1139_v45 = vsel %vm513_vm0, %v1136_v23, %v1138_v22  ;;  %v1211_v50 = vadd.f32 %v1137_v34, %v966_v30  ;;  %v1381_v56 = vrot.slane %v1261_v52, 2  ;;  %v1495_v51 = vmul.f32 %v4192_v54, %v4434_v43 }
 0x118   : > { %v1212_v49 = vadd.f32 %v1139_v45, %v967_v15  ;;  %v1383_v63 = vrot.slane %v1262_v32, 2  ;;  %v1575_v55 = vmul.f32 %v4205_v7, %v4423_v0  ;;  %v1576_v57 = vmul.f32 %v4205_v7, %v4434_v43 }
 0x119   : > { %v1382_v62 = vsel %vm759_vm1, %v1380_v46, %v1381_v56  ;;  %v1577_v4 = vmul.f32 %v4205_v7, %v4437_v58  ;;  %v1820_v2 = vmul.f32 %v4214_v27, %v4423_v0  ;;  %v1821_v18 = vmul.f32 %v4214_v27, %v4434_v43 }
 0x11a   : > { %v1384_v39 = vsel %vm759_vm1, %v1381_v56, %v1383_v63  ;;  %v1456_v24 = vadd.f32 %v1382_v62, %v1211_v50  ;;  %v1695_v5 = vrot.slane %v1575_v55, 1  ;;  %v1696_v41 = vrot.slane %v1576_v57, 1 }
 0x11b   : > { %v3132_v9 = vpop.eup %3131  ;;  %v1457_v40 = vadd.f32 %v1384_v39, %v1212_v49  ;;  %v1698_v14 = vrot.slane %v1577_v4, 1  ;;  %v1822_v42 = vmul.f32 %v4214_v27, %v4437_v58  ;;  %v1940_v8 = vrot.slane %v1820_v2, 2 }
 0x11c   : > { %v3134_v3 = vpop.eup %3133  ;;  %v2245_v26 = vmul.f32 %v3132_v9, %v4324_v47  ;;  %v1526_v20 = vadd.f32 %v1494_v28, %v1456_v24  ;;  %v1941_v13 = vrot.slane %v1821_v18, 2  ;;  %v1697_v19 = vsel %vm513_vm0, %v1695_v5, %v1696_v41 }
 0x11d   : > { %v2246_v53 = vmul.f32 %v3134_v3, %v4327_v33  ;;  %v1527_v60 = vadd.f32 %v1495_v51, %v1457_v40  ;;  %v1699_v23 = vsel %vm513_vm0, %v1696_v41, %v1698_v14  ;;  %v1943_v12 = vrot.slane %v1822_v42, 2 }
 0x11e   : > { %v1771_v30 = vadd.f32 %v1697_v19, %v1526_v20  ;;  %v1942_v22 = vsel %vm759_vm1, %v1940_v8, %v1941_v13  ;;  %v358_v52 = vmul.f32 %v4133_v48, %v4182_v61  ;;  %v359_v47 = vmul.f32 %v4133_v48, %v4196_v59 }
 0x11f   : > { %v2266_v15 = vpack.c.bf16 %v2246_v53, %v2245_v26  ;;  %v1772_v34 = vadd.f32 %v1699_v23, %v1527_v60  ;;  %v432_v33 = vmul.f32 %v4139_v21, %v4182_v61  ;;  %v1944_v28 = vsel %vm759_vm1, %v1941_v13, %v1943_v12 }
 0x120   : > { %v3136_v32 = vpop.eup %3135  ;;  %v2016_v45 = vadd.f32 %v1942_v22, %v1771_v30  ;;  %v433_v50 = vmul.f32 %v4139_v21, %v4196_v59  ;;  %v434_v46 = vmul.f32 %v4139_v21, %v4200_v10  ;;  %v678_v55 = vmul.f32 %v4148_v16, %v4182_v61 }
 0x121   : > { %v3138_v56 = vpop.eup %3137  ;;  %2955 = vmatmul.mubr.bf16.gmra.mxu1 %v2266_v15  ;;  %v2167_v49 = vadd.f32 1.0, %v3136_v32  ;;  %v2017_v63 = vadd.f32 %v1944_v28, %v1772_v34  ;;  %v539_v51 = vrot.slane %v432_v33, 1  ;;  %v679_v24 = vmul.f32 %v4148_v16, %v4196_v59 }
 0x122   : > { %v2168_v62 = vadd.f32 1.0, %v3138_v56  ;;  %v4474_v57 = vadd.f32 %v4243_v25, %v2016_v45  ;;  %v540_v4 = vrot.slane %v433_v50, 1  ;;  %v542_v2 = vrot.slane %v434_v46, 1  ;;  %v4509_v46 = vld [vmem:[#allocation2 + $0xb0] sm:$0xff] }
 0x123   : > { %3139 = vrcp.f32 %v2167_v49  ;;  %v4477_v39 = vadd.f32 %v4243_v25, %v2017_v63  ;;  %v680_v5 = vmul.f32 %v4148_v16, %v4200_v10  ;;  %v785_v42 = vrot.slane %v678_v55, 2  ;;  %v4513_v55 = vld [vmem:[#allocation2 + $0xb8] sm:$0xff] }
 0x124   : > { %3141 = vrcp.f32 %v2168_v62  ;;  %v2087_v18 = vsub.f32 0.0, %v4474_v57  ;;  %v541_v61 = vsel %vm513_vm0, %v539_v51, %v540_v4  ;;  %v543_v9 = vsel %vm513_vm0, %v540_v4, %v542_v2 }
 0x125   : > { %v2088_v40 = vsub.f32 0.0, %v4477_v39  ;;  %v636_v41 = vadd.f32 %v541_v61, %v358_v52  ;;  %v637_v14 = vadd.f32 %v543_v9, %v359_v47  ;;  %v786_v26 = vrot.slane %v679_v24, 2  ;;  %v4499_v52 = vld [vmem:[#allocation2 + $0xa8] sm:$0xff] }
 0x126   : > { %v2143_v3 = vmul.f32 1.442695, %v2087_v18  ;;  %v788_v20 = vrot.slane %v680_v5, 2  ;;  %v920_v59 = vmul.f32 %v4166_v35, %v4349_v17  ;;  %v921_v10 = vmul.f32 %v4166_v35, %v4353_v29 }
 0x127   : > { %v2145_v8 = vmul.f32 1.442695, %v2088_v40  ;;  %v994_v13 = vmul.f32 %v4172_v37, %v4349_v17  ;;  %v995_v53 = vmul.f32 %v4172_v37, %v4353_v29  ;;  %v787_v60 = vsel %vm759_vm1, %v785_v42, %v786_v26 }
 0x128   : > { %3143 = vpow2.f32 %v2143_v3  ;;  %v789_v19 = vsel %vm759_vm1, %v786_v26, %v788_v20  ;;  %v996_v23 = vmul.f32 %v4172_v37, %v4363_v31  ;;  %v882_v30 = vadd.f32 %v787_v60, %v636_v41 }
 0x129   : > { %3145 = vpow2.f32 %v2145_v8  ;;  %v883_v22 = vadd.f32 %v789_v19, %v637_v14  ;;  %v1100_v12 = vrot.slane %v994_v13, 1  ;;  %v1101_v15 = vrot.slane %v995_v53, 1 }
 0x12a   : > { %v1103_v34 = vrot.slane %v996_v23, 1  ;;  %v1239_v47 = vmul.f32 %v4184_v36, %v4349_v17  ;;  %v1240_v33 = vmul.f32 %v4184_v36, %v4353_v29  ;;  %v952_v32 = vadd.f32 %v920_v59, %v882_v30 }
 0x12b   : > { %v953_v28 = vadd.f32 %v921_v10, %v883_v22  ;;  %v1241_v45 = vmul.f32 %v4184_v36, %v4363_v31  ;;  %v1480_v50 = vmul.f32 %v4192_v54, %v4499_v52  ;;  %v1102_v56 = vsel %vm513_vm0, %v1100_v12, %v1101_v15 }
 0x12c   : > { %v1104_v49 = vsel %vm513_vm0, %v1101_v15, %v1103_v34  ;;  %v1345_v63 = vrot.slane %v1239_v47, 2  ;;  %v1346_v51 = vrot.slane %v1240_v33, 2  ;;  %v1197_v62 = vadd.f32 %v1102_v56, %v952_v32 }
 0x12d   : > { %v1198_v4 = vadd.f32 %v1104_v49, %v953_v28  ;;  %v1348_v2 = vrot.slane %v1241_v45, 2  ;;  %v1481_v24 = vmul.f32 %v4192_v54, %v4509_v46  ;;  %v1554_v18 = vmul.f32 %v4205_v7, %v4499_v52 }
 0x12e   : > { %v1347_v5 = vsel %vm759_vm1, %v1345_v63, %v1346_v51  ;;  %v1555_v61 = vmul.f32 %v4205_v7, %v4509_v46  ;;  %v1556_v9 = vmul.f32 %v4205_v7, %v4513_v55  ;;  %v1799_v14 = vmul.f32 %v4214_v27, %v4499_v52 }
 0x12f   : > { %v1349_v40 = vsel %vm759_vm1, %v1346_v51, %v1348_v2  ;;  %v1442_v41 = vadd.f32 %v1347_v5, %v1197_v62  ;;  %v1800_v42 = vmul.f32 %v4214_v27, %v4509_v46  ;;  %v1660_v20 = vrot.slane %v1554_v18, 1 }
 0x130   : > { %v3140_v3 = vpop.eup %3139  ;;  %v1443_v26 = vadd.f32 %v1349_v40, %v1198_v4  ;;  %v1661_v59 = vrot.slane %v1555_v61, 1  ;;  %v1663_v8 = vrot.slane %v1556_v9, 1  ;;  %v1801_v60 = vmul.f32 %v4214_v27, %v4513_v55 }
 0x131   : > { %v3142_v10 = vpop.eup %3141  ;;  %v2231_v13 = vmul.f32 %v3140_v3, %v4400_v6  ;;  %v1512_v53 = vadd.f32 %v1480_v50, %v1442_v41  ;;  %v1905_v19 = vrot.slane %v1799_v14, 2  ;;  %v1906_v34 = vrot.slane %v1800_v42, 2 }
 0x132   : > { %v2232_v23 = vmul.f32 %v3142_v10, %v4403_v38  ;;  %v1513_v30 = vadd.f32 %v1481_v24, %v1443_v26  ;;  %v1662_v22 = vsel %vm513_vm0, %v1660_v20, %v1661_v59  ;;  %v1664_v12 = vsel %vm513_vm0, %v1661_v59, %v1663_v8 }
 0x133   : > { %v1757_v15 = vadd.f32 %v1662_v22, %v1512_v53  ;;  %v1908_v47 = vrot.slane %v1801_v60, 2  ;;  %v374_v33 = vmul.f32 %v4133_v48, %v4273_v44  ;;  %v375_v28 = vmul.f32 %v4133_v48, %v4283_v11 }
 0x134   : > { %v2259_v32 = vpack.c.bf16 %v2232_v23, %v2231_v13  ;;  %v1758_v6 = vadd.f32 %v1664_v12, %v1513_v30  ;;  %v456_v45 = vmul.f32 %v4139_v21, %v4273_v44  ;;  %v1907_v50 = vsel %vm759_vm1, %v1905_v19, %v1906_v34 }
 0x135   : > { %v3144_v38 = vpop.eup %3143  ;;  %v1909_v56 = vsel %vm759_vm1, %v1906_v34, %v1908_v47  ;;  %v457_v49 = vmul.f32 %v4139_v21, %v4283_v11  ;;  %v458_v63 = vmul.f32 %v4139_v21, %v4285_v1  ;;  %v2002_v4 = vadd.f32 %v1907_v50, %v1757_v15 }
 0x136   : > { %v3146_v51 = vpop.eup %3145  ;;  %2942 = vmatprep.mubr.bf16.mxu0 %v2259_v32  ;;  %v2183_v62 = vadd.f32 1.0, %v3144_v38  ;;  %v2003_v2 = vadd.f32 %v1909_v56, %v1758_v6  ;;  %v579_v48 = vrot.slane %v456_v45, 1  ;;  %v702_v61 = vmul.f32 %v4148_v16, %v4273_v44 }
 0x137   : > { %v2184_v24 = vadd.f32 1.0, %v3146_v51  ;;  %v580_v5 = vrot.slane %v457_v49, 1  ;;  %v582_v18 = vrot.slane %v458_v63, 1  ;;  %v4550_v9 = vadd.f32 %v4243_v25, %v2002_v4  ;;  %v4587_v49 = vld [vmem:[#allocation2 + $0x170] sm:$0xff]  ;;  %v4589_v63 = vld [vmem:[#allocation2 + $0x178] sm:$0xff] }
 0x138   : > { %3147 = vrcp.f32 %v2183_v62  ;;  %v4553_v40 = vadd.f32 %v4243_v25, %v2003_v2  ;;  %v703_v21 = vmul.f32 %v4148_v16, %v4283_v11  ;;  %v704_v42 = vmul.f32 %v4148_v16, %v4285_v1 }
 0x139   : > { %3149 = vrcp.f32 %v2184_v24  ;;  %v581_v41 = vsel %vm513_vm0, %v579_v48, %v580_v5  ;;  %v583_v14 = vsel %vm513_vm0, %v580_v5, %v582_v18  ;;  %v2073_v44 = vsub.f32 0.0, %v4550_v9 }
 0x13a   : > { %v2074_v3 = vsub.f32 0.0, %v4553_v40  ;;  %v652_v26 = vadd.f32 %v581_v41, %v374_v33  ;;  %v653_v20 = vadd.f32 %v583_v14, %v375_v28  ;;  %v825_v59 = vrot.slane %v702_v61, 2  ;;  %v4577_v33 = vld [vmem:[#allocation2 + $0x168] sm:$0xff] }
 0x13b   : > { %v826_v8 = vrot.slane %v703_v21, 2  ;;  %v828_v10 = vrot.slane %v704_v42, 2  ;;  %v936_v11 = vmul.f32 %v4166_v35, %v4423_v0  ;;  %v2115_v13 = vmul.f32 1.442695, %v2073_v44 }
 0x13c   : > { %v2117_v53 = vmul.f32 1.442695, %v2074_v3  ;;  %v937_v60 = vmul.f32 %v4166_v35, %v4434_v43  ;;  %v1018_v16 = vmul.f32 %v4172_v37, %v4423_v0  ;;  %v1019_v23 = vmul.f32 %v4172_v37, %v4434_v43 }
 0x13d   : > { %v827_v1 = vsel %vm759_vm1, %v825_v59, %v826_v8  ;;  %v829_v19 = vsel %vm759_vm1, %v826_v8, %v828_v10  ;;  %v1020_v30 = vmul.f32 %v4172_v37, %v4437_v58  ;;  %3151 = vpow2.f32 %v2115_v13 }
 0x13e   : > { %v898_v22 = vadd.f32 %v827_v1, %v652_v26  ;;  %v899_v12 = vadd.f32 %v829_v19, %v653_v20  ;;  %v1140_v15 = vrot.slane %v1018_v16, 1  ;;  %3153 = vpow2.f32 %v2117_v53  ;;  %v4611_v19 = vld [vmem:[#allocation4] ss:$0 sm:$0xff] }
 0x13f   : > { %v1141_v34 = vrot.slane %v1019_v23, 1  ;;  %v1143_v35 = vrot.slane %v1020_v30, 1  ;;  %v1263_v47 = vmul.f32 %v4184_v36, %v4423_v0  ;;  %v1264_v28 = vmul.f32 %v4184_v36, %v4434_v43 }
 0x140   : > { %v968_v32 = vadd.f32 %v936_v11, %v898_v22  ;;  %v969_v6 = vadd.f32 %v937_v60, %v899_v12  ;;  %v1265_v37 = vmul.f32 %v4184_v36, %v4437_v58  ;;  %v1496_v56 = vmul.f32 %v4192_v54, %v4577_v33 }
 0x141   : > { %v1142_v45 = vsel %vm513_vm0, %v1140_v15, %v1141_v34  ;;  %v1144_v38 = vsel %vm513_vm0, %v1141_v34, %v1143_v35  ;;  %v1385_v50 = vrot.slane %v1263_v47, 2  ;;  %v1386_v4 = vrot.slane %v1264_v28, 2  ;;  %v4619_v15 = vld [vmem:[#allocation4 + $0x1] ss:$0 sm:$0xff] }
 0x142   : > { %v1213_v51 = vadd.f32 %v1142_v45, %v968_v32  ;;  %v1214_v62 = vadd.f32 %v1144_v38, %v969_v6  ;;  %v1388_v2 = vrot.slane %v1265_v37, 2  ;;  %v1497_v48 = vmul.f32 %v4192_v54, %v4587_v49  ;;  %v4627_v37 = vld [vmem:[#allocation4 + $0x2] ss:$0 sm:$0xff] }
 0x143   : > { %v1578_v36 = vmul.f32 %v4205_v7, %v4577_v33  ;;  %v1579_v24 = vmul.f32 %v4205_v7, %v4587_v49  ;;  %v1580_v5 = vmul.f32 %v4205_v7, %v4589_v63  ;;  %v1387_v18 = vsel %vm759_vm1, %v1385_v50, %v1386_v4 }
 0x144   : > { %v1389_v61 = vsel %vm759_vm1, %v1386_v4, %v1388_v2  ;;  %v1823_v21 = vmul.f32 %v4214_v27, %v4577_v33  ;;  %v1824_v41 = vmul.f32 %v4214_v27, %v4587_v49  ;;  %v1458_v14 = vadd.f32 %v1387_v18, %v1213_v51 }
 0x145   : > { %v3148_v54 = vpop.eup %3147  ;;  %v1459_v42 = vadd.f32 %v1389_v61, %v1214_v62  ;;  %v1700_v44 = vrot.slane %v1578_v36, 1  ;;  %v1701_v3 = vrot.slane %v1579_v24, 1  ;;  %v1703_v59 = vrot.slane %v1580_v5, 1 }
 0x146   : > { %v3150_v26 = vpop.eup %3149  ;;  %v2247_v20 = vmul.f32 %v3148_v54, %v4474_v57  ;;  %v1825_v7 = vmul.f32 %v4214_v27, %v4589_v63  ;;  %v1945_v8 = vrot.slane %v1823_v21, 2  ;;  %v1528_v11 = vadd.f32 %v1496_v56, %v1458_v14 }
 0x147   : > { %v2248_v10 = vmul.f32 %v3150_v26, %v4477_v39  ;;  %v1529_v13 = vadd.f32 %v1497_v48, %v1459_v42  ;;  %v1702_v53 = vsel %vm513_vm0, %v1700_v44, %v1701_v3  ;;  %v1704_v60 = vsel %vm513_vm0, %v1701_v3, %v1703_v59  ;;  %v4645_v44 = vld [vmem:[#allocation4 + $0x4] ss:$0 sm:$0xff]  ;;  %v4653_v59 = vld [vmem:[#allocation4 + $0x5] ss:$0 sm:$0xff] }
 0x148   : > { %v1946_v16 = vrot.slane %v1824_v41, 2  ;;  %v1948_v1 = vrot.slane %v1825_v7, 2  ;;  %v360_v57 = vmul.f32 %v4611_v19, %v4349_v17  ;;  %v1773_v30 = vadd.f32 %v1702_v53, %v1528_v11 }
 0x149   : > { %v2267_v23 = vpack.c.bf16 %v2248_v10, %v2247_v20  ;;  %v1774_v22 = vadd.f32 %v1704_v60, %v1529_v13  ;;  %v361_v27 = vmul.f32 %v4611_v19, %v4353_v29  ;;  %v435_v34 = vmul.f32 %v4619_v15, %v4349_v17 }
 0x14a   : > { %v1947_v39 = vsel %vm759_vm1, %v1945_v8, %v1946_v16  ;;  %v1949_v12 = vsel %vm759_vm1, %v1946_v16, %v1948_v1  ;;  %v436_v35 = vmul.f32 %v4619_v15, %v4353_v29  ;;  %v3152_v47 = vpop.eup %3151  ;;  %v437_v28 = vmul.f32 %v4619_v15, %v4363_v31  ;;  %v4661_v16 = vld [vmem:[#allocation4 + $0x6] ss:$0 sm:$0xff] }
 0x14b   : > { %2958 = vmatprep.mubr.bf16.mxu1 %v2267_v23  ;;  %v2018_v32 = vadd.f32 %v1947_v39, %v1773_v30  ;;  %v2019_v6 = vadd.f32 %v1949_v12, %v1774_v22  ;;  %v681_v45 = vmul.f32 %v4627_v37, %v4349_v17  ;;  %v3154_v38 = vpop.eup %3153  ;;  %v2169_v50 = vadd.f32 1.0, %v3152_v47 }
 0x14c   : > { %v544_v56 = vrot.slane %v435_v34, 1  ;;  %v545_v51 = vrot.slane %v436_v35, 1  ;;  %v682_v62 = vmul.f32 %v4627_v37, %v4353_v29  ;;  %v2170_v4 = vadd.f32 1.0, %v3154_v38  ;;  %v4670_v34 = vld [vmem:[#allocation4 + $0x8] ss:$0 sm:$0xff]  ;;  %v4672_v35 = vld [vmem:[#allocation2 + $0xc0] sm:$0xff] }
 0x14d   : > { %v4634_v2 = vadd.f32 %v4243_v25, %v2018_v32  ;;  %v4637_v48 = vadd.f32 %v4243_v25, %v2019_v6  ;;  %v547_v36 = vrot.slane %v437_v28, 1  ;;  %3155 = vrcp.f32 %v2169_v50 }
 0x14e   : > { %v546_v24 = vsel %vm513_vm0, %v544_v56, %v545_v51  ;;  %v683_v17 = vmul.f32 %v4627_v37, %v4363_v31  ;;  %v790_v5 = vrot.slane %v681_v45, 2  ;;  %3157 = vrcp.f32 %v2170_v4  ;;  %v4677_v45 = vld [vmem:[#allocation2 + $0xc8] sm:$0xff] }
 0x14f   : > { %v2089_v18 = vsub.f32 0.0, %v4634_v2  ;;  %v2090_v29 = vsub.f32 0.0, %v4637_v48  ;;  %v548_v61 = vsel %vm513_vm0, %v545_v51, %v547_v36  ;;  %v638_v21 = vadd.f32 %v546_v24, %v360_v57  ;;  %v4681_v51 = vld [vmem:[#allocation4 + $0x9] ss:$0 sm:$0xff]  ;;  %v4688_v24 = vld [vmem:[#allocation2 + $0xd0] sm:$0xff] }
 0x150   : > { %v639_v41 = vadd.f32 %v548_v61, %v361_v27  ;;  %v791_v54 = vrot.slane %v682_v62, 2  ;;  %v793_v25 = vrot.slane %v683_v17, 2  ;;  %v922_v3 = vmul.f32 %v4645_v44, %v4499_v52 }
 0x151   : > { %v2147_v14 = vmul.f32 1.442695, %v2089_v18  ;;  %v2149_v42 = vmul.f32 1.442695, %v2090_v29  ;;  %v923_v31 = vmul.f32 %v4645_v44, %v4509_v46  ;;  %v997_v7 = vmul.f32 %v4653_v59, %v4499_v52 }
 0x152   : > { %v792_v26 = vsel %vm759_vm1, %v790_v5, %v791_v54  ;;  %v794_v20 = vsel %vm759_vm1, %v791_v54, %v793_v25  ;;  %v998_v8 = vmul.f32 %v4653_v59, %v4509_v46  ;;  %v999_v13 = vmul.f32 %v4653_v59, %v4513_v55  ;;  %v4692_v5 = vld [vmem:[#allocation4 + $0xa] ss:$0 sm:$0xff] }
 0x153   : > { %3159 = vpow2.f32 %v2147_v14  ;;  %v884_v10 = vadd.f32 %v792_v26, %v638_v21  ;;  %v885_v11 = vadd.f32 %v794_v20, %v639_v41  ;;  %v1105_v53 = vrot.slane %v997_v7, 1 }
 0x154   : > { %3161 = vpow2.f32 %v2149_v42  ;;  %v1106_v60 = vrot.slane %v998_v8, 1  ;;  %v1242_v1 = vmul.f32 %v4661_v16, %v4499_v52  ;;  %v1108_v30 = vrot.slane %v999_v13, 1 }
 0x155   : > { %v954_v57 = vadd.f32 %v922_v3, %v884_v10  ;;  %v955_v23 = vadd.f32 %v923_v31, %v885_v11  ;;  %v1243_v22 = vmul.f32 %v4661_v16, %v4509_v46  ;;  %v1244_v39 = vmul.f32 %v4661_v16, %v4513_v55 }
 0x156   : > { %v1107_v27 = vsel %vm513_vm0, %v1105_v53, %v1106_v60  ;;  %v1350_v12 = vrot.slane %v1242_v1, 2  ;;  %v1482_v47 = vmul.f32 %v4672_v35, %v4670_v34  ;;  %v1109_v32 = vsel %vm513_vm0, %v1106_v60, %v1108_v30 }
 0x157   : > { %v1199_v6 = vadd.f32 %v1107_v27, %v954_v57  ;;  %v1351_v28 = vrot.slane %v1243_v22, 2  ;;  %v1483_v38 = vmul.f32 %v4677_v45, %v4670_v34  ;;  %v1200_v50 = vadd.f32 %v1109_v32, %v955_v23 }
 0x158   : > { %v1353_v56 = vrot.slane %v1244_v39, 2  ;;  %v1557_v62 = vmul.f32 %v4681_v51, %v4672_v35  ;;  %v1558_v4 = vmul.f32 %v4681_v51, %v4677_v45  ;;  %v1559_v17 = vmul.f32 %v4688_v24, %v4681_v51 }
 0x159   : > { %v1352_v36 = vsel %vm759_vm1, %v1350_v12, %v1351_v28  ;;  %v1802_v18 = vmul.f32 %v4692_v5, %v4672_v35  ;;  %v1803_v29 = vmul.f32 %v4692_v5, %v4677_v45  ;;  %v1804_v3 = vmul.f32 %v4692_v5, %v4688_v24 }
 0x15a   : > { %v1354_v61 = vsel %vm759_vm1, %v1351_v28, %v1353_v56  ;;  %v1444_v21 = vadd.f32 %v1352_v36, %v1199_v6  ;;  %v1665_v41 = vrot.slane %v1557_v62, 1  ;;  %v1666_v54 = vrot.slane %v1558_v4, 1  ;;  %v3156_v25 = vpop.eup %3155  ;;  %v4724_v36 = vld [vmem:[%s5083_s2] ss:$0 sm:$0xff] }
 0x15b   : > { %v1445_v14 = vadd.f32 %v1354_v61, %v1200_v50  ;;  %v1668_v42 = vrot.slane %v1559_v17, 1  ;;  %v1910_v31 = vrot.slane %v1802_v18, 2  ;;  %v3158_v26 = vpop.eup %3157  ;;  %v2233_v20 = vmul.f32 %v3156_v25, %v4550_v9 }
 0x15c   : > { %v1514_v7 = vadd.f32 %v1482_v47, %v1444_v21  ;;  %v1667_v8 = vsel %vm513_vm0, %v1665_v41, %v1666_v54  ;;  %v1911_v10 = vrot.slane %v1803_v29, 2  ;;  %v2234_v11 = vmul.f32 %v3158_v26, %v4553_v40 }
 0x15d   : > { %v1515_v13 = vadd.f32 %v1483_v38, %v1445_v14  ;;  %v1669_v53 = vsel %vm513_vm0, %v1666_v54, %v1668_v42  ;;  %v1913_v60 = vrot.slane %v1804_v3, 2  ;;  %v376_v23 = vmul.f32 %v4611_v19, %v4423_v0 }
 0x15e   : > { %v1759_v1 = vadd.f32 %v1667_v8, %v1514_v7  ;;  %v1912_v57 = vsel %vm759_vm1, %v1910_v31, %v1911_v10  ;;  %v377_v30 = vmul.f32 %v4611_v19, %v4434_v43  ;;  %v2260_v9 = vpack.c.bf16 %v2234_v11, %v2233_v20 }
 0x15f   : > { %v1760_v22 = vadd.f32 %v1669_v53, %v1515_v13  ;;  %v1914_v27 = vsel %vm759_vm1, %v1911_v10, %v1913_v60  ;;  %v459_v40 = vmul.f32 %v4619_v15, %v4423_v0  ;;  %v460_v47 = vmul.f32 %v4619_v15, %v4434_v43 }
 0x160   : > { %v3160_v39 = vpop.eup %3159  ;;  %v2004_v12 = vadd.f32 %v1912_v57, %v1759_v1  ;;  %v461_v32 = vmul.f32 %v4619_v15, %v4437_v58  ;;  %v705_v6 = vmul.f32 %v4627_v37, %v4423_v0  ;;  %2943 = vmatmul.mubr.bf16.gmra.mxu0 %v2260_v9  ;;  %v706_v62 = vmul.f32 %v4627_v37, %v4434_v43 }
 0x161   : > { %v3162_v28 = vpop.eup %3161  ;;  %v2185_v38 = vadd.f32 1.0, %v3160_v39  ;;  %v2005_v50 = vadd.f32 %v1914_v27, %v1760_v22  ;;  %v584_v56 = vrot.slane %v459_v40, 1  ;;  %v585_v18 = vrot.slane %v460_v47, 1 }
 0x162   : > { %v2186_v4 = vadd.f32 1.0, %v3162_v28  ;;  %v4727_v17 = vadd.f32 %v4724_v36, %v2004_v12  ;;  %v587_v29 = vrot.slane %v461_v32, 1  ;;  %v707_v61 = vmul.f32 %v4627_v37, %v4437_v58 }
 0x163   : > { %3163 = vrcp.f32 %v2185_v38  ;;  %v4730_v0 = vadd.f32 %v4724_v36, %v2005_v50  ;;  %v830_v21 = vrot.slane %v705_v6, 2  ;;  %v586_v41 = vsel %vm513_vm0, %v584_v56, %v585_v18  ;;  %v4761_v6 = vld [vmem:[#allocation2 + $0x188] sm:$0xff] }
 0x164   : > { %3165 = vrcp.f32 %v2186_v4  ;;  %v2075_v43 = vsub.f32 0.0, %v4727_v17  ;;  %v588_v54 = vsel %vm513_vm0, %v585_v18, %v587_v29  ;;  %v654_v14 = vadd.f32 %v586_v41, %v376_v23 }
 0x165   : > { %v2076_v25 = vsub.f32 0.0, %v4730_v0  ;;  %v655_v42 = vadd.f32 %v588_v54, %v377_v30  ;;  %v831_v3 = vrot.slane %v706_v62, 2  ;;  %v833_v26 = vrot.slane %v707_v61, 2  ;;  %v4750_v30 = vld [vmem:[#allocation2 + $0x180] sm:$0xff]  ;;  %v4764_v62 = vld [vmem:[#allocation2 + $0x190] sm:$0xff] }
 0x166   : > { %v2119_v31 = vmul.f32 1.442695, %v2075_v43  ;;  %v938_v20 = vmul.f32 %v4645_v44, %v4577_v33  ;;  %v939_v58 = vmul.f32 %v4645_v44, %v4587_v49  ;;  %v1021_v10 = vmul.f32 %v4653_v59, %v4577_v33 }
 0x167   : > { %v2121_v7 = vmul.f32 1.442695, %v2076_v25  ;;  %v832_v8 = vsel %vm759_vm1, %v830_v21, %v831_v3  ;;  %v1022_v11 = vmul.f32 %v4653_v59, %v4587_v49  ;;  %v834_v13 = vsel %vm759_vm1, %v831_v3, %v833_v26 }
 0x168   : > { %3167 = vpow2.f32 %v2119_v31  ;;  %v900_v53 = vadd.f32 %v832_v8, %v654_v14  ;;  %v1023_v60 = vmul.f32 %v4653_v59, %v4589_v63  ;;  %v901_v1 = vadd.f32 %v834_v13, %v655_v42 }
 0x169   : > { %3169 = vpow2.f32 %v2121_v7  ;;  %v1145_v57 = vrot.slane %v1021_v10, 1  ;;  %v1146_v23 = vrot.slane %v1022_v11, 1  ;;  %v1266_v27 = vmul.f32 %v4661_v16, %v4577_v33 }
 0x16a   : > { %v970_v9 = vadd.f32 %v938_v20, %v900_v53  ;;  %v1148_v22 = vrot.slane %v1023_v60, 1  ;;  %v1267_v40 = vmul.f32 %v4661_v16, %v4587_v49  ;;  %v971_v39 = vadd.f32 %v939_v58, %v901_v1 }
 0x16b   : > { %v1147_v12 = vsel %vm513_vm0, %v1145_v57, %v1146_v23  ;;  %v1268_v47 = vmul.f32 %v4661_v16, %v4589_v63  ;;  %v1498_v32 = vmul.f32 %v4670_v34, %v4750_v30  ;;  %v1390_v50 = vrot.slane %v1266_v27, 2 }
 0x16c   : > { %v1149_v28 = vsel %vm513_vm0, %v1146_v23, %v1148_v22  ;;  %v1215_v38 = vadd.f32 %v1147_v12, %v970_v9  ;;  %v1391_v56 = vrot.slane %v1267_v40, 2  ;;  %v1499_v29 = vmul.f32 %v4670_v34, %v4761_v6 }
 0x16d   : > { %v1216_v4 = vadd.f32 %v1149_v28, %v971_v39  ;;  %v1393_v18 = vrot.slane %v1268_v47, 2  ;;  %v1581_v61 = vmul.f32 %v4681_v51, %v4750_v30  ;;  %v1582_v43 = vmul.f32 %v4681_v51, %v4761_v6 }
 0x16e   : > { %v1392_v21 = vsel %vm759_vm1, %v1390_v50, %v1391_v56  ;;  %v1583_v41 = vmul.f32 %v4681_v51, %v4764_v62  ;;  %v1826_v54 = vmul.f32 %v4692_v5, %v4750_v30  ;;  %v1827_v3 = vmul.f32 %v4692_v5, %v4761_v6 }
 0x16f   : > { %v1394_v25 = vsel %vm759_vm1, %v1391_v56, %v1393_v18  ;;  %v1460_v14 = vadd.f32 %v1392_v21, %v1215_v38  ;;  %v1705_v42 = vrot.slane %v1581_v61, 1  ;;  %v1706_v20 = vrot.slane %v1582_v43, 1 }
 0x170   : > { %v3164_v31 = vpop.eup %3163  ;;  %v1461_v26 = vadd.f32 %v1394_v25, %v1216_v4  ;;  %v1708_v58 = vrot.slane %v1583_v41, 1  ;;  %v1828_v7 = vmul.f32 %v4692_v5, %v4764_v62  ;;  %v1950_v13 = vrot.slane %v1826_v54, 2 }
 0x171   : > { %v3166_v8 = vpop.eup %3165  ;;  %v2249_v10 = vmul.f32 %v3164_v31, %v4634_v2  ;;  %v1530_v11 = vadd.f32 %v1498_v32, %v1460_v14  ;;  %v1951_v53 = vrot.slane %v1827_v3, 2  ;;  %v1707_v57 = vsel %vm513_vm0, %v1705_v42, %v1706_v20 }
 0x172   : > { %v2250_v60 = vmul.f32 %v3166_v8, %v4637_v48  ;;  %v1531_v1 = vadd.f32 %v1499_v29, %v1461_v26  ;;  %v1709_v23 = vsel %vm513_vm0, %v1706_v20, %v1708_v58  ;;  %v1953_v27 = vrot.slane %v1828_v7, 2 }
 0x173   : > { %v1775_v9 = vadd.f32 %v1707_v57, %v1530_v11  ;;  %v1952_v22 = vsel %vm759_vm1, %v1950_v13, %v1951_v53  ;;  %v362_v40 = vmul.f32 %v4611_v19, %v4499_v52  ;;  %v363_v2 = vmul.f32 %v4611_v19, %v4509_v46 }
 0x174   : > { %v2268_v39 = vpack.c.bf16 %v2250_v60, %v2249_v10  ;;  %v1776_v12 = vadd.f32 %v1709_v23, %v1531_v1  ;;  %v438_v48 = vmul.f32 %v4619_v15, %v4499_v52  ;;  %v1954_v32 = vsel %vm759_vm1, %v1951_v53, %v1953_v27 }
 0x175   : > { %v3168_v47 = vpop.eup %3167  ;;  %v2020_v28 = vadd.f32 %v1952_v22, %v1775_v9  ;;  %v439_v38 = vmul.f32 %v4619_v15, %v4509_v46  ;;  %v440_v50 = vmul.f32 %v4619_v15, %v4513_v55  ;;  %v684_v61 = vmul.f32 %v4627_v37, %v4499_v52 }
 0x176   : > { %v3170_v56 = vpop.eup %3169  ;;  %2959 = vmatmul.mubr.bf16.gmra.mxu1 %v2268_v39  ;;  %v2171_v4 = vadd.f32 1.0, %v3168_v47  ;;  %v2021_v18 = vadd.f32 %v1954_v32, %v1776_v12  ;;  %v549_v29 = vrot.slane %v438_v48, 1  ;;  %v685_v14 = vmul.f32 %v4627_v37, %v4509_v46 }
 0x177   : > { %v2172_v21 = vadd.f32 1.0, %v3170_v56  ;;  %v4801_v43 = vadd.f32 %v4724_v36, %v2020_v28  ;;  %v550_v41 = vrot.slane %v439_v38, 1  ;;  %v552_v54 = vrot.slane %v440_v50, 1  ;;  %v3350_v28 = vld [vmem:[#allocation2 + $0xd8] sm:$0xff] }
 0x178   : > { %3171 = vrcp.f32 %v2171_v4  ;;  %v4804_v25 = vadd.f32 %v4724_v36, %v2021_v18  ;;  %v686_v42 = vmul.f32 %v4627_v37, %v4513_v55  ;;  %v795_v7 = vrot.slane %v684_v61, 2 }
 0x179   : > { %3173 = vrcp.f32 %v2172_v21  ;;  %v2091_v3 = vsub.f32 0.0, %v4801_v43  ;;  %v551_v52 = vsel %vm513_vm0, %v549_v29, %v550_v41  ;;  %v553_v31 = vsel %vm513_vm0, %v550_v41, %v552_v54  ;;  %v3351_v21 = vld [vmem:[#allocation2 + $0xe0] sm:$0xff] }
 0x17a   : > { %v2092_v26 = vsub.f32 0.0, %v4804_v25  ;;  %v640_v20 = vadd.f32 %v551_v52, %v362_v40  ;;  %v641_v58 = vadd.f32 %v553_v31, %v363_v2  ;;  %v796_v10 = vrot.slane %v685_v14, 2  ;;  %v3352_v14 = vld [vmem:[#allocation2 + $0xe8] sm:$0xff] }
 0x17b   : > { %v2151_v8 = vmul.f32 1.442695, %v2091_v3  ;;  %v798_v11 = vrot.slane %v686_v42, 2  ;;  %v924_v46 = vmul.f32 %v4672_v35, %v4645_v44  ;;  %v925_v55 = vmul.f32 %v4677_v45, %v4645_v44 }
 0x17c   : > { %v2153_v13 = vmul.f32 1.442695, %v2092_v26  ;;  %v1000_v53 = vmul.f32 %v4672_v35, %v4653_v59  ;;  %v1001_v60 = vmul.f32 %v4677_v45, %v4653_v59  ;;  %v797_v1 = vsel %vm759_vm1, %v795_v7, %v796_v10 }
 0x17d   : > { %3175 = vpow2.f32 %v2151_v8  ;;  %v799_v57 = vsel %vm759_vm1, %v796_v10, %v798_v11  ;;  %v1002_v23 = vmul.f32 %v4688_v24, %v4653_v59  ;;  %v886_v9 = vadd.f32 %v797_v1, %v640_v20 }
 0x17e   : > { %3177 = vpow2.f32 %v2153_v13  ;;  %v887_v22 = vadd.f32 %v799_v57, %v641_v58  ;;  %v1110_v27 = vrot.slane %v1000_v53, 1  ;;  %v1111_v40 = vrot.slane %v1001_v60, 1 }
 0x17f   : > { %v1113_v39 = vrot.slane %v1002_v23, 1  ;;  %v1245_v12 = vmul.f32 %v4672_v35, %v4661_v16  ;;  %v1246_v2 = vmul.f32 %v4677_v45, %v4661_v16  ;;  %v956_v48 = vadd.f32 %v924_v46, %v886_v9 }
 0x180   : > { %v957_v47 = vadd.f32 %v925_v55, %v887_v22  ;;  %v1247_v32 = vmul.f32 %v4688_v24, %v4661_v16  ;;  %v1484_v38 = vmul.f32 %v3350_v28, %v4670_v34  ;;  %v1112_v50 = vsel %vm513_vm0, %v1110_v27, %v1111_v40 }
 0x181   : > { %v1114_v56 = vsel %vm513_vm0, %v1111_v40, %v1113_v39  ;;  %v1355_v4 = vrot.slane %v1245_v12, 2  ;;  %v1356_v18 = vrot.slane %v1246_v2, 2  ;;  %v1201_v29 = vadd.f32 %v1112_v50, %v956_v48 }
 0x182   : > { %v1202_v61 = vadd.f32 %v1114_v56, %v957_v47  ;;  %v1358_v35 = vrot.slane %v1247_v32, 2  ;;  %v1485_v45 = vmul.f32 %v3351_v21, %v4670_v34  ;;  %v1560_v54 = vmul.f32 %v3350_v28, %v4681_v51 }
 0x183   : > { %v1357_v41 = vsel %vm759_vm1, %v1355_v4, %v1356_v18  ;;  %v1561_v24 = vmul.f32 %v3351_v21, %v4681_v51  ;;  %v1562_v42 = vmul.f32 %v3352_v14, %v4681_v51  ;;  %v1805_v31 = vmul.f32 %v3350_v28, %v4692_v5 }
 0x184   : > { %v1359_v3 = vsel %vm759_vm1, %v1356_v18, %v1358_v35  ;;  %v1446_v52 = vadd.f32 %v1357_v41, %v1201_v29  ;;  %v1806_v26 = vmul.f32 %v3351_v21, %v4692_v5  ;;  %v1670_v7 = vrot.slane %v1560_v54, 1 }
 0x185   : > { %v3172_v20 = vpop.eup %3171  ;;  %v1447_v58 = vadd.f32 %v1359_v3, %v1202_v61  ;;  %v1671_v8 = vrot.slane %v1561_v24, 1  ;;  %v1673_v10 = vrot.slane %v1562_v42, 1  ;;  %v1807_v55 = vmul.f32 %v3352_v14, %v4692_v5 }
 0x186   : > { %v3174_v11 = vpop.eup %3173  ;;  %v2235_v46 = vmul.f32 %v3172_v20, %v4727_v17  ;;  %v1516_v13 = vadd.f32 %v1484_v38, %v1446_v52  ;;  %v1915_v53 = vrot.slane %v1805_v31, 2  ;;  %v1916_v22 = vrot.slane %v1806_v26, 2 }
 0x187   : > { %v2236_v60 = vmul.f32 %v3174_v11, %v4730_v0  ;;  %v1517_v1 = vadd.f32 %v1485_v45, %v1447_v58  ;;  %v1672_v57 = vsel %vm513_vm0, %v1670_v7, %v1671_v8  ;;  %v1674_v23 = vsel %vm513_vm0, %v1671_v8, %v1673_v10 }
 0x188   : > { %v1761_v9 = vadd.f32 %v1672_v57, %v1516_v13  ;;  %v1918_v27 = vrot.slane %v1807_v55, 2  ;;  %v378_v40 = vmul.f32 %v4611_v19, %v4577_v33  ;;  %v379_v17 = vmul.f32 %v4611_v19, %v4587_v49  ;;  %v341_v57 = vld [vmem:[#allocation2 + $0x1a0] sm:$0xff] }
 0x189   : > { %v2261_v39 = vpack.c.bf16 %v2236_v60, %v2235_v46  ;;  %v1762_v12 = vadd.f32 %v1674_v23, %v1517_v1  ;;  %v462_v2 = vmul.f32 %v4619_v15, %v4577_v33  ;;  %v1917_v48 = vsel %vm759_vm1, %v1915_v53, %v1916_v22  ;;  %v340_v46 = vld [vmem:[#allocation2 + $0x198] sm:$0xff]  ;;  %v342_v23 = vld [vmem:[#allocation2 + $0x1a8] sm:$0xff] }
 0x18a   : > { %v3176_v0 = vpop.eup %3175  ;;  %v1919_v47 = vsel %vm759_vm1, %v1916_v22, %v1918_v27  ;;  %v463_v32 = vmul.f32 %v4619_v15, %v4587_v49  ;;  %v464_v28 = vmul.f32 %v4619_v15, %v4589_v63  ;;  %v2006_v56 = vadd.f32 %v1917_v48, %v1761_v9 }
 0x18b   : > { %v3178_v38 = vpop.eup %3177  ;;  %2946 = vmatprep.mubr.bf16.mxu0 %v2261_v39  ;;  %v2187_v50 = vadd.f32 1.0, %v3176_v0  ;;  %v2007_v4 = vadd.f32 %v1919_v47, %v1762_v12  ;;  %v589_v19 = vrot.slane %v462_v2, 1  ;;  %v708_v35 = vmul.f32 %v4627_v37, %v4577_v33  ;;  %v2936_v2 = vpop.f32.mrf.mxu0 }
 0x18c   : > { %v2188_v18 = vadd.f32 1.0, %v3178_v38  ;;  %v590_v29 = vrot.slane %v463_v32, 1  ;;  %v592_v61 = vrot.slane %v464_v28, 1  ;;  %v4863_v21 = vadd.f32 %v4724_v36, %v2006_v56 }
 0x18d   : > { %3179 = vrcp.f32 %v2187_v50  ;;  %v4866_v45 = vadd.f32 %v4724_v36, %v2007_v4  ;;  %v709_v15 = vmul.f32 %v4627_v37, %v4587_v49  ;;  %v710_v24 = vmul.f32 %v4627_v37, %v4589_v63 }
 0x18e   : > { %3181 = vrcp.f32 %v2188_v18  ;;  %v591_v41 = vsel %vm513_vm0, %v589_v19, %v590_v29  ;;  %v593_v54 = vsel %vm513_vm0, %v590_v29, %v592_v61  ;;  %v2077_v33 = vsub.f32 0.0, %v4863_v21 }
 0x18f   : > { %v2078_v14 = vsub.f32 0.0, %v4866_v45  ;;  %v656_v42 = vadd.f32 %v591_v41, %v378_v40  ;;  %v657_v3 = vadd.f32 %v593_v54, %v379_v17  ;;  %v835_v52 = vrot.slane %v708_v35, 2  ;;  %v4908_v35 = vld [vmem:[%s5085_s4] ss:$0 sm:$0xff] }
 0x190   : > { %v836_v31 = vrot.slane %v709_v15, 2  ;;  %v838_v26 = vrot.slane %v710_v24, 2  ;;  %v940_v49 = vmul.f32 %v4645_v44, %v4750_v30  ;;  %v2123_v20 = vmul.f32 1.442695, %v2077_v33 }
 0x191   : > { %v2125_v58 = vmul.f32 1.442695, %v2078_v14  ;;  %v941_v7 = vmul.f32 %v4645_v44, %v4761_v6  ;;  %v1024_v63 = vmul.f32 %v4653_v59, %v4750_v30  ;;  %v1025_v10 = vmul.f32 %v4653_v59, %v4761_v6 }
 0x192   : > { %v837_v37 = vsel %vm759_vm1, %v835_v52, %v836_v31  ;;  %v839_v8 = vsel %vm759_vm1, %v836_v31, %v838_v26  ;;  %v1026_v11 = vmul.f32 %v4653_v59, %v4764_v62  ;;  %3183 = vpow2.f32 %v2123_v20 }
 0x193   : > { %v902_v13 = vadd.f32 %v837_v37, %v656_v42  ;;  %v903_v55 = vadd.f32 %v839_v8, %v657_v3  ;;  %v1150_v53 = vrot.slane %v1024_v63, 1  ;;  %3185 = vpow2.f32 %v2125_v58 }
 0x194   : > { %v1151_v44 = vrot.slane %v1025_v10, 1  ;;  %v1153_v60 = vrot.slane %v1026_v11, 1  ;;  %v1269_v1 = vmul.f32 %v4661_v16, %v4750_v30  ;;  %v1270_v27 = vmul.f32 %v4661_v16, %v4761_v6 }
 0x195   : > { %v972_v9 = vadd.f32 %v940_v49, %v902_v13  ;;  %v973_v22 = vadd.f32 %v941_v7, %v903_v55  ;;  %v1271_v59 = vmul.f32 %v4661_v16, %v4764_v62  ;;  %v1500_v17 = vmul.f32 %v4670_v34, %v340_v46  ;;  %v2952_v62 = vpop.f32.mrf.mxu1 }
 0x196   : > { %v1152_v40 = vsel %vm513_vm0, %v1150_v53, %v1151_v44  ;;  %v1154_v39 = vsel %vm513_vm0, %v1151_v44, %v1153_v60  ;;  %v1395_v12 = vrot.slane %v1269_v1, 2  ;;  %v1396_v48 = vrot.slane %v1270_v27, 2 }
 0x197   : > { %v1217_v0 = vadd.f32 %v1152_v40, %v972_v9  ;;  %v1218_v30 = vadd.f32 %v1154_v39, %v973_v22  ;;  %v1398_v47 = vrot.slane %v1271_v59, 2  ;;  %v1501_v32 = vmul.f32 %v4670_v34, %v341_v57  ;;  %v2440_v31 = vpop.f32.mrf.mxu1 }
 0x198   : > { %v1584_v28 = vmul.f32 %v4681_v51, %v340_v46  ;;  %v1585_v6 = vmul.f32 %v4681_v51, %v341_v57  ;;  %v1586_v16 = vmul.f32 %v4681_v51, %v342_v23  ;;  %v1397_v38 = vsel %vm759_vm1, %v1395_v12, %v1396_v48  ;;  %v2376_v51 = vpop.f32.mrf.mxu0 }
 0x199   : > { %v1399_v50 = vsel %vm759_vm1, %v1396_v48, %v1398_v47  ;;  %v1829_v56 = vmul.f32 %v4692_v5, %v340_v46  ;;  %v1830_v4 = vmul.f32 %v4692_v5, %v341_v57  ;;  %v1462_v18 = vadd.f32 %v1397_v38, %v1217_v0  ;;  %v2953_v60 = vpop.f32.mrf.mxu1 }
 0x19a   : > { %v3180_v19 = vpop.eup %3179  ;;  %v1463_v29 = vadd.f32 %v1399_v50, %v1218_v30  ;;  %v1710_v61 = vrot.slane %v1584_v28, 1  ;;  %v1711_v34 = vrot.slane %v1585_v6, 1  ;;  %v1713_v54 = vrot.slane %v1586_v16, 1  ;;  %v2937_v37 = vpop.f32.mrf.mxu0 }
 0x19b   : > { %v3182_v15 = vpop.eup %3181  ;;  %v2251_v41 = vmul.f32 %v3180_v19, %v4801_v43  ;;  %v1831_v24 = vmul.f32 %v4692_v5, %v342_v23  ;;  %v1955_v33 = vrot.slane %v1829_v56, 2  ;;  %v1532_v42 = vadd.f32 %v1500_v17, %v1462_v18 }
 0x19c   : > { %v2252_v14 = vmul.f32 %v3182_v15, %v4804_v25  ;;  %v1533_v3 = vadd.f32 %v1501_v32, %v1463_v29  ;;  %v1712_v52 = vsel %vm513_vm0, %v1710_v61, %v1711_v34  ;;  %v1714_v26 = vsel %vm513_vm0, %v1711_v34, %v1713_v54  ;;  %v2379_v12 = vpop.f32.mrf.mxu0  ;;  %v2443_v32 = vpop.f32.mrf.mxu1 }
 0x19d   : > { %v1956_v49 = vrot.slane %v1830_v4, 2  ;;  %v1958_v20 = vrot.slane %v1831_v24, 2  ;;  %v4916_v58 = vadd.f32 %v2936_v2, %v4908_v35  ;;  %v1777_v43 = vadd.f32 %v1712_v52, %v1532_v42 }
 0x19e   : > { %v2269_v7 = vpack.c.bf16 %v2252_v14, %v2251_v41  ;;  %v1778_v63 = vadd.f32 %v1714_v26, %v1533_v3  ;;  %v4919_v5 = vadd.f32 %v2952_v62, %v4908_v35  ;;  %v4925_v11 = vadd.f32 %v4908_v35, %v2376_v51 }
 0x19f   : > { %v1957_v25 = vsel %vm759_vm1, %v1955_v33, %v1956_v49  ;;  %v1959_v8 = vsel %vm759_vm1, %v1956_v49, %v1958_v20  ;;  %v2505_v10 = vsub.f32 0.0, %v4916_v58  ;;  %v3184_v46 = vpop.eup %3183  ;;  %v4929_v44 = vadd.f32 %v4908_v35, %v2440_v31 }
 0x1a0   : > { %2962 = vmatprep.mubr.bf16.mxu1 %v2269_v7  ;;  %v2022_v13 = vadd.f32 %v1957_v25, %v1777_v43  ;;  %v2023_v55 = vadd.f32 %v1959_v8, %v1778_v63  ;;  %v2521_v53 = vsub.f32 0.0, %v4919_v5  ;;  %v3186_v1 = vpop.eup %3185  ;;  %v2173_v57 = vadd.f32 1.0, %v3184_v46 }
 0x1a1   : > { %v2539_v23 = vmul.f32 1.442695, %v2505_v10  ;;  %v2503_v9 = vsub.f32 0.0, %v4925_v11  ;;  %v4933_v22 = vadd.f32 %v2937_v37, %v4908_v35  ;;  %v2174_v27 = vadd.f32 1.0, %v3186_v1 }
 0x1a2   : > { %v4936_v59 = vadd.f32 %v4724_v36, %v2022_v13  ;;  %v4939_v40 = vadd.f32 %v4724_v36, %v2023_v55  ;;  %v2571_v39 = vmul.f32 1.442695, %v2521_v53  ;;  %3187 = vrcp.f32 %v2173_v57 }
 0x1a3   : > { %v2535_v17 = vmul.f32 1.442695, %v2503_v9  ;;  %v2519_v2 = vsub.f32 0.0, %v4929_v44  ;;  %v2506_v0 = vsub.f32 0.0, %v4933_v22  ;;  %3189 = vrcp.f32 %v2174_v27 }
 0x1a4   : > { %v2093_v30 = vsub.f32 0.0, %v4936_v59  ;;  %v2094_v48 = vsub.f32 0.0, %v4939_v40  ;;  %v4946_v47 = vadd.f32 %v2953_v60, %v4908_v35  ;;  %3191 = vpow2.f32 %v2539_v23 }
 0x1a5   : > { %v2567_v36 = vmul.f32 1.442695, %v2519_v2  ;;  %v4949_v28 = vadd.f32 %v4908_v35, %v2379_v12  ;;  %3193 = vpow2.f32 %v2571_v39  ;;  %v2541_v38 = vmul.f32 1.442695, %v2506_v0 }
 0x1a6   : > { %v2155_v6 = vmul.f32 1.442695, %v2093_v30  ;;  %v2157_v16 = vmul.f32 1.442695, %v2094_v48  ;;  %v2522_v62 = vsub.f32 0.0, %v4946_v47  ;;  %3195 = vpow2.f32 %v2535_v17 }
 0x1a7   : > { %v2504_v50 = vsub.f32 0.0, %v4949_v28  ;;  %v4954_v56 = vadd.f32 %v4908_v35, %v2443_v32 }
 0x1a8   : > { %3197 = vpow2.f32 %v2155_v6  ;;  %v2573_v4 = vmul.f32 1.442695, %v2522_v62 }
 0x1a9   : > { %3199 = vpow2.f32 %v2157_v16  ;;  %v2537_v19 = vmul.f32 1.442695, %v2504_v50  ;;  %v2520_v18 = vsub.f32 0.0, %v4954_v56 }
 0x1aa   : > { %3201 = vpow2.f32 %v2567_v36 }
 0x1ab   : > { %3203 = vpow2.f32 %v2541_v38  ;;  %v2569_v29 = vmul.f32 1.442695, %v2520_v18 }
 0x1ac   : > { %3205 = vpow2.f32 %v2573_v4 }
 0x1ad   : > { %3207 = vpow2.f32 %v2537_v19 }
 0x1ae   : > { %3209 = vpow2.f32 %v2569_v29 }
 0x1af   : > { %v3188_v61 = vpop.eup %3187 }
 0x1b0   : > { %v3190_v34 = vpop.eup %3189  ;;  %v2237_v51 = vmul.f32 %v3188_v61, %v4863_v21 }
 0x1b1   : > { %v3192_v15 = vpop.eup %3191  ;;  %v2238_v41 = vmul.f32 %v3190_v34, %v4866_v45 }
 0x1b2   : > { %v3194_v54 = vpop.eup %3193  ;;  %v2601_v24 = vadd.f32 1.0, %v3192_v15 }
 0x1b3   : > { %v3196_v33 = vpop.eup %3195  ;;  %v2262_v14 = vpack.c.bf16 %v2238_v41, %v2237_v51  ;;  %v2617_v42 = vadd.f32 1.0, %v3194_v54 }
 0x1b4   : > { %3211 = vrcp.f32 %v2601_v24  ;;  %v2599_v52 = vadd.f32 1.0, %v3196_v33 }
 0x1b5   : > { %v3198_v3 = vpop.eup %3197  ;;  %2947 = vmatmul.mubr.bf16.gmra.mxu0 %v2262_v14  ;;  %3213 = vrcp.f32 %v2617_v42 }
 0x1b6   : > { %v3200_v31 = vpop.eup %3199  ;;  %v2189_v26 = vadd.f32 1.0, %v3198_v3  ;;  %3215 = vrcp.f32 %v2599_v52 }
 0x1b7   : > { %v3202_v49 = vpop.eup %3201  ;;  %v2190_v20 = vadd.f32 1.0, %v3200_v31 }
 0x1b8   : > { %v3204_v7 = vpop.eup %3203  ;;  %3217 = vrcp.f32 %v2189_v26  ;;  %v2615_v21 = vadd.f32 1.0, %v3202_v49 }
 0x1b9   : > { %v3206_v43 = vpop.eup %3205  ;;  %3219 = vrcp.f32 %v2190_v20  ;;  %v2602_v45 = vadd.f32 1.0, %v3204_v7 }
 0x1ba   : > { %v3208_v63 = vpop.eup %3207  ;;  %3221 = vrcp.f32 %v2615_v21  ;;  %v2618_v37 = vadd.f32 1.0, %v3206_v43 }
 0x1bb   : > { %v3210_v25 = vpop.eup %3209  ;;  %3223 = vrcp.f32 %v2602_v45  ;;  %v2600_v8 = vadd.f32 1.0, %v3208_v63 }
 0x1bc   : > { %3225 = vrcp.f32 %v2618_v37  ;;  %v2616_v10 = vadd.f32 1.0, %v3210_v25 }
 0x1bd   : > { %3227 = vrcp.f32 %v2600_v8 }
 0x1be   : > { %3229 = vrcp.f32 %v2616_v10 }
 0x1c1   : > { %v3212_v46 = vpop.eup %3211 }
 0x1c2   : > { %v3214_v13 = vpop.eup %3213  ;;  %v2665_v55 = vmul.f32 %v3212_v46, %v4916_v58 }
 0x1c3   : > { %v3216_v53 = vpop.eup %3215  ;;  %v2681_v60 = vmul.f32 %v3214_v13, %v4919_v5 }
 0x1c4   : > { %2697 = vst [vmem:[%s3665_s11 + $0x10] sm:$0xff] %v2665_v55  ;;  %v2663_v57 = vmul.f32 %v3216_v53, %v4925_v11 }
 0x1c5   : > { %v3218_v1 = vpop.eup %3217  ;;  %2713 = vst [vmem:[%s3665_s11 + $0x90] sm:$0xff] %v2681_v60 }
 0x1c6   : > { %v3220_v23 = vpop.eup %3219  ;;  %v2253_v9 = vmul.f32 %v3218_v1, %v4936_v59  ;;  %2695 = vst [vmem:[%s3665_s11] sm:$0xff] %v2663_v57 }
 0x1c7   : > { %v3222_v27 = vpop.eup %3221  ;;  %v2254_v39 = vmul.f32 %v3220_v23, %v4939_v40 }
 0x1c8   : > { %v3224_v58 = vpop.eup %3223  ;;  %v2679_v12 = vmul.f32 %v3222_v27, %v4929_v44 }
 0x1c9   : > { %v3226_v5 = vpop.eup %3225  ;;  %v2270_v17 = vpack.c.bf16 %v2254_v39, %v2253_v9  ;;  %v2666_v2 = vmul.f32 %v3224_v58, %v4933_v22 }
 0x1ca   : > { %v3228_v11 = vpop.eup %3227  ;;  %2711 = vst [vmem:[%s3665_s11 + $0x80] sm:$0xff] %v2679_v12  ;;  %v2682_v0 = vmul.f32 %v3226_v5, %v4946_v47 }
 0x1cb   : > { %v3230_v59 = vpop.eup %3229  ;;  %2963 = vmatmul.mubr.bf16.gmra.mxu1 %v2270_v17  ;;  %2698 = vst [vmem:[%s3665_s11 + $0x18] sm:$0xff] %v2666_v2  ;;  %v2664_v30 = vmul.f32 %v3228_v11, %v4949_v28  ;;  %v2940_v48 = vpop.f32.mrf.mxu0 }
 0x1cc   : > { %2714 = vst [vmem:[%s3665_s11 + $0x98] sm:$0xff] %v2682_v0  ;;  %v2680_v40 = vmul.f32 %v3230_v59, %v4954_v56  ;;  %v2401_v44 = vadd.f32 %v2940_v48, %v4908_v35 }
 0x1cd   : > { %2696 = vst [vmem:[%s3665_s11 + $0x8] sm:$0xff] %v2664_v30  ;;  %v2392_v32 = vpop.f32.mrf.mxu0 }
 0x1ce   : > { %2712 = vst [vmem:[%s3665_s11 + $0x88] sm:$0xff] %v2680_v40  ;;  %v2509_v36 = vsub.f32 0.0, %v2401_v44  ;;  %v2393_v22 = vadd.f32 %v4908_v35, %v2392_v32 }
 0x1cf   : > { %v2941_v6 = vpop.f32.mrf.mxu0 }
 0x1d0   : > { %v2547_v16 = vmul.f32 1.442695, %v2509_v36  ;;  %v2507_v47 = vsub.f32 0.0, %v2393_v22  ;;  %v2404_v62 = vadd.f32 %v2941_v6, %v4908_v35 }
 0x1d1   : > { %v2395_v38 = vpop.f32.mrf.mxu0 }
 0x1d2   : > { %3231 = vpow2.f32 %v2547_v16  ;;  %v2543_v28 = vmul.f32 1.442695, %v2507_v47  ;;  %v2510_v50 = vsub.f32 0.0, %v2404_v62  ;;  %v2396_v56 = vadd.f32 %v4908_v35, %v2395_v38 }
 0x1d4   : > { %3233 = vpow2.f32 %v2543_v28  ;;  %v2549_v4 = vmul.f32 1.442695, %v2510_v50  ;;  %v2508_v19 = vsub.f32 0.0, %v2396_v56 }
 0x1d6   : > { %3235 = vpow2.f32 %v2549_v4  ;;  %v2545_v18 = vmul.f32 1.442695, %v2508_v19 }
 0x1d8   : > { %3237 = vpow2.f32 %v2545_v18 }
 0x1df   : > { %v3232_v29 = vpop.eup %3231 }
 0x1e0   : > { %v2605_v61 = vadd.f32 1.0, %v3232_v29 }
 0x1e1   : > { %v2956_v34 = vpop.f32.mrf.mxu1  ;;  %v3234_v51 = vpop.eup %3233 }
 0x1e2   : > { %v2465_v15 = vadd.f32 %v2956_v34, %v4908_v35  ;;  %3239 = vrcp.f32 %v2605_v61  ;;  %v2603_v41 = vadd.f32 1.0, %v3234_v51 }
 0x1e3   : > { %v2456_v54 = vpop.f32.mrf.mxu1  ;;  %v3236_v24 = vpop.eup %3235 }
 0x1e4   : > { %v2525_v33 = vsub.f32 0.0, %v2465_v15  ;;  %v2457_v14 = vadd.f32 %v4908_v35, %v2456_v54  ;;  %3241 = vrcp.f32 %v2603_v41  ;;  %v2606_v42 = vadd.f32 1.0, %v3236_v24 }
 0x1e5   : > { %v2957_v3 = vpop.f32.mrf.mxu1  ;;  %v3238_v52 = vpop.eup %3237 }
 0x1e6   : > { %v2579_v31 = vmul.f32 1.442695, %v2525_v33  ;;  %v2523_v26 = vsub.f32 0.0, %v2457_v14  ;;  %v2468_v49 = vadd.f32 %v2957_v3, %v4908_v35  ;;  %3243 = vrcp.f32 %v2606_v42 }
 0x1e7   : > { %v2604_v20 = vadd.f32 1.0, %v3238_v52  ;;  %v2459_v7 = vpop.f32.mrf.mxu1 }
 0x1e8   : > { %3245 = vpow2.f32 %v2579_v31  ;;  %v2575_v21 = vmul.f32 1.442695, %v2523_v26  ;;  %v2526_v43 = vsub.f32 0.0, %v2468_v49  ;;  %v2460_v45 = vadd.f32 %v4908_v35, %v2459_v7 }
 0x1e9   : > { %3247 = vrcp.f32 %v2604_v20 }
 0x1ea   : > { %3249 = vpow2.f32 %v2575_v21  ;;  %v2581_v63 = vmul.f32 1.442695, %v2526_v43  ;;  %v2524_v37 = vsub.f32 0.0, %v2460_v45 }
 0x1ec   : > { %3251 = vpow2.f32 %v2581_v63  ;;  %v2577_v25 = vmul.f32 1.442695, %v2524_v37 }
 0x1ee   : > { %3253 = vpow2.f32 %v2577_v25 }
 0x1ef   : > { %v3240_v8 = vpop.eup %3239 }
 0x1f0   : > { %v2669_v10 = vmul.f32 %v3240_v8, %v2401_v44 }
 0x1f1   : > { %v3242_v46 = vpop.eup %3241 }
 0x1f2   : > { %2701 = vst [vmem:[%s3665_s11 + $0x30] sm:$0xff] %v2669_v10  ;;  %v2667_v13 = vmul.f32 %v3242_v46, %v2393_v22 }
 0x1f3   : > { %v3244_v55 = vpop.eup %3243 }
 0x1f4   : > { %2699 = vst [vmem:[%s3665_s11 + $0x20] sm:$0xff] %v2667_v13  ;;  %v2670_v60 = vmul.f32 %v3244_v55, %v2404_v62 }
 0x1f5   : > { %v3246_v53 = vpop.eup %3245 }
 0x1f6   : > { %v3248_v1 = vpop.eup %3247  ;;  %v2621_v57 = vadd.f32 1.0, %v3246_v53  ;;  %2702 = vst [vmem:[%s3665_s11 + $0x38] sm:$0xff] %v2670_v60 }
 0x1f7   : > { %v3250_v23 = vpop.eup %3249  ;;  %v2668_v9 = vmul.f32 %v3248_v1, %v2396_v56 }
 0x1f8   : > { %3255 = vrcp.f32 %v2621_v57  ;;  %v2619_v27 = vadd.f32 1.0, %v3250_v23 }
 0x1f9   : > { %v3252_v39 = vpop.eup %3251  ;;  %2700 = vst [vmem:[%s3665_s11 + $0x28] sm:$0xff] %v2668_v9 }
 0x1fa   : > { %3257 = vrcp.f32 %v2619_v27  ;;  %v2622_v58 = vadd.f32 1.0, %v3252_v39 }
 0x1fb   : > { %v3254_v12 = vpop.eup %3253 }
 0x1fc   : > { %3259 = vrcp.f32 %v2622_v58  ;;  %v2620_v5 = vadd.f32 1.0, %v3254_v12 }
 0x1fe   : > { %3261 = vrcp.f32 %v2620_v5 }
 0x205   : > { %v3256_v17 = vpop.eup %3255 }
 0x206   : > { %v2685_v2 = vmul.f32 %v3256_v17, %v2465_v15 }
 0x207   : > { %v3258_v11 = vpop.eup %3257 }
 0x208   : > { %2717 = vst [vmem:[%s3665_s11 + $0xb0] sm:$0xff] %v2685_v2  ;;  %v2683_v0 = vmul.f32 %v3258_v11, %v2457_v14 }
 0x209   : > { %v3260_v59 = vpop.eup %3259 }
 0x20a   : > { %2715 = vst [vmem:[%s3665_s11 + $0xa0] sm:$0xff] %v2683_v0  ;;  %v2686_v30 = vmul.f32 %v3260_v59, %v2468_v49 }
 0x20b   : > { %v3262_v40 = vpop.eup %3261 }
 0x20c   : > { %2718 = vst [vmem:[%s3665_s11 + $0xb8] sm:$0xff] %v2686_v30  ;;  %v2684_v48 = vmul.f32 %v3262_v40, %v2460_v45 }
 0x20e   : > { %2716 = vst [vmem:[%s3665_s11 + $0xa8] sm:$0xff] %v2684_v48 }
 0x220   : > { %v2944_v44 = vpop.f32.mrf.mxu0 }
 0x221   : > { %v2417_v32 = vadd.f32 %v2944_v44, %v4908_v35 }
 0x222   : > { %v2408_v36 = vpop.f32.mrf.mxu0 }
 0x223   : > { %v2513_v22 = vsub.f32 0.0, %v2417_v32  ;;  %v2409_v6 = vadd.f32 %v4908_v35, %v2408_v36 }
 0x224   : > { %v2945_v16 = vpop.f32.mrf.mxu0 }
 0x225   : > { %v2555_v47 = vmul.f32 1.442695, %v2513_v22  ;;  %v2511_v62 = vsub.f32 0.0, %v2409_v6  ;;  %v2420_v38 = vadd.f32 %v2945_v16, %v4908_v35 }
 0x226   : > { %v2411_v28 = vpop.f32.mrf.mxu0 }
 0x227   : > { %3263 = vpow2.f32 %v2555_v47  ;;  %v2551_v50 = vmul.f32 1.442695, %v2511_v62  ;;  %v2514_v56 = vsub.f32 0.0, %v2420_v38  ;;  %v2412_v4 = vadd.f32 %v4908_v35, %v2411_v28 }
 0x229   : > { %3265 = vpow2.f32 %v2551_v50  ;;  %v2557_v19 = vmul.f32 1.442695, %v2514_v56  ;;  %v2512_v18 = vsub.f32 0.0, %v2412_v4 }
 0x22b   : > { %3267 = vpow2.f32 %v2557_v19  ;;  %v2553_v29 = vmul.f32 1.442695, %v2512_v18 }
 0x22d   : > { %3269 = vpow2.f32 %v2553_v29 }
 0x234   : > { %v3264_v61 = vpop.eup %3263 }
 0x235   : > { %v2609_v34 = vadd.f32 1.0, %v3264_v61 }
 0x236   : > { %v2960_v51 = vpop.f32.mrf.mxu1  ;;  %v3266_v15 = vpop.eup %3265 }
 0x237   : > { %v2481_v41 = vadd.f32 %v2960_v51, %v4908_v35  ;;  %3271 = vrcp.f32 %v2609_v34  ;;  %v2607_v54 = vadd.f32 1.0, %v3266_v15 }
 0x238   : > { %v2472_v24 = vpop.f32.mrf.mxu1  ;;  %v3268_v33 = vpop.eup %3267 }
 0x239   : > { %v2529_v14 = vsub.f32 0.0, %v2481_v41  ;;  %v2473_v42 = vadd.f32 %v4908_v35, %v2472_v24  ;;  %3273 = vrcp.f32 %v2607_v54  ;;  %v2610_v3 = vadd.f32 1.0, %v3268_v33 }
 0x23a   : > { %v2961_v52 = vpop.f32.mrf.mxu1  ;;  %v3270_v31 = vpop.eup %3269 }
 0x23b   : > { %v2587_v26 = vmul.f32 1.442695, %v2529_v14  ;;  %v2527_v49 = vsub.f32 0.0, %v2473_v42  ;;  %v2484_v20 = vadd.f32 %v2961_v52, %v4908_v35  ;;  %3275 = vrcp.f32 %v2610_v3 }
 0x23c   : > { %v2608_v7 = vadd.f32 1.0, %v3270_v31  ;;  %v2475_v21 = vpop.f32.mrf.mxu1 }
 0x23d   : > { %3277 = vpow2.f32 %v2587_v26  ;;  %v2583_v43 = vmul.f32 1.442695, %v2527_v49  ;;  %v2530_v45 = vsub.f32 0.0, %v2484_v20  ;;  %v2476_v63 = vadd.f32 %v4908_v35, %v2475_v21 }
 0x23e   : > { %3279 = vrcp.f32 %v2608_v7 }
 0x23f   : > { %3281 = vpow2.f32 %v2583_v43  ;;  %v2589_v37 = vmul.f32 1.442695, %v2530_v45  ;;  %v2528_v25 = vsub.f32 0.0, %v2476_v63 }
 0x241   : > { %3283 = vpow2.f32 %v2589_v37  ;;  %v2585_v8 = vmul.f32 1.442695, %v2528_v25 }
 0x243   : > { %3285 = vpow2.f32 %v2585_v8 }
 0x244   : > { %v3272_v10 = vpop.eup %3271 }
 0x245   : > { %v2673_v46 = vmul.f32 %v3272_v10, %v2417_v32 }
 0x246   : > { %v3274_v13 = vpop.eup %3273 }
 0x247   : > { %2705 = vst [vmem:[%s3665_s11 + $0x50] sm:$0xff] %v2673_v46  ;;  %v2671_v55 = vmul.f32 %v3274_v13, %v2409_v6 }
 0x248   : > { %v3276_v53 = vpop.eup %3275 }
 0x249   : > { %2703 = vst [vmem:[%s3665_s11 + $0x40] sm:$0xff] %v2671_v55  ;;  %v2674_v1 = vmul.f32 %v3276_v53, %v2420_v38 }
 0x24a   : > { %v3278_v60 = vpop.eup %3277 }
 0x24b   : > { %v3280_v57 = vpop.eup %3279  ;;  %v2625_v23 = vadd.f32 1.0, %v3278_v60  ;;  %2706 = vst [vmem:[%s3665_s11 + $0x58] sm:$0xff] %v2674_v1 }
 0x24c   : > { %v3282_v9 = vpop.eup %3281  ;;  %v2672_v27 = vmul.f32 %v3280_v57, %v2412_v4 }
 0x24d   : > { %3287 = vrcp.f32 %v2625_v23  ;;  %v2623_v39 = vadd.f32 1.0, %v3282_v9 }
 0x24e   : > { %v3284_v58 = vpop.eup %3283  ;;  %2704 = vst [vmem:[%s3665_s11 + $0x48] sm:$0xff] %v2672_v27 }
 0x24f   : > { %3289 = vrcp.f32 %v2623_v39  ;;  %v2626_v12 = vadd.f32 1.0, %v3284_v58 }
 0x250   : > { %v3286_v5 = vpop.eup %3285 }
 0x251   : > { %3291 = vrcp.f32 %v2626_v12  ;;  %v2624_v17 = vadd.f32 1.0, %v3286_v5 }
 0x253   : > { %3293 = vrcp.f32 %v2624_v17 }
 0x25a   : > { %v3288_v2 = vpop.eup %3287 }
 0x25b   : > { %v2689_v11 = vmul.f32 %v3288_v2, %v2481_v41 }
 0x25c   : > { %v3290_v0 = vpop.eup %3289 }
 0x25d   : > { %2721 = vst [vmem:[%s3665_s11 + $0xd0] sm:$0xff] %v2689_v11  ;;  %v2687_v59 = vmul.f32 %v3290_v0, %v2473_v42 }
 0x25e   : > { %v3292_v30 = vpop.eup %3291 }
 0x25f   : > { %2719 = vst [vmem:[%s3665_s11 + $0xc0] sm:$0xff] %v2687_v59  ;;  %v2690_v40 = vmul.f32 %v3292_v30, %v2484_v20 }
 0x260   : > { %v3294_v48 = vpop.eup %3293 }
 0x261   : > { %2722 = vst [vmem:[%s3665_s11 + $0xd8] sm:$0xff] %v2690_v40  ;;  %v2688_v44 = vmul.f32 %v3294_v48, %v2476_v63 }
 0x263   : > { %2720 = vst [vmem:[%s3665_s11 + $0xc8] sm:$0xff] %v2688_v44 }
 0x275   : > { %v2948_v32 = vpop.f32.mrf.mxu0 }
 0x276   : > { %v2433_v36 = vadd.f32 %v2948_v32, %v4908_v35 }
 0x277   : > { %v2424_v22 = vpop.f32.mrf.mxu0 }
 0x278   : > { %v2517_v6 = vsub.f32 0.0, %v2433_v36  ;;  %v2425_v16 = vadd.f32 %v4908_v35, %v2424_v22 }
 0x279   : > { %v2949_v47 = vpop.f32.mrf.mxu0 }
 0x27a   : > { %v2563_v62 = vmul.f32 1.442695, %v2517_v6  ;;  %v2515_v38 = vsub.f32 0.0, %v2425_v16  ;;  %v2436_v28 = vadd.f32 %v2949_v47, %v4908_v35 }
 0x27b   : > { %v2427_v50 = vpop.f32.mrf.mxu0 }
 0x27c   : > { %3295 = vpow2.f32 %v2563_v62  ;;  %v2559_v56 = vmul.f32 1.442695, %v2515_v38  ;;  %v2518_v4 = vsub.f32 0.0, %v2436_v28  ;;  %v2428_v19 = vadd.f32 %v4908_v35, %v2427_v50 }
 0x27e   : > { %3297 = vpow2.f32 %v2559_v56  ;;  %v2565_v18 = vmul.f32 1.442695, %v2518_v4  ;;  %v2516_v29 = vsub.f32 0.0, %v2428_v19 }
 0x280   : > { %3299 = vpow2.f32 %v2565_v18  ;;  %v2561_v61 = vmul.f32 1.442695, %v2516_v29 }
 0x282   : > { %3301 = vpow2.f32 %v2561_v61 }
 0x289   : > { %v3296_v34 = vpop.eup %3295 }
 0x28a   : > { %v2613_v51 = vadd.f32 1.0, %v3296_v34 }
 0x28b   : > { %v2964_v15 = vpop.f32.mrf.mxu1  ;;  %v3298_v41 = vpop.eup %3297 }
 0x28c   : > { %v2497_v54 = vadd.f32 %v2964_v15, %v4908_v35  ;;  %3303 = vrcp.f32 %v2613_v51  ;;  %v2611_v24 = vadd.f32 1.0, %v3298_v41 }
 0x28d   : > { %v2488_v33 = vpop.f32.mrf.mxu1  ;;  %v3300_v14 = vpop.eup %3299 }
 0x28e   : > { %v2533_v42 = vsub.f32 0.0, %v2497_v54  ;;  %v2489_v3 = vadd.f32 %v4908_v35, %v2488_v33  ;;  %3305 = vrcp.f32 %v2611_v24  ;;  %v2614_v52 = vadd.f32 1.0, %v3300_v14 }
 0x28f   : > { %v2965_v31 = vpop.f32.mrf.mxu1  ;;  %v3302_v26 = vpop.eup %3301 }
 0x290   : > { %v2595_v49 = vmul.f32 1.442695, %v2533_v42  ;;  %v2531_v20 = vsub.f32 0.0, %v2489_v3  ;;  %v2500_v7 = vadd.f32 %v2965_v31, %v4908_v35  ;;  %3307 = vrcp.f32 %v2614_v52 }
 0x291   : > { %v2612_v21 = vadd.f32 1.0, %v3302_v26  ;;  %v2491_v43 = vpop.f32.mrf.mxu1 }
 0x292   : > { %3309 = vpow2.f32 %v2595_v49  ;;  %v2591_v45 = vmul.f32 1.442695, %v2531_v20  ;;  %v2534_v63 = vsub.f32 0.0, %v2500_v7  ;;  %v2492_v37 = vadd.f32 %v4908_v35, %v2491_v43 }
 0x293   : > { %3311 = vrcp.f32 %v2612_v21 }
 0x294   : > { %3313 = vpow2.f32 %v2591_v45  ;;  %v2597_v25 = vmul.f32 1.442695, %v2534_v63  ;;  %v2532_v8 = vsub.f32 0.0, %v2492_v37 }
 0x296   : > { %3315 = vpow2.f32 %v2597_v25  ;;  %v2593_v10 = vmul.f32 1.442695, %v2532_v8 }
 0x298   : > { %3317 = vpow2.f32 %v2593_v10 }
 0x299   : > { %v3304_v46 = vpop.eup %3303 }
 0x29a   : > { %v2677_v13 = vmul.f32 %v3304_v46, %v2433_v36 }
 0x29b   : > { %v3306_v55 = vpop.eup %3305 }
 0x29c   : > { %2709 = vst [vmem:[%s3665_s11 + $0x70] sm:$0xff] %v2677_v13  ;;  %v2675_v53 = vmul.f32 %v3306_v55, %v2425_v16 }
 0x29d   : > { %v3308_v60 = vpop.eup %3307 }
 0x29e   : > { %2707 = vst [vmem:[%s3665_s11 + $0x60] sm:$0xff] %v2675_v53  ;;  %v2678_v57 = vmul.f32 %v3308_v60, %v2436_v28 }
 0x29f   : > { %v3310_v1 = vpop.eup %3309 }
 0x2a0   : > { %v3312_v23 = vpop.eup %3311  ;;  %v2629_v35 = vadd.f32 1.0, %v3310_v1  ;;  %2710 = vst [vmem:[%s3665_s11 + $0x78] sm:$0xff] %v2678_v57 }
 0x2a1   : > { %v3314_v9 = vpop.eup %3313  ;;  %v2676_v27 = vmul.f32 %v3312_v23, %v2428_v19 }
 0x2a2   : > { %3319 = vrcp.f32 %v2629_v35  ;;  %v2627_v39 = vadd.f32 1.0, %v3314_v9 }
 0x2a3   : > { %v3316_v58 = vpop.eup %3315  ;;  %2708 = vst [vmem:[%s3665_s11 + $0x68] sm:$0xff] %v2676_v27 }
 0x2a4   : > { %3321 = vrcp.f32 %v2627_v39  ;;  %v2630_v12 = vadd.f32 1.0, %v3316_v58 }
 0x2a5   : > { %v3318_v5 = vpop.eup %3317 }
 0x2a6   : > { %3323 = vrcp.f32 %v2630_v12  ;;  %v2628_v17 = vadd.f32 1.0, %v3318_v5 }
 0x2a8   : > { %3325 = vrcp.f32 %v2628_v17 }
 0x2af   : > { %v3320_v2 = vpop.eup %3319 }
 0x2b0   : > { %v2693_v11 = vmul.f32 %v3320_v2, %v2497_v54 }
 0x2b1   : > { %v3322_v0 = vpop.eup %3321 }
 0x2b2   : > { %2725 = vst [vmem:[%s3665_s11 + $0xf0] sm:$0xff] %v2693_v11  ;;  %v2691_v59 = vmul.f32 %v3322_v0, %v2489_v3 }
 0x2b3   : > { %v3324_v30 = vpop.eup %3323 }
 0x2b4   : > { %2723 = vst [vmem:[%s3665_s11 + $0xe0] sm:$0xff] %v2691_v59  ;;  %v2694_v40 = vmul.f32 %v3324_v30, %v2500_v7 }
 0x2b5   : > { %v3326_v48 = vpop.eup %3325 }
 0x2b6   : > { %2726 = vst [vmem:[%s3665_s11 + $0xf8] sm:$0xff] %v2694_v40  ;;  %v2692_v44 = vmul.f32 %v3326_v48, %v2492_v37 }
 0x2b8   : > { %2724 = vst [vmem:[%s3665_s11 + $0xe8] sm:$0xff] %v2692_v44 }
 0x2b9   : > { %3440 = shalt.err (!%p3437_p11)
}
 0x2ba   : > { %s3441_s9 = scalar_lea.hbm %s5028_s10, 4096  ;;  %s3445_s16 = scalar_lea.hbm %s5086_s5, 8192 }
 0x2bb   : > { %p3442_p13 = scmp.ne.s32.totalorder %s5028_s10, %s3441_s9  ;;  %p3446_p7 = scmp.lt.s32.totalorder %s5028_s10, %s5086_s5 }
 0x2bc   : > { %p3447_p9 = scmp.lt.s32.totalorder %s3445_s16, %s3441_s9 }
 0x2bd   : > { %p3443_p0 = pnand %p3442_p13, %p5093_p2 }
 0x2be   : > { %p3448_p12 = por %p3447_p9, %p3446_p7 }
 0x2bf   : > { %p3444_p6 = pneg %p3443_p0 }
 0x2c1   : > { %p3449_p1 = pnand %p3448_p12, %p3444_p6 }
 0x2c3   : > { %3452 = shalt.err (!%p3449_p1)
}
 0x2c4   : > { %s3521_s8 = smov 128   ;;  %s3522_s27 = smov 8  }
 0x2c5   : > { %2990 = dma.vmem_to_hbm [thread:$0]  (%p5093_p2), %s5030_s25, 4096, %s5028_s10, %s5036_s21, %s3521_s8, %s3521_s8, %s3522_s27  }
 0x2c6 PF: > { %p3007_p5 = scmp.ge.s32.totalorder %s3513_s23, 2  ;;  %s2759_s29 = sand.u32 1, %s3493_s18  }
 0x2c7   : > { %p5094_p3 = scmp.ne.s32.totalorder %s5089_s30, 0  ;;  %s2760_s7 = scalar_lea.sflag [#allocation6], %s2759_s29 }
 0x2c9   : > { %p3000_p4 = pnand %p3007_p5, %p5094_p3 }
 0x2cb   : > { %p3001_p8 = pneg %p3000_p4 }
 0x2cd   : > { %3488 = dma.done.wait (%p3001_p8), %s2760_s7, 4096  }
 0x2ce   : > { %3490 = vsyncadd (%p3001_p8), %s2760_s7, 4294963200  ;;  %s20_s23 = sadd.s32 1, %s3513_s23   ;;  %s5095_s18 = smov %s3497_s19 }
 0x2cf   : > { %p17_p10 = scmp.ge.s32.totalorder %s20_s23, 4   ;;  %s5096_s19 = smov %s3501_s20 }
 0x2d0   : > { %s5097_s20 = smov %s3606_s6  ;;  %s5098_s21 = smov %s3509_s22 }
 0x2d1   : > { %s5099_s22 = smov %s5101_s26  ;;  %19 = sbr.rel (!%p17_p10) target bundleno = 6 (0x6), region = 102 }
 0x2d6   :  { %2765 = vsyncpa [#allocation5], 1 }
 0x2d7   :  { %2767 = vsyncpa [#allocation5 + $0x1], 1 }
 0x2d8   :  { %2768 = vsyncpa [#allocation8], 1 }
 0x2d9   :  { %2769 = vsyncpa [#allocation6], 1 }
 0x2da   :  { %2771 = vsyncpa [#allocation6 + $0x1], 1 }
 0x2db   :  { %2772 = vsyncmov [#allocation3] }
 0x2de   :  { %s2773_s28 = vpop.sfrf %2772 }
 0x2df   :  { %p2890_p2 = scmp.ne.s32.totalorder %s2773_s28, 0 }
 0x2e1   :  { %2777 = shalt.err (%p2890_p2)  }
 0x2e2   :  { %2779 = vsyncmov [#allocation3 + $0x1] }
 0x2e5   :  { %s2780_s30 = vpop.sfrf %2779 }
 0x2e6   :  { %p2891_p11 = scmp.ne.s32.totalorder %s2780_s30, 0 }
 0x2e8   :  { %2784 = shalt.err (%p2891_p11)  }

</bundles_post_ra>
